<compile_context>
chip_gen: v7x
topology: tpu7x:2x2x1
jax: 0.10.0
libtpu: 0.0.40
codegen_flags: <defaults>
</compile_context>

<pallas_src>
import functools

import jax
import jax.numpy as jnp
from jax.experimental import pallas as pl
from jax.experimental.pallas import tpu as pltpu


def _round_up(a, b):
    return (a + b - 1) // b * b


# ----------------------------------------------------------------------------
# Bilinear interpolation matrix (per axis), matches F.interpolate for upsample.
# ----------------------------------------------------------------------------
def bilinear_matrix(out_size, in_size, align_corners):
    idx = jnp.arange(out_size, dtype=jnp.float32)
    if align_corners and out_size > 1:
        src = idx * (in_size - 1) / (out_size - 1)
    else:
        scale = in_size / out_size
        src = jnp.clip((idx + 0.5) * scale - 0.5, 0.0, float(in_size - 1))
    i0 = jnp.clip(jnp.floor(src).astype(jnp.int32), 0, in_size - 1)
    i1 = jnp.clip(i0 + 1, 0, in_size - 1)
    frac = src - i0.astype(jnp.float32)
    rows = jnp.arange(out_size)
    a = jnp.zeros((out_size, in_size), jnp.float32)
    a = a.at[rows, i0].add(1.0 - frac)
    a = a.at[rows, i1].add(frac)
    return a


# ----------------------------------------------------------------------------
# Fused kernel: (W-resize) -> (1x1 conv * BN-scale + H-resize, one matmul) ->
#               bias/ReLU -> (concat + 3x3 conv + BN + ReLU as ONE im2col dot)
#               -> (3x3 conv + BN + ReLU as ONE im2col dot).
# Layout per image: (C, flat) over a zero-padded (h+4, wp) frame, wp % 128 == 0.
# ----------------------------------------------------------------------------
def upsampling_kernel(x_ref, sc_ref, m1_ref, m2_ref,
                      wk_ref, awpt_ref, b1_ref,
                      w2_ref, b2_ref, w3_ref, b3_ref,
                      o_ref, mid_ref, *, h, w, hp, wp):
    f32 = jnp.float32
    bf16 = jnp.bfloat16
    cout = b1_ref.shape[0]
    c_sc = sc_ref.shape[1]
    lp = hp * wp                  # padded flat length
    lo = h * wp                   # flat length covering all valid output rows
    base = 2 * wp                 # flat offset of the first valid output row

    # ---- W-resize, then fused (1x1 conv * BN-scale) + H-resize (all f32) ----
    t = jnp.dot(x_ref[0], awpt_ref[...], preferred_element_type=f32)    # (cin*hx, wp)
    r = jnp.dot(wk_ref[...], t, preferred_element_type=f32)             # (cout*hp, wp)
    r = r.reshape(cout, lp)
    # BN bias + ReLU; mask keeps the zero frame (conv2's zero padding) exact.
    yf = (jnp.maximum(r + b1_ref[...], 0.0) * m1_ref[...]).astype(bf16)  # (cout, lp)

    # ---- zero-framed short_cut, built in VMEM (no wrapper jnp.pad pass) -----
    scb = sc_ref[0].astype(bf16)                                         # (c_sc, h, w)
    rowmid = jnp.concatenate(
        [jnp.zeros((c_sc, h, 1), bf16), scb,
         jnp.zeros((c_sc, h, wp - w - 1), bf16)], axis=2)                # (c_sc, h, wp)
    zrow = jnp.zeros((c_sc, 2, wp), bf16)
    scf = jnp.concatenate([zrow, rowmid, zrow], axis=1).reshape(c_sc, lp)

    # ---- conv2: concat once, 9 tap windows, ONE im2col contraction ---------
    z = jnp.concatenate([yf, scf], axis=0)                               # (cz, lp)
    taps = []
    for dy in range(3):
        for dx in range(3):
            st = base + (dy - 1) * wp + (dx - 1)   # static; dy shift lane-aligned
            taps.append(z[:, st:st + lo])
    rhs2 = jnp.concatenate(taps, axis=0)                                 # (9*cz, lo)
    acc2 = jnp.dot(w2_ref[...], rhs2, preferred_element_type=f32)        # (cout, lo)
    mid = jnp.maximum(acc2 + b2_ref[...], 0.0) * m2_ref[...]             # (cout, lo)

    # ---- conv3: mid goes straight into a persistent zero-framed scratch ----
    mid_ref[:, 0:base] = jnp.zeros((cout, base), bf16)                   # top margin
    mid_ref[:, base + lo:lp] = jnp.zeros((cout, lp - base - lo), bf16)   # bottom margin
    mid_ref[:, base:base + lo] = mid.astype(bf16)                        # aligned store
    taps3 = []
    for dy in range(3):
        for dx in range(3):
            st = base + (dy - 1) * wp + (dx - 1)
            taps3.append(mid_ref[:, st:st + lo])
    rhs3 = jnp.concatenate(taps3, axis=0)                                # (9*cout, lo)
    acc3 = jnp.dot(w3_ref[...], rhs3, preferred_element_type=f32)        # (cout, lo)
    o_ref[0] = jnp.maximum(acc3 + b3_ref[...], 0.0)


# ----------------------------------------------------------------------------
# Wrapper (NCHW in / NCHW out).
# ----------------------------------------------------------------------------
def upsampling_forward(x, short_cut, params, align_corners):
    n, cin, hx, wx = x.shape
    _, c_sc, h, w = short_cut.shape
    cout = params["w1"].shape[0]
    hp = h + 4
    wp = _round_up(w + 2, 128)        # lane-dense stores + lane-aligned row shifts
    lp, lo = hp * wp, h * wp
    bf16 = jnp.bfloat16

    # separable interpolation matrices, embedded into the zero-padded frame
    a_h = bilinear_matrix(h, hx, align_corners)
    a_w = bilinear_matrix(w, wx, align_corners)
    ahp = jnp.zeros((hp, hx), jnp.float32).at[2:h + 2].set(a_h)
    awpt = jnp.zeros((wx, wp), jnp.float32).at[:, 1:w + 1].set(a_w.T)
    # 1x1 conv (BN scale already folded into w1) merged with the H-resize
    wk = jnp.einsum('oc,ik->oick', params["w1"], ahp).reshape(cout * hp, cin * hx)

    # validity masks of the padded frames (static f32 constants)
    row_ok = (jnp.arange(hp) >= 2) & (jnp.arange(hp) < h + 2)
    col_ok = (jnp.arange(wp) >= 1) & (jnp.arange(wp) < w + 1)
    m1 = (row_ok[:, None] & col_ok[None, :]).astype(jnp.float32).reshape(1, lp)
    m2 = jnp.broadcast_to(col_ok.astype(jnp.float32)[None, :], (h, wp)).reshape(1, lo)

    # im2col tap-stacked conv weights (contraction depth 9*Cin), bf16 operands
    cz = cout + c_sc
    w2 = jnp.transpose(params["w2"], (0, 2, 3, 1)).reshape(cout, 9 * cz).astype(bf16)
    w3 = jnp.transpose(params["w3"], (0, 2, 3, 1)).reshape(cout, 9 * cout).astype(bf16)

    x_flat = x.reshape(n, cin * hx, wx)

    kernel = functools.partial(upsampling_kernel, h=h, w=w, hp=hp, wp=wp)
    out = pl.pallas_call(
        kernel,
        out_shape=jax.ShapeDtypeStruct((n, cout, lo), jnp.float32),
        grid=(n,),
        in_specs=[
            pl.BlockSpec((1, cin * hx, wx), lambda i: (i, 0, 0)),    # x (low res, flat)
            pl.BlockSpec((1, c_sc, h, w), lambda i: (i, 0, 0, 0)),   # short_cut (unpadded)
            pl.BlockSpec((1, lp), lambda i: (0, 0)),                 # mask (padded frame)
            pl.BlockSpec((1, lo), lambda i: (0, 0)),                 # mask (valid cols)
            pl.BlockSpec((cout * hp, cin * hx), lambda i: (0, 0)),   # kron(w1*bn, A_h)
            pl.BlockSpec((wx, wp), lambda i: (0, 0)),                # A_w^T (padded)
            pl.BlockSpec((cout, 1), lambda i: (0, 0)),               # b1
            pl.BlockSpec((cout, 9 * cz), lambda i: (0, 0)),          # w2 taps (im2col)
            pl.BlockSpec((cout, 1), lambda i: (0, 0)),               # b2
            pl.BlockSpec((cout, 9 * cout), lambda i: (0, 0)),        # w3 taps (im2col)
            pl.BlockSpec((cout, 1), lambda i: (0, 0)),               # b3
        ],
        out_specs=pl.BlockSpec((1, cout, lo), lambda i: (i, 0, 0)),
        scratch_shapes=[pltpu.VMEM((cout, lp), bf16)],               # conv3 zero frame
        compiler_params=pltpu.CompilerParams(dimension_semantics=("parallel",)),
    )(x_flat, short_cut, m1, m2, wk, awpt, params["b1"],
      w2, params["b2"], w3, params["b3"])

    # drop the zero-frame columns -> NCHW (kept f32 for module parity)
    return out.reshape(n, cout, h, wp)[:, :, :, 1:w + 1]


# ----------------------------------------------------------------------------
# Pure-JAX (f32) reference, in the original op order of the PyTorch module.
# ----------------------------------------------------------------------------
def upsampling_reference(x, sc, params, align_corners):
    _, _, hx, wx = x.shape
    _, _, h, w = sc.shape
    a_h = bilinear_matrix(h, hx, align_corners)
    a_w = bilinear_matrix(w, wx, align_corners)
    xr = jnp.einsum('hH,wW,ncHW->nchw', a_h, a_w, x)
    y = jnp.einsum('oc,nchw->nohw', params["w1"], xr)
    y = jnp.maximum(y + params["b1"].reshape(1, -1, 1, 1), 0.0)
    z = jnp.concatenate([y, sc], axis=1)

    def conv(zz, wk, bb):
        out = jax.lax.conv_general_dilated(
            zz, wk, (1, 1), ((1, 1), (1, 1)),
            dimension_numbers=("NCHW", "OIHW", "NCHW"))
        return jnp.maximum(out + bb.reshape(1, -1, 1, 1), 0.0)

    z = conv(z, params["w2"], params["b2"])
    z = conv(z, params["w3"], params["b3"])
    return z


# ----------------------------------------------------------------------------
# Deterministic parameters (BatchNorm folded: conv weights pre-scaled, bias kept).
# ----------------------------------------------------------------------------
def init_params(key, in_channels, out_channels):
    ks = jax.random.split(key, 6)

    def bn(k, c):
        k1, k2, k3, k4 = jax.random.split(k, 4)
        gamma = jax.random.uniform(k1, (c,), jnp.float32, 0.5, 1.5)
        beta = 0.1 * jax.random.normal(k2, (c,), jnp.float32)
        mean = 0.1 * jax.random.normal(k3, (c,), jnp.float32)
        var = jax.random.uniform(k4, (c,), jnp.float32, 0.5, 1.5)
        scale = gamma / jnp.sqrt(var + 1e-5)
        return scale, beta - mean * scale

    w1 = 0.3 * jax.random.normal(ks[0], (out_channels, in_channels), jnp.float32)
    s1, b1 = bn(ks[1], out_channels)
    w2 = 0.15 * jax.random.normal(ks[2], (out_channels, 2 * out_channels, 3, 3), jnp.float32)
    s2, b2 = bn(ks[3], out_channels)
    w3 = 0.15 * jax.random.normal(ks[4], (out_channels, out_channels, 3, 3), jnp.float32)
    s3, b3 = bn(ks[5], out_channels)
    return dict(
        w1=w1 * s1[:, None], b1=b1.reshape(-1, 1),
        w2=w2 * s2[:, None, None, None], b2=b2.reshape(-1, 1),
        w3=w3 * s3[:, None, None, None], b3=b3.reshape(-1, 1),
    )


if __name__ == "__main__":
    key = jax.random.PRNGKey(0)
    k_x, k_sc, k_p = jax.random.split(key, 3)

    N, C_IN, C_OUT = 2, 8, 8
    HX, WX = 8, 8        # low-res input spatial
    H, W = 16, 16        # short_cut spatial (interpolation target)
    ALIGN_CORNERS = False

    x = jax.random.normal(k_x, (N, C_IN, HX, WX), jnp.float32)          # NCHW
    short_cut = jax.random.normal(k_sc, (N, C_OUT, H, W), jnp.float32)  # NCHW
    params = init_params(k_p, C_IN, C_OUT)

    fwd = jax.jit(functools.partial(upsampling_forward, align_corners=ALIGN_CORNERS))
    out = jax.block_until_ready(fwd(x, short_cut, params))

    ref = upsampling_reference(x, short_cut, params, ALIGN_CORNERS)
    assert out.shape == (N, C_OUT, H, W), out.shape
    err = float(jnp.max(jnp.abs(out - ref)))
    # bf16 operands on the two 3x3 convs (f32 accumulation) -> loosened tolerance
    assert jnp.allclose(out, ref, atol=1e-1, rtol=1e-1), err
    print("KERNEL_OK")
</pallas_src>

<mosaic_0001>
module attributes {stable_mosaic.version = 11 : i64} {
  func.func private @main(%arg0: i32) attributes {dimension_semantics = [#tpu.dimension_semantics<core_parallel>], iteration_bounds = array<i64: 2>, tpu.core_type = #tpu.core_type<sc_scalar_subcore>, window_params = []} {
    return
  }
}

module attributes {stable_mosaic.version = 11 : i64} {
  func.func private @main(%arg0: i32) attributes {dimension_semantics = [#tpu.dimension_semantics<core_parallel>], iteration_bounds = array<i64: 2>, tpu.core_type = #tpu.core_type<sc_scalar_subcore>, window_params = []} {
    return
  }
}

module attributes {stable_mosaic.version = 11 : i64} {
  func.func @upsampling_kernel(%arg0: i32, %arg1: memref<1x64x8xf32, #tpu.memory_space<vmem>>, %arg2: memref<1x8x16x16xf32, #tpu.memory_space<vmem>>, %arg3: memref<1x2560xf32, #tpu.memory_space<vmem>>, %arg4: memref<1x2048xf32, #tpu.memory_space<vmem>>, %arg5: memref<160x64xf32, #tpu.memory_space<vmem>>, %arg6: memref<8x128xf32, #tpu.memory_space<vmem>>, %arg7: memref<8x1xf32, #tpu.memory_space<vmem>>, %arg8: memref<8x144xbf16, #tpu.memory_space<vmem>>, %arg9: memref<8x1xf32, #tpu.memory_space<vmem>>, %arg10: memref<8x72xbf16, #tpu.memory_space<vmem>>, %arg11: memref<8x1xf32, #tpu.memory_space<vmem>>, %arg12: memref<1x8x2048xf32, #tpu.memory_space<vmem>>, %arg13: memref<8x2560xbf16, #tpu.memory_space<vmem>>) attributes {dimension_semantics = [#tpu.dimension_semantics<parallel>], iteration_bounds = array<i64: 2>, scalar_prefetch = 0 : i64, scratch_operands = 1 : i64, tpu.core_type = #tpu.core_type<tc>, window_params = [{transform_indices = @transform_0, window_bounds = array<i64: 1, 64, 8>}, {transform_indices = @transform_1, window_bounds = array<i64: 1, 8, 16, 16>}, {pipeline_mode = #tpu.pipeline_mode<synchronous>, transform_indices = @transform_2, window_bounds = array<i64: 1, 2560>}, {pipeline_mode = #tpu.pipeline_mode<synchronous>, transform_indices = @transform_3, window_bounds = array<i64: 1, 2048>}, {pipeline_mode = #tpu.pipeline_mode<synchronous>, transform_indices = @transform_4, window_bounds = array<i64: 160, 64>}, {pipeline_mode = #tpu.pipeline_mode<synchronous>, transform_indices = @transform_5, window_bounds = array<i64: 8, 128>}, {pipeline_mode = #tpu.pipeline_mode<synchronous>, transform_indices = @transform_6, window_bounds = array<i64: 8, 1>}, {pipeline_mode = #tpu.pipeline_mode<synchronous>, transform_indices = @transform_7, window_bounds = array<i64: 8, 144>}, {pipeline_mode = #tpu.pipeline_mode<synchronous>, transform_indices = @transform_8, window_bounds = array<i64: 8, 1>}, {pipeline_mode = #tpu.pipeline_mode<synchronous>, transform_indices = @transform_9, window_bounds = array<i64: 8, 72>}, {pipeline_mode = #tpu.pipeline_mode<synchronous>, transform_indices = @transform_10, window_bounds = array<i64: 8, 1>}, {transform_indices = @transform_11, window_bounds = array<i64: 1, 8, 2048>}]} {
    %c0 = arith.constant 0 : index
    %c0_0 = arith.constant 0 : index
    %c0_1 = arith.constant 0 : index
    %0 = vector.load %arg1[%c0, %c0_0, %c0_1] : memref<1x64x8xf32, #tpu.memory_space<vmem>>, vector<1x64x8xf32>
    %1 = vector.shape_cast %0 : vector<1x64x8xf32> to vector<64x8xf32>
    %c0_2 = arith.constant 0 : index
    %c0_3 = arith.constant 0 : index
    %2 = vector.load %arg6[%c0_2, %c0_3] : memref<8x128xf32, #tpu.memory_space<vmem>>, vector<8x128xf32>
    %cst = arith.constant dense<0.000000e+00> : vector<64x128xf32>
    %3 = tpu.matmul %1, %2, %cst {dimension_numbers = #tpu.dot_dimension_numbers<[1], [0], [0], [1], [0, 0, 1, 1], [], []>} : vector<64x8xf32>, vector<8x128xf32>, vector<64x128xf32> -> vector<64x128xf32>
    %c0_4 = arith.constant 0 : index
    %c0_5 = arith.constant 0 : index
    %4 = vector.load %arg5[%c0_4, %c0_5] : memref<160x64xf32, #tpu.memory_space<vmem>>, vector<160x64xf32>
    %cst_6 = arith.constant dense<0.000000e+00> : vector<160x128xf32>
    %5 = tpu.matmul %4, %3, %cst_6 {dimension_numbers = #tpu.dot_dimension_numbers<[1], [0], [0], [1], [0, 0, 1, 1], [], []>} : vector<160x64xf32>, vector<64x128xf32>, vector<160x128xf32> -> vector<160x128xf32>
    %6 = vector.shape_cast %5 : vector<160x128xf32> to vector<8x2560xf32>
    %c0_7 = arith.constant 0 : index
    %c0_8 = arith.constant 0 : index
    %7 = vector.load %arg7[%c0_7, %c0_8] : memref<8x1xf32, #tpu.memory_space<vmem>>, vector<8x1xf32>
    %8 = vector.broadcast %7 : vector<8x1xf32> to vector<8x2560xf32>
    %9 = arith.addf %6, %8 : vector<8x2560xf32>
    %cst_9 = arith.constant 0.000000e+00 : f32
    %10 = vector.broadcast %cst_9 : f32 to vector<8x2560xf32>
    %11 = arith.maximumf %9, %10 : vector<8x2560xf32>
    %c0_10 = arith.constant 0 : index
    %c0_11 = arith.constant 0 : index
    %12 = vector.load %arg3[%c0_10, %c0_11] : memref<1x2560xf32, #tpu.memory_space<vmem>>, vector<1x2560xf32>
    %13 = vector.broadcast %12 : vector<1x2560xf32> to vector<8x2560xf32>
    %14 = arith.mulf %11, %13 : vector<8x2560xf32>
    %15 = arith.truncf %14 : vector<8x2560xf32> to vector<8x2560xbf16>
    %c0_12 = arith.constant 0 : index
    %c0_13 = arith.constant 0 : index
    %c0_14 = arith.constant 0 : index
    %c0_15 = arith.constant 0 : index
    %16 = vector.load %arg2[%c0_12, %c0_13, %c0_14, %c0_15] : memref<1x8x16x16xf32, #tpu.memory_space<vmem>>, vector<1x8x16x16xf32>
    %17 = vector.shape_cast %16 : vector<1x8x16x16xf32> to vector<8x16x16xf32>
    %18 = arith.truncf %17 : vector<8x16x16xf32> to vector<8x16x16xbf16>
    %cst_16 = arith.constant 0.000000e+00 : bf16
    %19 = vector.broadcast %cst_16 : bf16 to vector<8x16x1xbf16>
    %cst_17 = arith.constant 0.000000e+00 : bf16
    %20 = vector.broadcast %cst_17 : bf16 to vector<8x16x111xbf16>
    %21 = tpu.concatenate %19, %18, %20 in 2 : vector<8x16x1xbf16>, vector<8x16x16xbf16>, vector<8x16x111xbf16> -> vector<8x16x128xbf16>
    %cst_18 = arith.constant 0.000000e+00 : bf16
    %22 = vector.broadcast %cst_18 : bf16 to vector<8x2x128xbf16>
    %23 = tpu.concatenate %22, %21, %22 in 1 : vector<8x2x128xbf16>, vector<8x16x128xbf16>, vector<8x2x128xbf16> -> vector<8x20x128xbf16>
    %24 = vector.shape_cast %23 : vector<8x20x128xbf16> to vector<8x2560xbf16>
    %25 = tpu.concatenate %15, %24 in 0 : vector<8x2560xbf16>, vector<8x2560xbf16> -> vector<16x2560xbf16>
    %26 = vector.extract_strided_slice %25 {offsets = [0, 127], sizes = [16, 2048], strides = [1, 1]} : vector<16x2560xbf16> to vector<16x2048xbf16>
    %27 = vector.extract_strided_slice %25 {offsets = [0, 128], sizes = [16, 2048], strides = [1, 1]} : vector<16x2560xbf16> to vector<16x2048xbf16>
    %28 = vector.extract_strided_slice %25 {offsets = [0, 129], sizes = [16, 2048], strides = [1, 1]} : vector<16x2560xbf16> to vector<16x2048xbf16>
    %29 = vector.extract_strided_slice %25 {offsets = [0, 255], sizes = [16, 2048], strides = [1, 1]} : vector<16x2560xbf16> to vector<16x2048xbf16>
    %30 = vector.extract_strided_slice %25 {offsets = [0, 256], sizes = [16, 2048], strides = [1, 1]} : vector<16x2560xbf16> to vector<16x2048xbf16>
    %31 = vector.extract_strided_slice %25 {offsets = [0, 257], sizes = [16, 2048], strides = [1, 1]} : vector<16x2560xbf16> to vector<16x2048xbf16>
    %32 = vector.extract_strided_slice %25 {offsets = [0, 383], sizes = [16, 2048], strides = [1, 1]} : vector<16x2560xbf16> to vector<16x2048xbf16>
    %33 = vector.extract_strided_slice %25 {offsets = [0, 384], sizes = [16, 2048], strides = [1, 1]} : vector<16x2560xbf16> to vector<16x2048xbf16>
    %34 = vector.extract_strided_slice %25 {offsets = [0, 385], sizes = [16, 2048], strides = [1, 1]} : vector<16x2560xbf16> to vector<16x2048xbf16>
    %35 = tpu.concatenate %26, %27, %28, %29, %30, %31, %32, %33, %34 in 0 : vector<16x2048xbf16>, vector<16x2048xbf16>, vector<16x2048xbf16>, vector<16x2048xbf16>, vector<16x2048xbf16>, vector<16x2048xbf16>, vector<16x2048xbf16>, vector<16x2048xbf16>, vector<16x2048xbf16> -> vector<144x2048xbf16>
    %c0_19 = arith.constant 0 : index
    %c0_20 = arith.constant 0 : index
    %36 = vector.load %arg8[%c0_19, %c0_20] : memref<8x144xbf16, #tpu.memory_space<vmem>>, vector<8x144xbf16>
    %cst_21 = arith.constant dense<0.000000e+00> : vector<8x2048xf32>
    %37 = tpu.matmul %36, %35, %cst_21 {dimension_numbers = #tpu.dot_dimension_numbers<[1], [0], [0], [1], [0, 0, 1, 1], [], []>} : vector<8x144xbf16>, vector<144x2048xbf16>, vector<8x2048xf32> -> vector<8x2048xf32>
    %c0_22 = arith.constant 0 : index
    %c0_23 = arith.constant 0 : index
    %38 = vector.load %arg9[%c0_22, %c0_23] : memref<8x1xf32, #tpu.memory_space<vmem>>, vector<8x1xf32>
    %39 = vector.broadcast %38 : vector<8x1xf32> to vector<8x2048xf32>
    %40 = arith.addf %37, %39 : vector<8x2048xf32>
    %cst_24 = arith.constant 0.000000e+00 : f32
    %41 = vector.broadcast %cst_24 : f32 to vector<8x2048xf32>
    %42 = arith.maximumf %40, %41 : vector<8x2048xf32>
    %c0_25 = arith.constant 0 : index
    %c0_26 = arith.constant 0 : index
    %43 = vector.load %arg4[%c0_25, %c0_26] : memref<1x2048xf32, #tpu.memory_space<vmem>>, vector<1x2048xf32>
    %44 = vector.broadcast %43 : vector<1x2048xf32> to vector<8x2048xf32>
    %45 = arith.mulf %42, %44 : vector<8x2048xf32>
    %cst_27 = arith.constant 0.000000e+00 : bf16
    %46 = vector.broadcast %cst_27 : bf16 to vector<8x256xbf16>
    %c0_28 = arith.constant 0 : index
    %c0_29 = arith.constant 0 : index
    %47 = vector.load %arg13[%c0_28, %c0_29] : memref<8x2560xbf16, #tpu.memory_space<vmem>>, vector<8x256xbf16>
    tpu.vector_store %arg13[%c0_28, %c0_29], %46 {strides = array<i32>} : memref<8x2560xbf16, #tpu.memory_space<vmem>>, vector<8x256xbf16>,
    %cst_30 = arith.constant 0.000000e+00 : bf16
    %48 = vector.broadcast %cst_30 : bf16 to vector<8x256xbf16>
    %c0_31 = arith.constant 0 : index
    %c2304 = arith.constant 2304 : index
    %49 = vector.load %arg13[%c0_31, %c2304] : memref<8x2560xbf16, #tpu.memory_space<vmem>>, vector<8x256xbf16>
    tpu.vector_store %arg13[%c0_31, %c2304], %48 {strides = array<i32>} : memref<8x2560xbf16, #tpu.memory_space<vmem>>, vector<8x256xbf16>,
    %50 = arith.truncf %45 : vector<8x2048xf32> to vector<8x2048xbf16>
    %c0_32 = arith.constant 0 : index
    %c256 = arith.constant 256 : index
    %51 = vector.load %arg13[%c0_32, %c256] : memref<8x2560xbf16, #tpu.memory_space<vmem>>, vector<8x2048xbf16>
    tpu.vector_store %arg13[%c0_32, %c256], %50 {strides = array<i32>} : memref<8x2560xbf16, #tpu.memory_space<vmem>>, vector<8x2048xbf16>,
    %c0_33 = arith.constant 0 : index
    %c127 = arith.constant 127 : index
    %52 = vector.load %arg13[%c0_33, %c127] : memref<8x2560xbf16, #tpu.memory_space<vmem>>, vector<8x2048xbf16>
    %c0_34 = arith.constant 0 : index
    %c128 = arith.constant 128 : index
    %53 = vector.load %arg13[%c0_34, %c128] : memref<8x2560xbf16, #tpu.memory_space<vmem>>, vector<8x2048xbf16>
    %c0_35 = arith.constant 0 : index
    %c129 = arith.constant 129 : index
    %54 = vector.load %arg13[%c0_35, %c129] : memref<8x2560xbf16, #tpu.memory_space<vmem>>, vector<8x2048xbf16>
    %c0_36 = arith.constant 0 : index
    %c255 = arith.constant 255 : index
    %55 = vector.load %arg13[%c0_36, %c255] : memref<8x2560xbf16, #tpu.memory_space<vmem>>, vector<8x2048xbf16>
    %c0_37 = arith.constant 0 : index
    %c256_38 = arith.constant 256 : index
    %56 = vector.load %arg13[%c0_37, %c256_38] : memref<8x2560xbf16, #tpu.memory_space<vmem>>, vector<8x2048xbf16>
    %c0_39 = arith.constant 0 : index
    %c257 = arith.constant 257 : index
    %57 = vector.load %arg13[%c0_39, %c257] : memref<8x2560xbf16, #tpu.memory_space<vmem>>, vector<8x2048xbf16>
    %c0_40 = arith.constant 0 : index
    %c383 = arith.constant 383 : index
    %58 = vector.load %arg13[%c0_40, %c383] : memref<8x2560xbf16, #tpu.memory_space<vmem>>, vector<8x2048xbf16>
    %c0_41 = arith.constant 0 : index
    %c384 = arith.constant 384 : index
    %59 = vector.load %arg13[%c0_41, %c384] : memref<8x2560xbf16, #tpu.memory_space<vmem>>, vector<8x2048xbf16>
    %c0_42 = arith.constant 0 : index
    %c385 = arith.constant 385 : index
    %60 = vector.load %arg13[%c0_42, %c385] : memref<8x2560xbf16, #tpu.memory_space<vmem>>, vector<8x2048xbf16>
    %61 = tpu.concatenate %52, %53, %54, %55, %56, %57, %58, %59, %60 in 0 : vector<8x2048xbf16>, vector<8x2048xbf16>, vector<8x2048xbf16>, vector<8x2048xbf16>, vector<8x2048xbf16>, vector<8x2048xbf16>, vector<8x2048xbf16>, vector<8x2048xbf16>, vector<8x2048xbf16> -> vector<72x2048xbf16>
    %c0_43 = arith.constant 0 : index
    %c0_44 = arith.constant 0 : index
    %62 = vector.load %arg10[%c0_43, %c0_44] : memref<8x72xbf16, #tpu.memory_space<vmem>>, vector<8x72xbf16>
    %cst_45 = arith.constant dense<0.000000e+00> : vector<8x2048xf32>
    %63 = tpu.matmul %62, %61, %cst_45 {dimension_numbers = #tpu.dot_dimension_numbers<[1], [0], [0], [1], [0, 0, 1, 1], [], []>} : vector<8x72xbf16>, vector<72x2048xbf16>, vector<8x2048xf32> -> vector<8x2048xf32>
    %c0_46 = arith.constant 0 : index
    %c0_47 = arith.constant 0 : index
    %64 = vector.load %arg11[%c0_46, %c0_47] : memref<8x1xf32, #tpu.memory_space<vmem>>, vector<8x1xf32>
    %65 = vector.broadcast %64 : vector<8x1xf32> to vector<8x2048xf32>
    %66 = arith.addf %63, %65 : vector<8x2048xf32>
    %cst_48 = arith.constant 0.000000e+00 : f32
    %67 = vector.broadcast %cst_48 : f32 to vector<8x2048xf32>
    %68 = arith.maximumf %66, %67 : vector<8x2048xf32>
    %c0_49 = arith.constant 0 : index
    %c0_50 = arith.constant 0 : index
    %c0_51 = arith.constant 0 : index
    %69 = vector.load %arg12[%c0_49, %c0_50, %c0_51] : memref<1x8x2048xf32, #tpu.memory_space<vmem>>, vector<1x8x2048xf32>
    %70 = vector.shape_cast %69 : vector<1x8x2048xf32> to vector<8x2048xf32>
    %71 = vector.shape_cast %68 : vector<8x2048xf32> to vector<1x8x2048xf32>
    tpu.vector_store %arg12[%c0_49, %c0_50, %c0_51], %71 {strides = array<i32>} : memref<1x8x2048xf32, #tpu.memory_space<vmem>>, vector<1x8x2048xf32>,
    return
  }
  func.func @transform_0(%arg0: i32) -> (i32, i32, i32) {
    %c0_i32 = arith.constant 0 : i32
    %c0_i32_0 = arith.constant 0 : i32
    %c0_i32_1 = arith.constant 0 : i32
    return %arg0, %c0_i32, %c0_i32_0 : i32, i32, i32
  }
  func.func @transform_1(%arg0: i32) -> (i32, i32, i32, i32) {
    %c0_i32 = arith.constant 0 : i32
    %c0_i32_0 = arith.constant 0 : i32
    %c0_i32_1 = arith.constant 0 : i32
    %c0_i32_2 = arith.constant 0 : i32
    return %arg0, %c0_i32, %c0_i32_0, %c0_i32_1 : i32, i32, i32, i32
  }
  func.func @transform_2(%arg0: i32) -> (i32, i32) {
    %c0_i32 = arith.constant 0 : i32
    %c0_i32_0 = arith.constant 0 : i32
    %c0_i32_1 = arith.constant 0 : i32
    return %c0_i32, %c0_i32_0 : i32, i32
  }
  func.func @transform_3(%arg0: i32) -> (i32, i32) {
    %c0_i32 = arith.constant 0 : i32
    %c0_i32_0 = arith.constant 0 : i32
    %c0_i32_1 = arith.constant 0 : i32
    return %c0_i32, %c0_i32_0 : i32, i32
  }
  func.func @transform_4(%arg0: i32) -> (i32, i32) {
    %c0_i32 = arith.constant 0 : i32
    %c0_i32_0 = arith.constant 0 : i32
    %c0_i32_1 = arith.constant 0 : i32
    return %c0_i32, %c0_i32_0 : i32, i32
  }
  func.func @transform_5(%arg0: i32) -> (i32, i32) {
    %c0_i32 = arith.constant 0 : i32
    %c0_i32_0 = arith.constant 0 : i32
    %c0_i32_1 = arith.constant 0 : i32
    return %c0_i32, %c0_i32_0 : i32, i32
  }
  func.func @transform_6(%arg0: i32) -> (i32, i32) {
    %c0_i32 = arith.constant 0 : i32
    %c0_i32_0 = arith.constant 0 : i32
    %c0_i32_1 = arith.constant 0 : i32
    return %c0_i32, %c0_i32_0 : i32, i32
  }
  func.func @transform_7(%arg0: i32) -> (i32, i32) {
    %c0_i32 = arith.constant 0 : i32
    %c0_i32_0 = arith.constant 0 : i32
    %c0_i32_1 = arith.constant 0 : i32
    return %c0_i32, %c0_i32_0 : i32, i32
  }
  func.func @transform_8(%arg0: i32) -> (i32, i32) {
    %c0_i32 = arith.constant 0 : i32
    %c0_i32_0 = arith.constant 0 : i32
    %c0_i32_1 = arith.constant 0 : i32
    return %c0_i32, %c0_i32_0 : i32, i32
  }
  func.func @transform_9(%arg0: i32) -> (i32, i32) {
    %c0_i32 = arith.constant 0 : i32
    %c0_i32_0 = arith.constant 0 : i32
    %c0_i32_1 = arith.constant 0 : i32
    return %c0_i32, %c0_i32_0 : i32, i32
  }
  func.func @transform_10(%arg0: i32) -> (i32, i32) {
    %c0_i32 = arith.constant 0 : i32
    %c0_i32_0 = arith.constant 0 : i32
    %c0_i32_1 = arith.constant 0 : i32
    return %c0_i32, %c0_i32_0 : i32, i32
  }
  func.func @transform_11(%arg0: i32) -> (i32, i32, i32) {
    %c0_i32 = arith.constant 0 : i32
    %c0_i32_0 = arith.constant 0 : i32
    %c0_i32_1 = arith.constant 0 : i32
    return %arg0, %c0_i32, %c0_i32_0 : i32, i32, i32
  }
}

</mosaic_0001>

<bundles_post_ra>
// kernel: upsampling_forward.1
= control target key start
LH: loop header
LB: loop body
LE: loop exit
PB: predicated region body
PF: predicated region fallthrough
CT: control target
= control target key end

     0   :  { %s4446_s17 = smov 0   ;;  %s6918_s0 = inlined_call_operand.vmem [shape: f32[2,64,8], index: 0, kind: input, shape index: {}]   ;;  %s6919_s1 = inlined_call_operand.vmem [shape: f32[2,8,16,16], index: 1, kind: input, shape index: {}]   ;;  %s6920_s2 = inlined_call_operand.vmem [shape: f32[1,2560], index: 2, kind: input, shape index: {}]   ;;  %s6921_s3 = inlined_call_operand.vmem [shape: f32[1,2048], index: 3, kind: input, shape index: {}]   ;;  %s6922_s4 = inlined_call_operand.vmem [shape: f32[160,64], index: 4, kind: input, shape index: {}]   ;;  %s6923_s5 = inlined_call_operand.vmem [shape: f32[8,128], index: 5, kind: input, shape index: {}]   ;;  %s6924_s6 = inlined_call_operand.vmem [shape: f32[8,1], index: 6, kind: input, shape index: {}]   ;;  %s6925_s7 = inlined_call_operand.vmem [shape: bf16[8,144], index: 7, kind: input, shape index: {}]   ;;  %s6926_s8 = inlined_call_operand.vmem [shape: f32[8,1], index: 8, kind: input, shape index: {}]   ;;  %s6927_s9 = inlined_call_operand.vmem [shape: bf16[8,72], index: 9, kind: input, shape index: {}]   ;;  %s6928_s10 = inlined_call_operand.vmem [shape: f32[8,1], index: 10, kind: input, shape index: {}]   ;;  %s6929_s11 = inlined_call_operand.vmem [shape: f32[2,8,2048], index: 11, kind: output, shape index: {}]  }
   0x1 LB: > { %s4051_s18 = sadd.s32 4294967295, %s4378_s17   ;;  %p4055_p0 = scmp.ge.s32.totalorder %s4378_s17, 1  ;;  %s4378_s17 = sphi %s4446_s17, %s21_s17  }
   0x2   : > { %p347_p1 = scmp.lt.s32.totalorder %s4378_s17, 3 }
   0x4   : > { %p348_p2 = pnand %p4055_p0, %p347_p1 }
   0x6   : > { %351 = sbr.rel (%p348_p2) target bundleno = 1763 (0x6e3), region = 64 }
   0xd   : > { %v416_v0 = vld [vmem:[%s6923_s5] sm:$0xff]  ;;  %p392_p3 = scmp.lt.s32.totalorder %s4051_s18, 1  ;;  %vm417_vm0 = vcmask 64512   ;;  %vm567_vm1 = vcmask 523264   ;;  %v549_v10 = vld [vmem:[%s6922_s4 + $0x10] sm:$0xff]  ;;  %v4380_v18 = vmov 0  }
   0xe   : > { %4230 = vmatprep.subr.mxu0 %v416_v0  ;;  %v547_v9 = vld [vmem:[%s6922_s4] sm:$0xff]  ;;  %4263 = vmatprep.mubr.msk.f32.mxu1 %vm567_vm1, %v549_v10  ;;  %2586 = vst [vmem:[#allocation2] sm:$0xff] %v4380_v18  ;;  %2587 = vst [vmem:[#allocation2 + $0x48] sm:$0xff] %v4380_v18  ;;  %s4381_s14 = smov 1   ;;  %v548_v49 = vld [vmem:[%s6922_s4 + $0x8] sm:$0xff]  ;;  %vm1337_vm2 = vcmask 7168  }
   0xf   : > { %4231 = vmatpush3.msra.mxu0 %v416_v0  ;;  %s7129_s18 = smov (!%p392_p3, %s4051_s18), 1  ;;  %4328 = vset.pattern.permute.xlu0 %v4380_v18  ;;  %v1097_v36 = vld [vmem:[%s6924_s6] sm:$0xff]  ;;  %v550_v50 = vld [vmem:[%s6922_s4 + $0x18] sm:$0xff]  ;;  %v552_v52 = vld [vmem:[%s6922_s4 + $0x28] sm:$0xff]  ;;  %vm1355_vm3 = vcmask 138240   ;;  %vm793_vm4 = vcmask 1040384  }
  0x10   : > { %s4182_s21 = sshll.u32 %s7129_s18, 6  ;;  %s4183_s29 = sshll.u32 %s7129_s18, 7  ;;  %v551_v51 = vld [vmem:[%s6922_s4 + $0x20] sm:$0xff]  ;;  %v553_v53 = vld [vmem:[%s6922_s4 + $0x30] sm:$0xff]  ;;  %v554_v54 = vld [vmem:[%s6922_s4 + $0x38] sm:$0xff]  ;;  %vm796_vm5 = vcmask 1041409  }
  0x11   : > { %s396_s24 = scalar_lea.vmem %s6918_s0, %s4182_s21  ;;  %s4485_s13 = scalar_lea.vmem %s6919_s1, %s4183_s29  ;;  %v555_v55 = vld [vmem:[%s6922_s4 + $0x40] sm:$0xff]  ;;  %v556_v56 = vld [vmem:[%s6922_s4 + $0x48] sm:$0xff]  ;;  %v557_v57 = vld [vmem:[%s6922_s4 + $0x50] sm:$0xff]  ;;  %vm799_vm6 = vcmask 1042434   ;;  %vm802_vm7 = vcmask 1043459   ;;  %vm805_vm8 = vcmask 1044484  }
  0x12   : > { %v408_v1 = vld [vmem:[%s396_s24] sm:$0xff]  ;;  %v409_v2 = vld [vmem:[%s396_s24 + $0x8] sm:$0xff]  ;;  %v410_v3 = vld [vmem:[%s396_s24 + $0x10] sm:$0xff]  ;;  %vm808_vm9 = vcmask 1045509   ;;  %vm814_vm10 = vcmask 1047559   ;;  %vm811_vm11 = vcmask 1046534  }
  0x13   : > { %4232 = vmatprep.mubr.msk.f32.mxu0 %vm417_vm0, %v408_v1  ;;  %v411_v4 = vld [vmem:[%s396_s24 + $0x18] sm:$0xff]  ;;  %v412_v5 = vld [vmem:[%s396_s24 + $0x20] sm:$0xff]  ;;  %v413_v6 = vld [vmem:[%s396_s24 + $0x28] sm:$0xff]  ;;  %vm1686_vm12 = vcmask 1043456   ;;  %s4385_s15 = smov 127   ;;  %vm1795_vm13 = vcmask 1039360  }
  0x14   : > { %4233 = vmatmul.mubr.msk.f32.vlgmr.msra.gmra.mrb[0].mxu0 %vm417_vm0, %v409_v2  ;;  %v414_v7 = vld [vmem:[%s396_s24 + $0x30] sm:$0xff]  ;;  %v415_v8 = vld [vmem:[%s396_s24 + $0x38] sm:$0xff]  ;;  %v1293_v11 = vld [vmem:[%s4485_s13 + $0x20] sm:$0xff]  ;;  %vm1846_vm14 = vcmask 1031168   ;;  %vm2138_vm15 = vcmask 130048  }
  0x15   : > { %4235 = vmatprep.mubr.msk.f32.mxu0 %vm417_vm0, %v410_v3  ;;  %v1294_v12 = vld [vmem:[%s4485_s13 + $0x28] sm:$0xff]  ;;  %v1289_v13 = vld [vmem:[%s4485_s13] sm:$0xff]  ;;  %v1295_v16 = vld [vmem:[%s4485_s13 + $0x30] sm:$0xff]  ;;  %v1149_v3 = vlaneseq }
  0x16   : > { %v1307_v14 = vpack.c.bf16 %v1294_v12, %v1293_v11  ;;  %v1290_v15 = vld [vmem:[%s4485_s13 + $0x8] sm:$0xff]  ;;  %v1296_v17 = vld [vmem:[%s4485_s13 + $0x38] sm:$0xff]  ;;  %v1291_v20 = vld [vmem:[%s4485_s13 + $0x10] sm:$0xff] }
  0x17   : > { %v1305_v19 = vpack.c.bf16 %v1290_v15, %v1289_v13  ;;  %v1292_v21 = vld [vmem:[%s4485_s13 + $0x18] sm:$0xff]  ;;  %v1308_v22 = vpack.c.bf16 %v1296_v17, %v1295_v16  ;;  %v1299_v24 = vld [vmem:[%s4485_s13 + $0x50] sm:$0xff]  ;;  %v1297_v26 = vld [vmem:[%s4485_s13 + $0x40] sm:$0xff] }
  0x18   : > { %4236 = vmatmul.mubr.msk.f32.gmra.mrb[2].mxu0 %vm417_vm0, %v411_v4  ;;  %1325 = vrot.lane.b32.xlu1 %v1307_v14, %s4381_s14  ;;  %v1306_v23 = vpack.c.bf16 %v1292_v21, %v1291_v20  ;;  %v1300_v25 = vld [vmem:[%s4485_s13 + $0x58] sm:$0xff]  ;;  %v1298_v27 = vld [vmem:[%s4485_s13 + $0x48] sm:$0xff]  ;;  %v1303_v29 = vld [vmem:[%s4485_s13 + $0x70] sm:$0xff]  ;;  %v4589_v14 = vshrl.u32 %v1149_v3, 7 }
  0x19   : > { %4238 = vmatprep.mubr.msk.f32.mxu0 %vm417_vm0, %v412_v5  ;;  %1321 = vrot.lane.b32.xlu0 %v1305_v19, %s4381_s14  ;;  %v1310_v28 = vpack.c.bf16 %v1300_v25, %v1299_v24  ;;  %v1309_v30 = vpack.c.bf16 %v1298_v27, %v1297_v26  ;;  %v1304_v31 = vld [vmem:[%s4485_s13 + $0x78] sm:$0xff]  ;;  %v1301_v32 = vld [vmem:[%s4485_s13 + $0x60] sm:$0xff]  ;;  %v1302_v33 = vld [vmem:[%s4485_s13 + $0x68] sm:$0xff]  ;;  %s4384_s13 = smov 126  }
  0x1a   : > { %v1312_v34 = vpack.c.bf16 %v1304_v31, %v1303_v29  ;;  %v1311_v35 = vpack.c.bf16 %v1302_v33, %v1301_v32  ;;  %v558_v58 = vld [vmem:[%s6922_s4 + $0x58] sm:$0xff]  ;;  %v559_v59 = vld [vmem:[%s6922_s4 + $0x60] sm:$0xff]  ;;  %v560_v60 = vld [vmem:[%s6922_s4 + $0x68] sm:$0xff] }
  0x1b   : > { %v561_v61 = vld [vmem:[%s6922_s4 + $0x70] sm:$0xff]  ;;  %v562_v62 = vld [vmem:[%s6922_s4 + $0x78] sm:$0xff]  ;;  %v563_v0 = vld [vmem:[%s6922_s4 + $0x80] sm:$0xff] }
  0x1c   : > { %4239 = vmatmul.mubr.msk.f32.gmra.mrb[4].mxu0 %vm417_vm0, %v413_v6  ;;  %1327 = vrot.lane.b32.xlu1 %v1308_v22, %s4381_s14  ;;  %v564_v4 = vld [vmem:[%s6922_s4 + $0x88] sm:$0xff]  ;;  %v4382_v6 = vmov 1983009808   ;;  %v566_v15 = vld [vmem:[%s6922_s4 + $0x98] sm:$0xff] }
  0x1d   : > { %4241 = vmatprep.mubr.msk.f32.mxu0 %vm417_vm0, %v414_v7  ;;  %1323 = vrot.lane.b32.xlu0 %v1306_v23, %s4381_s14  ;;  %v1423_v7 = vunpack.c.l.s4 %v4382_v6 }
  0x1f   : > { %v1424_v20 = vunpack.c.0.s8 %v1423_v7 }
  0x20   : > { %4242 = vmatmul.mubr.msk.f32.gmra.mrb[6].mxu0 %vm417_vm0, %v415_v8  ;;  %1331 = vrot.lane.b32.xlu1 %v1310_v28, %s4381_s14  ;;  %v565_v8 = vld [vmem:[%s6922_s4 + $0x90] sm:$0xff]  ;;  %vm3572_vm0 = vcmask 588800  }
  0x21   : > { %4260 = vmatprep.mubr.msk.f32.mxu0 %vm567_vm1, %v547_v9  ;;  %1329 = vrot.lane.b32.xlu0 %v1309_v30, %s4381_s14  ;;  %v4606_v33 = vsub.s32 %v1424_v20, %v4589_v14 }
  0x24   : > { %1335 = vrot.lane.b32.xlu1 %v1312_v34, %s4381_s14 }
  0x25   : > { %1333 = vrot.lane.b32.xlu0 %v1311_v35, %s4381_s14 }
  0x29   : > { %1100 = vperm.xlu0 %4328, %v1097_v36  }
  0x8a   : > { %v1326_v63 = vpop.permute.xlu1 %1325 }
  0x8b   : > { %v1322_v1 = vpop.permute.xlu0 %1321  ;;  %v1344_v16 = vsel %vm1337_vm2, 0, %v1326_v63 }
  0x8c   : > { %v1340_v2 = vsel %vm1337_vm2, 0, %v1322_v1  ;;  %v1358_v27 = vsel %vm1355_vm3, %v1344_v16, 0 }
  0x8d   : > { %v1356_v9 = vsel %vm1355_vm3, %v1340_v2, 0 }
  0x8e   : > { %v1328_v5 = vpop.permute.xlu1 %1327  ;;  %v1372_v17 = vrot.slane %v1356_v9, 7 }
  0x8f   : > { %v1324_v10 = vpop.permute.xlu0 %1323  ;;  %v1346_v11 = vsel %vm1337_vm2, 0, %v1328_v5 }
  0x90   : > { %v1342_v12 = vsel %vm1337_vm2, 0, %v1324_v10  ;;  %v1359_v22 = vsel %vm1355_vm3, %v1346_v11, 0  ;;  %v1404_v31 = vsel %vm793_vm4, %v1372_v17, 0 }
  0x91   : > { %v1357_v13 = vsel %vm1355_vm3, %v1342_v12, 0  ;;  %v1375_v32 = vrot.slane %v1359_v22, 7 }
  0x92   : > { %v1373_v19 = vrot.slane %v1357_v13, 7  ;;  %v1332_v21 = vpop.permute.xlu1 %1331 }
  0x93   : > { %v1350_v23 = vsel %vm1337_vm2, 0, %v1332_v21  ;;  %v1330_v24 = vpop.permute.xlu0 %1329 }
  0x94   : > { %v1361_v25 = vsel %vm1355_vm3, %v1350_v23, 0  ;;  %v1348_v26 = vsel %vm1337_vm2, 0, %v1330_v24  ;;  %v1406_v28 = vsel %vm793_vm4, %v1373_v19, 0  ;;  %v4609_v36 = vsel %vm793_vm4, 0, %v1373_v19 }
  0x95   : > { %v1377_v29 = vrot.slane %v1361_v25, 7  ;;  %v1360_v30 = vsel %vm1355_vm3, %v1348_v26, 0 }
  0x96   : > { %v1376_v34 = vrot.slane %v1360_v30, 7  ;;  %v1336_v35 = vpop.permute.xlu1 %1335 }
  0xe7   : > { %v4234_v37 = vpop.f32.mrb[0].mxu0 }
  0xe8   : > { %v508_v38 = vpop.f32.mrb[1].mxu0 }
  0xe9   : > { %v4290_v39 = vpack.c.bf16 %v4234_v37, %v508_v38  ;;  %v4612_v37 = vsel %vm793_vm4, 0, %v1377_v29  ;;  %v1414_v38 = vsel %vm793_vm4, %v1377_v29, 0 }
  0xeb   : > { %v4237_v40 = vpop.f32.mrb[2].mxu0  ;;  %4291 = vmatprep.subr.bf16.mxu0 %v4290_v39  ;;  %4306 = vmatprep.subr.bf16.mxu1 %v4290_v39 }
  0xec   : > { %v518_v41 = vpop.f32.mrb[3].mxu0  ;;  %4293 = vmatpush3.bf16.msra.mxu0 %v4290_v39  ;;  %4310 = vmatpush3.bf16.msra.mxu1 %v4290_v39  ;;  %v1354_v39 = vsel %vm1337_vm2, 0, %v1336_v35 }
  0xed   : > { %v4294_v42 = vpack.c.bf16 %v4237_v40, %v518_v41  ;;  %v1374_v40 = vrot.slane %v1358_v27, 7  ;;  %v1581_v41 = vcombine.low %v1406_v28, %v1414_v38 }
  0xef   : > { %v4240_v43 = vpop.f32.mrb[4].mxu0  ;;  %4295 = vmatprep.subr.bf16.mxu0 %v4294_v42  ;;  %4307 = vmatprep.subr.bf16.mxu1 %v4294_v42 }
  0xf0   : > { %v528_v44 = vpop.f32.mrb[5].mxu0  ;;  %4297 = vmatpush3.bf16.msra.mxu0 %v4294_v42  ;;  %4311 = vmatpush3.bf16.msra.mxu1 %v4294_v42  ;;  %v1334_v42 = vpop.permute.xlu0 %1333 }
  0xf1   : > { %v4298_v45 = vpack.c.bf16 %v4240_v43, %v528_v44  ;;  %v4617_v43 = vsel %vm793_vm4, 0, %v1372_v17  ;;  %v1412_v44 = vsel %vm793_vm4, %v1376_v34, 0 }
  0xf3   : > { %v4243_v46 = vpop.f32.mrb[6].mxu0  ;;  %4299 = vmatprep.subr.bf16.mxu0 %v4298_v45  ;;  %4308 = vmatprep.subr.bf16.mxu1 %v4298_v45 }
  0xf4   : > { %v538_v47 = vpop.f32.mrb[7].mxu0  ;;  %4301 = vmatpush3.bf16.msra.mxu0 %v4298_v45  ;;  %4312 = vmatpush3.bf16.msra.mxu1 %v4298_v45  ;;  %v1363_v45 = vsel %vm1355_vm3, %v1354_v39, 0  ;;  %v1488_v39 = vcombine.low %v4609_v36, %v4612_v37 }
  0xf5   : > { %v4302_v48 = vpack.c.bf16 %v4243_v46, %v538_v47  ;;  %v1489_v46 = vcombine.high %v4609_v36, %v4612_v37  ;;  %v1588_v47 = vrot.slane %v1581_v41, %v4606_v33 }
  0xf6   : > { %v1496_v37 = vrot.slane %v1488_v39, %v4606_v33  ;;  %v4733_v39 = vsub.s32 2, %v4589_v14 }
  0xf7   : > { %4303 = vmatprep.subr.bf16.mxu0 %v4302_v48  ;;  %4309 = vmatprep.subr.bf16.mxu1 %v4302_v48 }
  0xf8   : > { %4305 = vmatpush3.bf16.msra.mxu0 %v4302_v48  ;;  %4313 = vmatpush3.bf16.msra.mxu1 %v4302_v48  ;;  %v1393_v48 = vsel %vm793_vm4, 0, %v1376_v34 }
  0xfb   : > { %4261 = vmatmul.mubr.msk.f32.vlgmr.msra.gmra.mrb[8].mxu0 %vm567_vm1, %v548_v49  ;;  %4264 = vmatmul.mubr.msk.f32.vlgmr.msra.gmra.mrb[0].mxu1 %vm567_vm1, %v550_v50  ;;  %v1556_v49 = vcombine.low %v1404_v31, %v1412_v44  ;;  %v1390_v50 = vsel %vm793_vm4, 0, %v1375_v32 }
  0xfc   : > { %4266 = vmatprep.mubr.msk.f32.mxu1 %vm567_vm1, %v551_v51  ;;  %v1410_v51 = vsel %vm793_vm4, %v1375_v32, 0 }
  0xff   : > { %4267 = vmatmul.mubr.msk.f32.gmra.mrb[2].mxu1 %vm567_vm1, %v552_v52  ;;  %v1379_v52 = vrot.slane %v1363_v45, 7 }
 0x100   : > { %4269 = vmatprep.mubr.msk.f32.mxu1 %vm567_vm1, %v553_v53  ;;  %v1352_v53 = vsel %vm1337_vm2, 0, %v1334_v42 }
 0x103   : > { %4270 = vmatmul.mubr.msk.f32.gmra.mrb[4].mxu1 %vm567_vm1, %v554_v54  ;;  %v1387_v54 = vsel %vm793_vm4, 0, %v1374_v40 }
 0x104   : > { %4272 = vmatprep.mubr.msk.f32.mxu1 %vm567_vm1, %v555_v55  ;;  %v1563_v55 = vrot.slane %v1556_v49, %v4606_v33 }
 0x107   : > { %4273 = vmatmul.mubr.msk.f32.gmra.mrb[6].mxu1 %vm567_vm1, %v556_v56  ;;  %v1362_v56 = vsel %vm1355_vm3, %v1352_v53, 0 }
 0x108   : > { %4275 = vmatprep.mubr.msk.f32.mxu1 %vm567_vm1, %v557_v57  ;;  %v1421_v57 = vcombine.high %v4617_v43, %v1393_v48 }
 0x10a   : > { %v1435_v5 = vrot.slane %v1421_v57, %v4606_v33 }
 0x10b   : > { %4276 = vmatmul.mubr.msk.f32.gmra.mrb[8].mxu1 %vm567_vm1, %v558_v58  ;;  %v1402_v58 = vsel %vm793_vm4, 0, %v1379_v52 }
 0x10c   : > { %4278 = vmatprep.mubr.msk.f32.mxu1 %vm567_vm1, %v559_v59  ;;  %v1418_v59 = vsel %vm793_vm4, %v1379_v52, 0  ;;  %v1505_v63 = vcombine.high %v1390_v50, %v1402_v58  ;;  %v1504_v41 = vcombine.low %v1390_v50, %v1402_v58 }
 0x10e   : > { %v1519_v3 = vrot.slane %v1505_v63, %v4606_v33 }
 0x10f   : > { %4279 = vmatmul.mubr.msk.f32.gmra.mrb[10].mxu1 %vm567_vm1, %v560_v60  ;;  %v1378_v60 = vrot.slane %v1362_v56, 7 }
 0x110   : > { %4281 = vmatprep.mubr.msk.f32.mxu1 %vm567_vm1, %v561_v61  ;;  %v1408_v61 = vsel %vm793_vm4, %v1374_v40, 0  ;;  %v1420_v40 = vcombine.low %v4617_v43, %v1393_v48  ;;  %v1512_v48 = vrot.slane %v1504_v41, %v4606_v33 }
 0x111   : > { %v1399_v1 = vsel %vm793_vm4, 0, %v1378_v60  ;;  %v1416_v2 = vsel %vm793_vm4, %v1378_v60, 0 }
 0x112   : > { %v1437_v6 = vcombine.high %v1387_v54, %v1399_v1  ;;  %v1564_v7 = vcombine.low %v1408_v61, %v1416_v2  ;;  %v1436_v42 = vcombine.low %v1387_v54, %v1399_v1  ;;  %v1428_v43 = vrot.slane %v1420_v40, %v4606_v33 }
 0x113   : > { %4282 = vmatmul.mubr.msk.f32.gmra.mrb[12].mxu1 %vm567_vm1, %v562_v62  ;;  %v4636_v62 = vrot.slane %v1489_v46, %v4606_v33  ;;  %v1520_v53 = vcombine.low %v1496_v37, %v1512_v48  ;;  %v1521_v57 = vcombine.high %v1496_v37, %v1512_v48  ;;  %v4736_v37 = vsub.s32 1, %v4589_v14 }
 0x114   : > { %4284 = vmatprep.mubr.msk.f32.mxu1 %vm567_vm1, %v563_v0  ;;  %v1589_v0 = vcombine.low %v1410_v51, %v1418_v59  ;;  %v1451_v10 = vrot.slane %v1437_v6, %v4606_v33  ;;  %v1571_v11 = vrot.slane %v1564_v7, %v4606_v33  ;;  %v1444_v49 = vrot.slane %v1436_v42, %v4606_v33 }
 0x115   : > { %v1536_v58 = vcombine.low %v4636_v62, %v1519_v3  ;;  %v4706_v7 = vsub.s32 3, %v4589_v14 }
 0x116   : > { %v1469_v12 = vcombine.high %v1435_v5, %v1451_v10  ;;  %v1572_v13 = vcombine.low %v1563_v55, %v1571_v11  ;;  %v1452_v54 = vcombine.low %v1428_v43, %v1444_v49  ;;  %v1453_v59 = vcombine.high %v1428_v43, %v1444_v49 }
 0x117   : > { %4285 = vmatmul.mubr.msk.f32.gmra.mrb[14].mxu1 %vm567_vm1, %v564_v4  ;;  %v1596_v4 = vrot.slane %v1589_v0, %v4606_v33  ;;  %v1468_v60 = vcombine.low %v1435_v5, %v1451_v10  ;;  %v4739_v43 = vsub.s32 0, %v4589_v14 }
 0x118   : > { %4287 = vmatprep.mubr.msk.f32.mxu1 %vm567_vm1, %v565_v8  ;;  %v1537_v8 = vcombine.high %v4636_v62, %v1519_v3 }
 0x119   : > { %v1597_v9 = vcombine.low %v1588_v47, %v1596_v4 }
 0x11b   : > { %4288 = vmatmul.mubr.msk.f32.gmra.mrb[16].mxu1 %vm567_vm1, %v566_v15  ;;  %v4383_v15 = vmov 1934713408  }
 0x11c   : > { %v1455_v16 = vunpack.c.l.s4 %v4383_v15 }
 0x11e   : > { %v1456_v17 = vunpack.c.0.s8 %v1455_v16 }
 0x120   : > { %v1459_v19 = vsub.s32 %v1456_v17, %v4589_v14 }
 0x122   : > { %v4647_v20 = vrot.slane %v1469_v12, %v1459_v19  ;;  %v4649_v21 = vrot.slane %v1537_v8, %v1459_v19  ;;  %v4667_v30 = vrot.slane %v1572_v13, %v1459_v19  ;;  %v4669_v31 = vrot.slane %v1597_v9, %v1459_v19  ;;  %v4711_v8 = vld [vmem:[%s6920_s2] sm:$0xff] }
 0x123   : > { %v1528_v55 = vrot.slane %v1520_v53, %v1459_v19  ;;  %v1460_v56 = vrot.slane %v1452_v54, %v1459_v19  ;;  %v1544_v33 = vrot.slane %v1536_v58, %v1459_v19  ;;  %v1476_v0 = vrot.slane %v1468_v60, %v1459_v19 }
 0x124   : > { %v1645_v22 = vshrl.u32 %v4647_v20, 16  ;;  %v1644_v23 = vpack.i.b16 %v4649_v21, %v4647_v20  ;;  %v1646_v24 = vshrl.u32 %v4649_v21, 16  ;;  %v4659_v26 = vcombine.high %v4647_v20, %v4380_v18 }
 0x125   : > { %v4663_v27 = vcombine.high %v4649_v21, %v4380_v18  ;;  %v1656_v34 = vpack.i.b16 %v4669_v31, %v4667_v30  ;;  %v1657_v35 = vshrl.u32 %v4667_v30, 16  ;;  %v1658_v38 = vshrl.u32 %v4669_v31, 16 }
 0x126   : > { %v4655_v25 = vpack.i.b16 %v1646_v24, %v1645_v22  ;;  %v1651_v28 = vshrl.u32 %v4659_v26, 16  ;;  %v4686_v46 = vcombine.high %v4667_v30, %v4380_v18  ;;  %v4690_v47 = vcombine.high %v4669_v31, %v4380_v18 }
 0x127   : > { %v1652_v29 = vshrl.u32 %v4663_v27, 16  ;;  %v1650_v44 = vpack.i.b16 %v4663_v27, %v4659_v26  ;;  %v4682_v45 = vpack.i.b16 %v1658_v38, %v1657_v35  ;;  %v1484_v61 = vcombine.high %v1460_v56, %v4380_v18 }
 0x128   : > { %6960 = vst [vmem:[#allocation3_spill] sm:$0xff] %v4655_v25  ;;  %6963 = vst [vmem:[#allocation6_spill] sm:$0xff] %v4686_v46  ;;  %v1663_v50 = vshrl.u32 %v4686_v46, 16  ;;  %v1664_v51 = vshrl.u32 %v4690_v47, 16  ;;  %v1552_v63 = vcombine.high %v1528_v55, %v4380_v18  ;;  %v1467_v1 = vrot.slane %v1453_v59, %v1459_v19 }
 0x129   : > { %v4671_v32 = vpack.i.b16 %v1652_v29, %v1651_v28  ;;  %6962 = vst [vmem:[#allocation5_spill] sm:$0xff] %v4682_v45  ;;  %6964 = vst [vmem:[#allocation7_spill] sm:$0xff] %v4690_v47  ;;  %v1535_v2 = vrot.slane %v1521_v57, %v1459_v19  ;;  %v1615_v4 = vshrl.u32 %v1484_v61, 16  ;;  %v4716_v5 = vcombine.high %v1476_v0, %v4380_v18 }
 0x12a   : > { %v4700_v52 = vpack.i.b16 %v1664_v51, %v1663_v50  ;;  %v1616_v6 = vshrl.u32 %v1552_v63, 16  ;;  %v1485_v62 = vcombine.high %v1467_v1, %v4380_v18  ;;  %v4719_v9 = vcombine.high %v1544_v33, %v4380_v18 }
 0x12b   : > { %6961 = vst [vmem:[#allocation4_spill] sm:$0xff] %v4671_v32  ;;  %v1553_v3 = vcombine.high %v1535_v2, %v4380_v18  ;;  %6966 = vst [vmem:[#allocation9_spill] sm:$0xff] %v4716_v5  ;;  %v1614_v11 = vpack.i.b16 %v1552_v63, %v1484_v61  ;;  %v1609_v12 = vshrl.u32 %v1460_v56, 16  ;;  %v1610_v13 = vshrl.u32 %v1528_v55, 16  ;;  %v4769_v63 = vld [vmem:[%s6920_s2 + $0x8] sm:$0xff] }
 0x12c   : > { %6965 = vst [vmem:[#allocation8_spill] sm:$0xff] %v4700_v52  ;;  %6967 = vst [vmem:[#allocation10_spill] sm:$0xff] %v4719_v9  ;;  %v4721_v10 = vpack.i.b16 %v1616_v6, %v1615_v4  ;;  %v1621_v16 = vshrl.u32 %v1467_v1, 16  ;;  %v1622_v17 = vshrl.u32 %v1535_v2, 16  ;;  %v1627_v19 = vshrl.u32 %v1485_v62, 16 }
 0x12d   : > { %v1628_v22 = vshrl.u32 %v1553_v3, 16  ;;  %v1639_v24 = vshrl.u32 %v4716_v5, 16  ;;  %v1640_v28 = vshrl.u32 %v4719_v9, 16  ;;  %v4728_v18 = vrot.slane %v1614_v11, 4 }
 0x12e   : > { %v4730_v35 = vpack.i.b16 %v1610_v13, %v1609_v12  ;;  %v1608_v38 = vpack.i.b16 %v1528_v55, %v1460_v56  ;;  %v1620_v40 = vpack.i.b16 %v1535_v2, %v1467_v1  ;;  %v1633_v41 = vshrl.u32 %v1476_v0, 16 }
 0x12f   : > { %v1634_v42 = vshrl.u32 %v1544_v33, 16  ;;  %v4741_v48 = vpack.i.b16 %v1622_v17, %v1621_v16  ;;  %v1626_v49 = vpack.i.b16 %v1553_v3, %v1485_v62  ;;  %v4744_v50 = vsub.s32 4, %v4589_v14 }
 0x130   : > { %v4747_v51 = vsub.s32 5, %v4589_v14  ;;  %v4749_v53 = vpack.i.b16 %v1628_v22, %v1627_v19  ;;  %v4751_v54 = vpack.i.b16 %v1640_v28, %v1639_v24  ;;  %v4754_v56 = vrot.slane %v1608_v38, 4 }
 0x131   : > { %v4757_v57 = vsub.s32 6, %v4589_v14  ;;  %v1632_v58 = vpack.i.b16 %v1544_v33, %v1476_v0  ;;  %v4761_v60 = vrot.slane %v1620_v40, 4  ;;  %v4764_v61 = vsub.s32 7, %v4589_v14 }
 0x132   : > { %6968 = vst [vmem:[#allocation11_spill] sm:$0xff] %v4751_v54  ;;  %v4771_v1 = vpack.i.b16 %v1634_v42, %v1633_v41  ;;  %v4778_v4 = vrot.slane %v1626_v49, 4  ;;  %v4802_v24 = vrot.slane %v1644_v23, 4  ;;  %v4811_v41 = vrot.slane %v1656_v34, 4  ;;  %v4833_v23 = vld [vmem:[%s6920_s2 + $0x10] sm:$0xf] }
 0x133   : > { %v4790_v13 = vrot.slane %v1632_v58, 4  ;;  %v4824_v58 = vrot.slane %v1650_v44, 4  ;;  %6974 = vst [vmem:[#allocation17_spill] sm:$0xff] %v4833_v23 }
 0x134   : > { %6969 = vst [vmem:[#allocation12_spill] sm:$0xff] %v4771_v1  ;;  %6971 = vst [vmem:[#allocation14_spill] sm:$0xff] %v4802_v24 }
 0x135   : > { %6970 = vst [vmem:[#allocation13_spill] sm:$0xff] %v4790_v13  ;;  %6972 = vst [vmem:[#allocation15_spill] sm:$0xff] %v4811_v41 }
 0x136   : > { %6973 = vst [vmem:[#allocation16_spill] sm:$0xff] %v4824_v58 }
 0x1ce   : > { %v4262_v42 = vpop.f32.mrb[8].mxu0  ;;  %v4813_v49 = vpop.f32.mrb[0].mxu1 }
 0x1cf   : > { %v936_v30 = vrot.slane %v4262_v42, 1  ;;  %v951_v31 = vrot.slane %v4262_v42, 2  ;;  %v966_v34 = vrot.slane %v4262_v42, 3  ;;  %v694_v36 = vpop.f32.mrb[9].mxu0  ;;  %v4826_v16 = vpop.f32.mrb[1].mxu1  ;;  %v981_v38 = vrot.slane %v4262_v42, 4 }
 0x1d0   : > { %v996_v22 = vrot.slane %v4262_v42, 5  ;;  %v1011_v21 = vrot.slane %v4262_v42, 6  ;;  %v1026_v20 = vrot.slane %v4262_v42, 7  ;;  %v4836_v26 = vsel %vm793_vm4, %v4262_v42, 0.0 }
 0x1d1   : > { %v4845_v3 = vsel %vm793_vm4, %v936_v30, 0.0  ;;  %v4848_v28 = vsel %vm793_vm4, %v951_v31, 0.0  ;;  %v4851_v19 = vsel %vm793_vm4, %v966_v34, 0.0  ;;  %v4857_v27 = vsel %vm793_vm4, %v981_v38, 0.0 }
 0x1d2   : > { %v4854_v62 = vpop.f32.mrb[2].mxu1  ;;  %v997_v44 = vsel %vm793_vm4, %v996_v22, 0.0  ;;  %v4861_v40 = vsel %vm793_vm4, %v1011_v21, 0.0  ;;  %v4864_v30 = vsel %vm793_vm4, %v1026_v20, 0.0  ;;  %v816_v17 = vrot.slane %v694_v36, 1 }
 0x1d3   : > { %6975 = vst [vmem:[#allocation18_spill] sm:$0xff] %v4861_v40  ;;  %6976 = vst [vmem:[#allocation19_spill] sm:$0xff] %v4864_v30  ;;  %v4866_v31 = vpop.f32.mrb[3].mxu1  ;;  %v794_v38 = vsel %vm793_vm4, %v694_v36, 0.0  ;;  %v831_v11 = vrot.slane %v694_v36, 2  ;;  %v846_v6 = vrot.slane %v694_v36, 3 }
 0x1d4   : > { %v861_v22 = vrot.slane %v694_v36, 4  ;;  %v876_v14 = vrot.slane %v694_v36, 5  ;;  %v891_v55 = vrot.slane %v694_v36, 6  ;;  %v795_v20 = vrot.slane %v4826_v16, 3 }
 0x1d5   : > { %v953_v34 = vrot.slane %v4813_v49, 5  ;;  %v817_v12 = vsel %vm793_vm4, %v816_v17, 0.0  ;;  %v906_v29 = vrot.slane %v694_v36, 7  ;;  %v832_v59 = vsel %vm793_vm4, %v831_v11, 0.0 }
 0x1d6   : > { %v4874_v33 = vpop.f32.mrb[4].mxu1  ;;  %v847_v15 = vsel %vm793_vm4, %v846_v6, 0.0  ;;  %v4884_v21 = vsel %vm796_vm5, %v795_v20, %v794_v38  ;;  %v818_v42 = vrot.slane %v4826_v16, 4  ;;  %v4888_v52 = vsel %vm793_vm4, %v861_v22, 0.0 }
 0x1d7   : > { %v4879_v2 = vpop.f32.mrb[5].mxu1  ;;  %v833_v46 = vrot.slane %v4826_v16, 5  ;;  %v848_v0 = vrot.slane %v4826_v16, 6  ;;  %v1056_v36 = vrot.slane %v4826_v16, 1  ;;  %v4894_v17 = vsel %vm793_vm4, %v876_v14, 0.0 }
 0x1d8   : > { %v4897_v11 = vsel %vm793_vm4, %v891_v55, 0.0  ;;  %v4900_v6 = vsel %vm796_vm5, %v818_v42, %v817_v12  ;;  %v1071_v38 = vrot.slane %v4826_v16, 2  ;;  %v4906_v22 = vsel %vm793_vm4, %v906_v29, 0.0 }
 0x1d9   : > { %v834_v5 = vsel %vm796_vm5, %v833_v46, %v832_v59  ;;  %v4910_v9 = vsel %vm796_vm5, %v848_v0, %v847_v15  ;;  %v1041_v14 = vsel %vm793_vm4, %v4826_v16, 0.0  ;;  %v1057_v12 = vsel %vm793_vm4, %v1056_v36, 0.0 }
 0x1da   : > { %v4903_v47 = vpop.f32.mrb[6].mxu1  ;;  %v1086_v42 = vsel %vm793_vm4, %v795_v20, 0.0  ;;  %v4921_v29 = vsel %vm799_vm6, %v4854_v62, %v834_v5  ;;  %v1072_v46 = vsel %vm793_vm4, %v1071_v38, 0.0  ;;  %v4931_v20 = vsel %vm796_vm5, %v4866_v31, %v997_v44 }
 0x1db   : > { %6977 = vst [vmem:[#allocation20_spill] sm:$0xff] %v4903_v47  ;;  %v4914_v55 = vpop.f32.mrb[7].mxu1  ;;  %6978 = vst [vmem:[#allocation21_spill] sm:$0xff] %v4931_v20  ;;  %v1042_v41 = vrot.slane %v4866_v31, 3  ;;  %v1058_v38 = vrot.slane %v4866_v31, 4  ;;  %v1073_v15 = vrot.slane %v4866_v31, 5  ;;  %v5048_v20 = vpop.permute.xlu0 %1100 }
 0x1dc   : > { %v1087_v59 = vrot.slane %v4866_v31, 6  ;;  %v1044_v23 = vrot.slane %v4874_v33, 6  ;;  %v1060_v25 = vrot.slane %v4874_v33, 7  ;;  %v6985_v30 = vrot.slane %v4854_v62, 1 }
 0x1dd   : > { %v1043_v45 = vsel %vm796_vm5, %v1042_v41, %v1041_v14  ;;  %v1059_v32 = vsel %vm796_vm5, %v1058_v38, %v1057_v12  ;;  %v1074_v24 = vsel %vm796_vm5, %v1073_v15, %v1072_v46  ;;  %v6982_v12 = vrot.slane %v4874_v33, 1 }
 0x1de   : > { %v4934_v5 = vpop.f32.mrb[8].mxu1  ;;  %v4954_v36 = vsel %vm799_vm6, %v4874_v33, %v1074_v24  ;;  %v1088_v44 = vsel %vm796_vm5, %v1087_v59, %v1086_v42  ;;  %v4960_v41 = vsel %vm799_vm6, %v1044_v23, %v1043_v45  ;;  %v4963_v14 = vsel %vm799_vm6, %v1060_v25, %v1059_v32 }
 0x1df   : > { %v4940_v58 = vpop.f32.mrb[9].mxu1  ;;  %6979 = vst [vmem:[#allocation22_spill] sm:$0xff] %v4954_v36  ;;  %6980 = vst [vmem:[#allocation23_spill] sm:$0xff] %v4960_v41  ;;  %v4968_v46 = vsel %vm799_vm6, %v6982_v12, %v1088_v44  ;;  %v954_v15 = vsel %vm796_vm5, %v953_v34, %v4848_v28  ;;  %v836_v42 = vrot.slane %v4874_v33, 3  ;;  %v852_v59 = vrot.slane %v4874_v33, 4 }
 0x1e0   : > { %6981 = vst [vmem:[#allocation24_spill] sm:$0xff] %v4963_v14  ;;  %6983 = vst [vmem:[#allocation25_spill] sm:$0xff] %v4968_v46  ;;  %v4979_v25 = vsel %vm799_vm6, %v4879_v2, %v954_v15  ;;  %v804_v23 = vrot.slane %v4940_v58, 4  ;;  %v824_v28 = vrot.slane %v4940_v58, 5  ;;  %v838_v34 = vrot.slane %v4940_v58, 6 }
 0x1e1   : > { %v854_v44 = vrot.slane %v4940_v58, 7  ;;  %v851_v12 = vsel %vm799_vm6, %v6985_v30, %v4910_v9  ;;  %v837_v14 = vsel %vm802_vm7, %v836_v42, %v4921_v29  ;;  %v6986_v9 = vrot.slane %v4854_v62, 7 }
 0x1e2   : > { %v4957_v16 = vpop.f32.mrb[10].mxu1  ;;  %v853_v46 = vsel %vm802_vm7, %v852_v59, %v851_v12  ;;  %v6987_v42 = vrot.slane %v4874_v33, 2 }
 0x1e3   : > { %v4972_v24 = vpop.f32.mrb[11].mxu1  ;;  %v855_v1 = vsel %vm805_vm8, %v854_v44, %v853_v46  ;;  %v821_v30 = vsel %vm799_vm6, %v6986_v9, %v4900_v6 }
 0x1e4   : > { %v840_v15 = vrot.slane %v4972_v24, 1  ;;  %v856_v32 = vrot.slane %v4972_v24, 2  ;;  %v823_v46 = vsel %vm802_vm7, %v6987_v42, %v821_v30  ;;  %v6989_v30 = vrot.slane %v4874_v33, 1 }
 0x1e5   : > { %v825_v12 = vsel %vm805_vm8, %v824_v28, %v823_v46 }
 0x1e6   : > { %v4989_v45 = vpop.f32.mrb[12].mxu1  ;;  %v857_v59 = vsel %vm808_vm9, %v856_v32, %v855_v1 }
 0x1e7   : > { %v4995_v40 = vpop.f32.mrb[13].mxu1  ;;  %v858_v54 = vrot.slane %v4989_v45, 5  ;;  %v842_v41 = vrot.slane %v4989_v45, 4  ;;  %v810_v42 = vrot.slane %v4989_v45, 2 }
 0x1ea   : > { %v5009_v0 = vpop.f32.mrb[14].mxu1 }
 0x1eb   : > { %v5015_v38 = vpop.f32.mrb[15].mxu1  ;;  %v844_v47 = vrot.slane %v5009_v0, 7  ;;  %v829_v6 = vrot.slane %v5009_v0, 6  ;;  %v813_v46 = vrot.slane %v5009_v0, 5 }
 0x1ee   : > { %v5028_v13 = vpop.f32.mrb[16].mxu1 }
 0x1ef   : > { %6984 = vst [vmem:[#allocation26_spill] sm:$0xff] %v5028_v13  ;;  %v5034_v36 = vpop.f32.mrb[17].mxu1  ;;  %v839_v13 = vsel %vm805_vm8, %v838_v34, %v837_v14  ;;  %v827_v14 = vrot.slane %v4989_v45, 3  ;;  %v859_v34 = vsel %vm811_vm11, %v858_v54, %v857_v59 }
 0x1f0   : > { %v841_v29 = vsel %vm808_vm9, %v840_v15, %v839_v13  ;;  %v860_v1 = vsel %vm814_vm10, %v5009_v0, %v859_v34  ;;  %v826_v13 = vsel %vm808_vm9, %v4972_v24, %v825_v12  ;;  %v6988_v15 = vrot.slane %v4854_v62, 6 }
 0x1f1   : > { %v843_v44 = vsel %vm811_vm11, %v842_v41, %v841_v29  ;;  %v1106_v54 = vadd.f32 %v5048_v20, %v860_v1  ;;  %v828_v28 = vsel %vm811_vm11, %v827_v14, %v826_v13  ;;  %v6990_v12 = vrot.slane %v4972_v24, 7 }
 0x1f2   : > { %v845_v32 = vsel %vm814_vm10, %v844_v47, %v843_v44  ;;  %v800_v9 = vsel %vm799_vm6, %v6988_v15, %v4884_v21  ;;  %v830_v47 = vsel %vm814_vm10, %v829_v6, %v828_v28  ;;  %v6991_v1 = vrot.slane %v4813_v49, 7 }
 0x1f3   : > { %v1105_v41 = vadd.f32 %v5048_v20, %v845_v32  ;;  %v803_v59 = vsel %vm802_vm7, %v6989_v30, %v800_v9  ;;  %v1126_v34 = vmax.f32 %v1106_v54, 0.0  ;;  %v1104_v44 = vadd.f32 %v5048_v20, %v830_v47 }
 0x1f4   : > { %v806_v29 = vsel %vm805_vm8, %v804_v23, %v803_v59  ;;  %v864_v6 = vsel %vm796_vm5, %v6991_v1, %v4888_v52  ;;  %v870_v23 = vrot.slane %v4957_v16, 3  ;;  %v872_v32 = vrot.slane %v4989_v45, 6 }
 0x1f5   : > { %v1125_v21 = vmax.f32 %v1105_v41, 0.0  ;;  %v809_v14 = vsel %vm808_vm9, %v6990_v12, %v806_v29  ;;  %v6992_v13 = vrot.slane %v4711_v8, %v4706_v7  ;;  %v6993_v9 = vrot.slane %v4711_v8, %v4733_v39 }
 0x1f6   : > { %v812_v33 = vsel %vm811_vm11, %v810_v42, %v809_v14  ;;  %v1124_v41 = vmax.f32 %v1104_v44, 0.0  ;;  %v6994_v52 = vrot.slane %v4854_v62, 2  ;;  %v874_v47 = vrot.slane %v5034_v36, 1 }
 0x1f7   : > { %v1252_v15 = vmul.f32 %v6992_v13, %v1126_v34  ;;  %v1251_v54 = vmul.f32 %v6993_v9, %v1125_v21  ;;  %v815_v28 = vsel %vm814_vm10, %v813_v46, %v812_v33  ;;  %v878_v29 = vsel %vm796_vm5, %v4813_v49, %v4894_v17 }
 0x1f8   : > { %v1103_v30 = vadd.f32 %v5048_v20, %v815_v28  ;;  %v866_v59 = vsel %vm799_vm6, %v6994_v52, %v864_v6  ;;  %v6995_v21 = vrot.slane %v4711_v8, %v4736_v37  ;;  %v6996_v12 = vrot.slane %v4914_v55, 5 }
 0x1f9   : > { %v1272_v42 = vpack.c.bf16 %v1252_v15, %v1252_v15  ;;  %v1271_v34 = vpack.c.bf16 %v1251_v54, %v1251_v54  ;;  %v6997_v6 = vrot.slane %v4854_v62, 3  ;;  %v885_v17 = vrot.slane %v4957_v16, 4 }
 0x1fa   : > { %v1250_v44 = vmul.f32 %v6995_v21, %v1124_v41  ;;  %v868_v14 = vsel %vm802_vm7, %v6996_v12, %v866_v59  ;;  %v1123_v33 = vmax.f32 %v1103_v30, 0.0  ;;  %v1078_v15 = vrot.slane %v4972_v24, 6 }
 0x1fb   : > { %v869_v1 = vsel %vm805_vm8, %v4940_v58, %v868_v14  ;;  %v880_v13 = vsel %vm799_vm6, %v6997_v6, %v878_v29  ;;  %v6998_v9 = vrot.slane %v4721_v10, 4  ;;  %v6999_v30 = vrot.slane %v4711_v8, %v4739_v43 }
 0x1fc   : > { %v1270_v41 = vpack.c.bf16 %v1250_v44, %v1250_v44  ;;  %v871_v28 = vsel %vm808_vm9, %v870_v23, %v869_v1  ;;  %v7000_v29 = vrot.slane %v4914_v55, 6  ;;  %v5136_v23 = vsel %vm1686_vm12, %v1271_v34, %v4728_v18 }
 0x1fd   : > { %v1698_v54 = vsel %vm1686_vm12, %v1272_v42, %v6998_v9  ;;  %v1249_v52 = vmul.f32 %v6999_v30, %v1123_v33  ;;  %v873_v59 = vsel %vm811_vm11, %v872_v32, %v871_v28  ;;  %v887_v42 = vrot.slane %v4989_v45, 7 }
 0x1fe   : > { %1816 = vrot.lane.b32.xlu1 %v1698_v54, %s4384_s13  ;;  %1767 = vrot.lane.b32.xlu0 %v1698_v54, %s4385_s15  ;;  %v882_v10 = vsel %vm802_vm7, %v7000_v29, %v880_v13  ;;  %v875_v21 = vsel %vm814_vm10, %v874_v47, %v873_v59  ;;  %v7001_v44 = vrot.slane %v4940_v58, 1  ;;  %v889_v14 = vrot.slane %v5034_v36, 2 }
 0x1ff   : > { %v7002_v32 = vrot.slane %v4730_v35, 4  ;;  %v1107_v1 = vadd.f32 %v5048_v20, %v875_v21  ;;  %v7003_v18 = vrot.slane %v4813_v49, 1  ;;  %v1269_v47 = vpack.c.bf16 %v1249_v52, %v1249_v52 }
 0x200   : > { %v884_v12 = vsel %vm805_vm8, %v7001_v44, %v882_v10  ;;  %v7004_v9 = vrot.slane %v4854_v62, 4  ;;  %v901_v35 = vrot.slane %v4957_v16, 5  ;;  %v7005_v30 = vrot.slane %v4914_v55, 7 }
 0x201   : > { %v1692_v33 = vsel %vm1686_vm12, %v1270_v41, %v7002_v32  ;;  %v886_v6 = vsel %vm808_vm9, %v885_v17, %v884_v12  ;;  %v894_v34 = vsel %vm796_vm5, %v7003_v18, %v4897_v11  ;;  %v1127_v17 = vmax.f32 %v1107_v1, 0.0 }
 0x202   : > { %v888_v13 = vsel %vm811_vm11, %v887_v42, %v886_v6  ;;  %v896_v28 = vsel %vm799_vm6, %v7004_v9, %v894_v34  ;;  %1897 = vrot.lane.b32.xlu1 %v1698_v54, %s4381_s14  ;;  %1814 = vrot.lane.b32.xlu0 %v5136_v23, %s4384_s13  ;;  %v904_v52 = vrot.slane %v5034_v36, 3  ;;  %v7006_v29 = vrot.slane %v4940_v58, 2 }
 0x203   : > { %v890_v41 = vsel %vm814_vm10, %v889_v14, %v888_v13  ;;  %v898_v11 = vsel %vm802_vm7, %v7005_v30, %v896_v28  ;;  %v7007_v54 = vrot.slane %v4813_v49, 2  ;;  %v915_v21 = vrot.slane %v4957_v16, 6 }
 0x204   : > { %v1108_v59 = vadd.f32 %v5048_v20, %v890_v41  ;;  %v900_v10 = vsel %vm805_vm8, %v7006_v29, %v898_v11  ;;  %v7008_v44 = vrot.slane %v4711_v8, %v4744_v50  ;;  %v7009_v32 = vrot.slane %v4854_v62, 5 }
 0x205   : > { %v909_v42 = vsel %vm796_vm5, %v7007_v54, %v4906_v22  ;;  %v902_v14 = vsel %vm808_vm9, %v901_v35, %v900_v10  ;;  %v917_v6 = vrot.slane %v4989_v45, 1  ;;  %v919_v13 = vrot.slane %v5034_v36, 4 }
 0x206   : > { %v1253_v12 = vmul.f32 %v7008_v44, %v1127_v17  ;;  %v911_v1 = vsel %vm799_vm6, %v7009_v32, %v909_v42  ;;  %v1128_v18 = vmax.f32 %v1108_v59, 0.0  ;;  %v903_v34 = vsel %vm811_vm11, %v4989_v45, %v902_v14  ;;  %1893 = vrot.lane.b32.xlu0 %v1692_v33, %s4381_s14  ;;  %1763 = vrot.lane.b32.xlu1 %v1692_v33, %s4385_s15 }
 0x207   : > { %v912_v22 = vsel %vm802_vm7, %v4914_v55, %v911_v1  ;;  %v905_v62 = vsel %vm814_vm10, %v904_v52, %v903_v34  ;;  %v7010_v28 = vrot.slane %v4940_v58, 3  ;;  %v976_v17 = vrot.slane %v4957_v16, 2 }
 0x208   : > { %v1273_v9 = vpack.c.bf16 %v1253_v12, %v1253_v12  ;;  %v7011_v45 = vrot.slane %v4711_v8, %v4747_v51  ;;  %v1109_v30 = vadd.f32 %v5048_v20, %v905_v62  ;;  %v7012_v59 = vrot.slane %v4813_v49, 6 }
 0x209   : > { %v914_v35 = vsel %vm805_vm8, %v7010_v28, %v912_v22  ;;  %v1689_v58 = vsel %vm1686_vm12, %v1269_v47, %v4754_v56  ;;  %v7013_v10 = vrot.slane %v4879_v2, 1  ;;  %v978_v42 = vrot.slane %v5015_v38, 5 }
 0x20a   : > { %v1254_v41 = vmul.f32 %v7011_v45, %v1128_v18  ;;  %v916_v11 = vsel %vm808_vm9, %v915_v21, %v914_v35  ;;  %v969_v29 = vsel %vm796_vm5, %v7012_v59, %v4851_v19  ;;  %v5212_v44 = vsel %vm1686_vm12, %v1273_v9, %v4761_v60  ;;  %1765 = vrot.lane.b32.xlu1 %v5136_v23, %s4385_s15 }
 0x20b   : > { %v918_v52 = vsel %vm811_vm11, %v917_v6, %v916_v11  ;;  %v971_v54 = vsel %vm799_vm6, %v7013_v10, %v969_v29  ;;  %v1129_v21 = vmax.f32 %v1109_v30, 0.0  ;;  %v7014_v19 = vrot.slane %v4914_v55, 4  ;;  %1891 = vrot.lane.b32.xlu0 %v1689_v58, %s4381_s14 }
 0x20c   : > { %v920_v12 = vsel %vm814_vm10, %v919_v13, %v918_v52  ;;  %v7015_v47 = vrot.slane %v4934_v5, 7  ;;  %v7016_v60 = vrot.slane %v4813_v49, 3  ;;  %v930_v6 = vrot.slane %v4957_v16, 7 }
 0x20d   : > { %v973_v14 = vsel %vm802_vm7, %v7014_v19, %v971_v54  ;;  %v1110_v56 = vadd.f32 %v5048_v20, %v920_v12  ;;  %v1274_v18 = vpack.c.bf16 %v1254_v41, %v1254_v41  ;;  %v7017_v34 = vrot.slane %v4711_v8, %v4757_v57 }
 0x20e   : > { %v975_v32 = vsel %vm805_vm8, %v7015_v47, %v973_v14  ;;  %v923_v1 = vsel %vm796_vm5, %v7016_v60, %v4836_v26  ;;  %v7018_v9 = vrot.slane %v4879_v2, 6  ;;  %v7019_v45 = vrot.slane %v4914_v55, 1  ;;  %1812 = vrot.lane.b32.xlu1 %v1692_v33, %s4384_s13 }
 0x20f   : > { %v1255_v22 = vmul.f32 %v7017_v34, %v1129_v21  ;;  %v977_v13 = vsel %vm808_vm9, %v976_v17, %v975_v32  ;;  %v1130_v28 = vmax.f32 %v1110_v56, 0.0  ;;  %v932_v30 = vrot.slane %v5015_v38, 2  ;;  %1769 = vrot.lane.b32.xlu0 %v5212_v44, %s4385_s15 }
 0x210   : > { %v925_v62 = vsel %vm799_vm6, %v7018_v9, %v923_v1  ;;  %v979_v35 = vsel %vm811_vm11, %v978_v42, %v977_v13  ;;  %v7020_v59 = vrot.slane %v4934_v5, 4  ;;  %v934_v29 = vrot.slane %v5034_v36, 5 }
 0x211   : > { %v927_v26 = vsel %vm802_vm7, %v7019_v45, %v925_v62  ;;  %v1275_v41 = vpack.c.bf16 %v1255_v22, %v1255_v22  ;;  %v980_v11 = vsel %vm814_vm10, %v5034_v36, %v979_v35  ;;  %v1052_v58 = vrot.slane %v5009_v0, 2 }
 0x212   : > { %v929_v17 = vsel %vm805_vm8, %v7020_v59, %v927_v26  ;;  %v7021_v52 = vrot.slane %v4711_v8, %v4764_v61  ;;  %v1114_v54 = vadd.f32 %v5048_v20, %v980_v11  ;;  %v7022_v12 = vrot.slane %v4813_v49, 4  ;;  %1895 = vrot.lane.b32.xlu1 %v5136_v23, %s4381_s14 }
 0x213   : > { %v931_v42 = vsel %vm808_vm9, %v930_v6, %v929_v17  ;;  %v947_v33 = vrot.slane %v5015_v38, 3  ;;  %v949_v14 = vrot.slane %v5034_v36, 6  ;;  %v7023_v32 = vrot.slane %v4879_v2, 7  ;;  %1818 = vrot.lane.b32.xlu0 %v5212_v44, %s4384_s13 }
 0x214   : > { %v1256_v10 = vmul.f32 %v7021_v52, %v1130_v28  ;;  %v933_v21 = vsel %vm811_vm11, %v932_v30, %v931_v42  ;;  %v939_v19 = vsel %vm796_vm5, %v7022_v12, %v4845_v3  ;;  %v1134_v47 = vmax.f32 %v1114_v54, 0.0 }
 0x215   : > { %v935_v8 = vsel %vm814_vm10, %v934_v29, %v933_v21  ;;  %v941_v60 = vsel %vm799_vm6, %v7023_v32, %v939_v19  ;;  %v7024_v6 = vrot.slane %v4914_v55, 2  ;;  %v7025_v3 = vrot.slane %v4914_v55, 3 }
 0x216   : > { %v1276_v56 = vpack.c.bf16 %v1256_v10, %v1256_v10  ;;  %v1111_v1 = vadd.f32 %v5048_v20, %v935_v8  ;;  %v960_v22 = vrot.slane %v4957_v16, 1  ;;  %v1067_v13 = vrot.slane %v5009_v0, 3 }
 0x217   : > { %v943_v49 = vsel %vm802_vm7, %v7024_v6, %v941_v60  ;;  %v957_v34 = vsel %vm802_vm7, %v7025_v3, %v4979_v25  ;;  %v7026_v9 = vrot.slane %v4769_v63, %v4706_v7  ;;  %v7027_v28 = vrot.slane %v4934_v5, 5  ;;  %v7034_v60 = vld [vmem:[#allocation21_spill] sm:$0xff]  ;;  %v7036_v3 = vld [vmem:[#allocation20_spill] sm:$0xff] }
 0x218   : > { %v962_v25 = vrot.slane %v5015_v38, 4  ;;  %v1131_v35 = vmax.f32 %v1111_v1, 0.0  ;;  %v7028_v26 = vrot.slane %v4934_v5, 6  ;;  %v964_v30 = vrot.slane %v5034_v36, 7 }
 0x219   : > { %v1260_v62 = vmul.f32 %v7026_v9, %v1134_v47  ;;  %v945_v55 = vsel %vm805_vm8, %v7027_v28, %v943_v49  ;;  %v7029_v11 = vrot.slane %v4741_v48, 4  ;;  %v5302_v17 = vsel %vm1686_vm12, %v1275_v41, %v4778_v4 }
 0x21a   : > { %v946_v45 = vsel %vm808_vm9, %v4957_v16, %v945_v55  ;;  %v959_v23 = vsel %vm805_vm8, %v7028_v26, %v957_v34  ;;  %v7030_v16 = vrot.slane %v4749_v53, 4  ;;  %v7031_v36 = vrot.slane %v4769_v63, %v4739_v43  ;;  %1773 = vrot.lane.b32.xlu0 %v5302_v17, %s4385_s15 }
 0x21b   : > { %v5298_v59 = vsel %vm1686_vm12, %v1274_v18, %v7029_v11  ;;  %v948_v29 = vsel %vm811_vm11, %v947_v33, %v946_v45  ;;  %v961_v52 = vsel %vm808_vm9, %v960_v22, %v959_v23  ;;  %v1082_v4 = vrot.slane %v5009_v0, 4 }
 0x21c   : > { %v5309_v10 = vsel %vm1686_vm12, %v1276_v56, %v7030_v16  ;;  %v1257_v48 = vmul.f32 %v7031_v36, %v1131_v35  ;;  %v950_v18 = vsel %vm814_vm10, %v949_v14, %v948_v29  ;;  %v963_v54 = vsel %vm811_vm11, %v962_v25, %v961_v52  ;;  %1771 = vrot.lane.b32.xlu1 %v5298_v59, %s4385_s15 }
 0x21d   : > { %v1280_v53 = vpack.c.bf16 %v1260_v62, %v1260_v62  ;;  %v1112_v41 = vadd.f32 %v5048_v20, %v950_v18  ;;  %v965_v42 = vsel %vm814_vm10, %v964_v30, %v963_v54  ;;  %v7032_v19 = vrot.slane %v4866_v31, 7  ;;  %v7042_v30 = vld [vmem:[#allocation11_spill] sm:$0xff] }
 0x21e   : > { %v1277_v21 = vpack.c.bf16 %v1257_v48, %v1257_v48  ;;  %v1113_v12 = vadd.f32 %v5048_v20, %v965_v42  ;;  %v990_v14 = vrot.slane %v4995_v40, 3  ;;  %v7033_v47 = vrot.slane %v4879_v2, 2  ;;  %1775 = vrot.lane.b32.xlu0 %v5309_v10, %s4385_s15 }
 0x21f   : > { %v984_v33 = vsel %vm796_vm5, %v7032_v19, %v4857_v27  ;;  %v1132_v56 = vmax.f32 %v1112_v41, 0.0  ;;  %v992_v32 = vrot.slane %v5015_v38, 6  ;;  %v7035_v1 = vrot.slane %v4879_v2, 3  ;;  %v7038_v27 = vld [vmem:[#allocation26_spill] sm:$0xff]  ;;  %v7044_v41 = vld [vmem:[#allocation19_spill] sm:$0xff]  ;;  %v7046_v19 = vld [vmem:[#allocation13_spill] sm:$0xff] }
 0x220   : > { %v986_v8 = vsel %vm799_vm6, %v7033_v47, %v984_v33  ;;  %v1133_v49 = vmax.f32 %v1113_v12, 0.0  ;;  %v7037_v34 = vrot.slane %v7036_v3, 5  ;;  %v994_v9 = vrot.slane %v7038_v27, 1  ;;  %1820 = vrot.lane.b32.xlu1 %v5298_v59, %s4384_s13 }
 0x221   : > { %v1000_v6 = vsel %vm799_vm6, %v7035_v1, %v7034_v60  ;;  %v7039_v62 = vrot.slane %v7036_v3, 6  ;;  %v7040_v55 = vrot.slane %v4769_v63, %v4736_v37  ;;  %v7041_v45 = vrot.slane %v4934_v5, 1 }
 0x222   : > { %v988_v22 = vsel %vm802_vm7, %v7037_v34, %v986_v8  ;;  %v1005_v23 = vrot.slane %v4995_v40, 4  ;;  %v7043_v11 = vrot.slane %v7042_v30, 4  ;;  %v1007_v16 = vrot.slane %v5015_v38, 7 }
 0x223   : > { %v1002_v28 = vsel %vm802_vm7, %v7039_v62, %v1000_v6  ;;  %v1258_v25 = vmul.f32 %v7040_v55, %v1132_v56  ;;  %v989_v35 = vsel %vm805_vm8, %v4934_v5, %v988_v22  ;;  %v1009_v36 = vrot.slane %v7038_v27, 2  ;;  %v7049_v6 = vld [vmem:[#allocation12_spill] sm:$0xff] }
 0x224   : > { %v1004_v26 = vsel %vm805_vm8, %v7041_v45, %v1002_v28  ;;  %v5360_v29 = vsel %vm1686_vm12, %v1280_v53, %v7043_v11  ;;  %v991_v52 = vsel %vm808_vm9, %v990_v14, %v989_v35  ;;  %v7045_v42 = vrot.slane %v4866_v31, 2  ;;  %v7052_v45 = vld [vmem:[#allocation18_spill] sm:$0xff] }
 0x225   : > { %v1278_v48 = vpack.c.bf16 %v1258_v25, %v1258_v25  ;;  %v993_v18 = vsel %vm811_vm11, %v992_v32, %v991_v52  ;;  %v1006_v54 = vsel %vm808_vm9, %v1005_v23, %v1004_v26  ;;  %v5373_v53 = vsel %vm1686_vm12, %v1277_v21, %v7046_v19  ;;  %1783 = vrot.lane.b32.xlu1 %v5360_v29, %s4385_s15 }
 0x226   : > { %v1029_v12 = vsel %vm796_vm5, %v7045_v42, %v7044_v41  ;;  %v995_v33 = vsel %vm814_vm10, %v994_v9, %v993_v18  ;;  %v1008_v14 = vsel %vm811_vm11, %v1007_v16, %v1006_v54  ;;  %v7047_v56 = vrot.slane %v4879_v2, 5  ;;  %1777 = vrot.lane.b32.xlu0 %v5373_v53, %s4385_s15 }
 0x227   : > { %v7048_v8 = vrot.slane %v4769_v63, %v4733_v39  ;;  %v1115_v21 = vadd.f32 %v5048_v20, %v995_v33  ;;  %v1010_v60 = vsel %vm814_vm10, %v1009_v36, %v1008_v14  ;;  %v1035_v1 = vrot.slane %v4995_v40, 6 }
 0x228   : > { %v1031_v47 = vsel %vm799_vm6, %v7047_v56, %v1029_v12  ;;  %v7050_v34 = vrot.slane %v7049_v6, 4  ;;  %v1116_v9 = vadd.f32 %v5048_v20, %v1010_v60  ;;  %v1037_v28 = vrot.slane %v5015_v38, 1  ;;  %v7059_v56 = vld [vmem:[#allocation23_spill] sm:$0xff] }
 0x229   : > { %v5387_v32 = vmul.f32 %v7048_v8, %v1133_v49  ;;  %v1032_v62 = vsel %vm802_vm7, %v7036_v3, %v1031_v47  ;;  %v1135_v49 = vmax.f32 %v1115_v21, 0.0  ;;  %v7051_v55 = vrot.slane %v4934_v5, 3  ;;  %1832 = vrot.lane.b32.xlu1 %v5360_v29, %s4384_s13 }
 0x22a   : > { %v5395_v22 = vsel %vm1686_vm12, %v1278_v48, %v7050_v34  ;;  %v1039_v35 = vrot.slane %v7038_v27, 4  ;;  %v7053_v26 = vrot.slane %v4866_v31, 1  ;;  %v1136_v30 = vmax.f32 %v1116_v9, 0.0  ;;  %1826 = vrot.lane.b32.xlu0 %v5373_v53, %s4384_s13 }
 0x22b   : > { %v1034_v25 = vsel %vm805_vm8, %v7051_v55, %v1032_v62  ;;  %v7054_v52 = vrot.slane %v4879_v2, 4  ;;  %v1021_v36 = vrot.slane %v4995_v40, 5  ;;  %v7055_v31 = vrot.slane %v4769_v63, %v4744_v50 }
 0x22c   : > { %v1014_v23 = vsel %vm796_vm5, %v7053_v26, %v7052_v45  ;;  %v1036_v11 = vsel %vm808_vm9, %v1035_v1, %v1034_v25  ;;  %v7056_v54 = vrot.slane %v7036_v3, 7  ;;  %v1024_v41 = vrot.slane %v7038_v27, 3  ;;  %v7063_v45 = vld [vmem:[#allocation24_spill] sm:$0xff] }
 0x22d   : > { %v1016_v16 = vsel %vm799_vm6, %v7054_v52, %v1014_v23  ;;  %v1261_v48 = vmul.f32 %v7055_v31, %v1135_v49  ;;  %v1038_v18 = vsel %vm811_vm11, %v1037_v28, %v1036_v11  ;;  %v7057_v42 = vrot.slane %v4769_v63, %v4747_v51  ;;  %1822 = vrot.lane.b32.xlu1 %v5302_v17, %s4384_s13  ;;  %v7062_v49 = vld [vmem:[#allocation14_spill] sm:$0xff]  ;;  %v7065_v23 = vld [vmem:[#allocation3_spill] sm:$0xff] }
 0x22e   : > { %v1018_v2 = vsel %vm802_vm7, %v7056_v54, %v1016_v16  ;;  %v1040_v19 = vsel %vm814_vm10, %v1039_v35, %v1038_v18  ;;  %v7058_v33 = vrot.slane %v4934_v5, 2  ;;  %v7060_v47 = vrot.slane %v7036_v3, 1  ;;  %1899 = vrot.lane.b32.xlu0 %v5212_v44, %s4381_s14 }
 0x22f   : > { %v1262_v12 = vmul.f32 %v7057_v42, %v1136_v30  ;;  %v1281_v21 = vpack.c.bf16 %v1261_v48, %v1261_v48  ;;  %v1118_v60 = vadd.f32 %v5048_v20, %v1040_v19  ;;  %v7061_v6 = vrot.slane %v4972_v24, 4  ;;  %v7069_v19 = vld [vmem:[#allocation22_spill] sm:$0xff] }
 0x230   : > { %v1020_v14 = vsel %vm805_vm8, %v7058_v33, %v1018_v2  ;;  %v1047_v8 = vsel %vm802_vm7, %v7060_v47, %v7059_v56  ;;  %v1050_v62 = vrot.slane %v4995_v40, 7  ;;  %v1054_v28 = vrot.slane %v7038_v27, 5 }
 0x231   : > { %v1022_v1 = vsel %vm808_vm9, %v1021_v36, %v1020_v14  ;;  %v1049_v34 = vsel %vm805_vm8, %v7061_v6, %v1047_v8  ;;  %v1282_v9 = vpack.c.bf16 %v1262_v12, %v1262_v12  ;;  %v5452_v55 = vsel %vm1686_vm12, %v1281_v21, %v7062_v49  ;;  %1824 = vrot.lane.b32.xlu1 %v5309_v10, %s4384_s13 }
 0x232   : > { %v1023_v5 = vsel %vm811_vm11, %v5015_v38, %v1022_v1  ;;  %v1138_v25 = vmax.f32 %v1118_v60, 0.0  ;;  %v7064_v38 = vrot.slane %v7036_v3, 2  ;;  %v7066_v30 = vrot.slane %v7065_v23, 4  ;;  %v7077_v23 = vld [vmem:[#allocation17_spill] sm:$0xff] }
 0x233   : > { %v1025_v35 = vsel %vm814_vm10, %v1024_v41, %v1023_v5  ;;  %v1051_v44 = vsel %vm808_vm9, %v1050_v62, %v1049_v34  ;;  %v7067_v16 = vrot.slane %v4972_v24, 5  ;;  %v7068_v31 = vrot.slane %v4769_v63, %v4764_v61  ;;  %v7072_v34 = vld [vmem:[#allocation4_spill] sm:$0xff] }
 0x234   : > { %v1063_v26 = vsel %vm802_vm7, %v7064_v38, %v7063_v45  ;;  %v5462_v11 = vsel %vm1686_vm12, %v1282_v9, %v7066_v30  ;;  %v1117_v52 = vadd.f32 %v5048_v20, %v1025_v35  ;;  %v1053_v18 = vsel %vm811_vm11, %v1052_v58, %v1051_v44 }
 0x235   : > { %v1065_v36 = vsel %vm805_vm8, %v7067_v16, %v1063_v26  ;;  %v1264_v48 = vmul.f32 %v7068_v31, %v1138_v25  ;;  %v1069_v2 = vrot.slane %v7038_v27, 6  ;;  %v1055_v42 = vsel %vm814_vm10, %v1054_v28, %v1053_v18  ;;  %v7074_v28 = vld [vmem:[#allocation25_spill] sm:$0xff]  ;;  %1779 = vrot.lane.b32.xlu1 %v5395_v22, %s4385_s15 }
 0x236   : > { %v1066_v54 = vsel %vm808_vm9, %v4995_v40, %v1065_v36  ;;  %v1137_v41 = vmax.f32 %v1117_v52, 0.0  ;;  %v7070_v33 = vrot.slane %v7036_v3, 3  ;;  %v1119_v56 = vadd.f32 %v5048_v20, %v1055_v42  ;;  %v7080_v36 = vld [vmem:[#allocation16_spill] sm:$0xff] }
 0x237   : > { %v1068_v12 = vsel %vm811_vm11, %v1067_v13, %v1066_v54  ;;  %v1284_v58 = vpack.c.bf16 %v1264_v48, %v1264_v48  ;;  %v7071_v13 = vrot.slane %v4769_v63, %v4757_v57  ;;  %v1080_v1 = vrot.slane %v4995_v40, 1 }
 0x238   : > { %v1077_v14 = vsel %vm802_vm7, %v7070_v33, %v7069_v19  ;;  %v1070_v47 = vsel %vm814_vm10, %v1069_v2, %v1068_v12  ;;  %v1084_v6 = vrot.slane %v7038_v27, 7  ;;  %v7073_v9 = vrot.slane %v7072_v34, 4  ;;  %v7087_v34 = vld [vmem:[#allocation6_spill] sm:$0xff] }
 0x239   : > { %v1079_v8 = vsel %vm805_vm8, %v1078_v15, %v1077_v14  ;;  %v1263_v21 = vmul.f32 %v7071_v13, %v1137_v41  ;;  %v1120_v60 = vadd.f32 %v5048_v20, %v1070_v47  ;;  %v1139_v62 = vmax.f32 %v1119_v56, 0.0  ;;  %1828 = vrot.lane.b32.xlu1 %v5395_v22, %s4384_s13  ;;  %v7083_v56 = vld [vmem:[#allocation10_spill] sm:$0xff]  ;;  %v7084_v47 = vld [vmem:[#allocation9_spill] sm:$0xff] }
 0x23a   : > { %v5502_v5 = vsel %vm1686_vm12, %v1284_v58, %v7073_v9  ;;  %v7075_v49 = vrot.slane %v7036_v3, 4  ;;  %v1093_v63 = vrot.slane %v4995_v40, 2  ;;  %v1081_v45 = vsel %vm808_vm9, %v1080_v1, %v1079_v8  ;;  %v7079_v3 = vld [vmem:[#allocation5_spill] sm:$0xff] }
 0x23b   : > { %v1283_v25 = vpack.c.bf16 %v1263_v21, %v1263_v21  ;;  %v1140_v35 = vmax.f32 %v1120_v60, 0.0  ;;  %v7076_v38 = vrot.slane %v4972_v24, 7  ;;  %v7078_v30 = vrot.slane %v7077_v23, %v4739_v43 }
 0x23c   : > { %v1091_v15 = vsel %vm802_vm7, %v7075_v49, %v7074_v28  ;;  %v1683_v44 = vrot.slane %v7079_v3, 4  ;;  %v1083_v40 = vsel %vm811_vm11, %v1082_v4, %v1081_v45  ;;  %v7081_v31 = vrot.slane %v7077_v23, %v4736_v37  ;;  %v7089_v49 = vld [vmem:[#allocation8_spill] sm:$0xff] }
 0x23d   : > { %v1092_v26 = vsel %vm805_vm8, %v7076_v38, %v1091_v15  ;;  %v1265_v52 = vmul.f32 %v7078_v30, %v1139_v62  ;;  %v5525_v24 = vsel %vm1686_vm12, %v1283_v25, %v7080_v36  ;;  %v1085_v18 = vsel %vm814_vm10, %v1084_v6, %v1083_v40  ;;  %v7086_v6 = vld [vmem:[#allocation7_spill] sm:$0xff] }
 0x23e   : > { %v1094_v16 = vsel %vm808_vm9, %v1093_v63, %v1092_v26  ;;  %v1266_v48 = vmul.f32 %v7081_v31, %v1140_v35  ;;  %v1121_v41 = vadd.f32 %v5048_v20, %v1085_v18  ;;  %v1224_v4 = vrot.slane %v7077_v23, %v4733_v39 }
 0x23f   : > { %v1095_v54 = vsel %vm811_vm11, %v813_v46, %v1094_v16  ;;  %v1285_v2 = vpack.c.bf16 %v1265_v52, %v1265_v52  ;;  %v1279_v12 = vpack.c.bf16 %v5387_v32, %v5387_v32  ;;  %v1228_v0 = vrot.slane %v7077_v23, %v4706_v7  ;;  %v7082_v46 = vld [vmem:[#allocation15_spill] sm:$0xff] }
 0x240   : > { %v1096_v42 = vsel %vm814_vm10, %v7038_v27, %v1095_v54  ;;  %v1286_v19 = vpack.c.bf16 %v1266_v48, %v1266_v48  ;;  %v1141_v58 = vmax.f32 %v1121_v41, 0.0  ;;  %v7085_v27 = vpack.i.b16 %v7083_v56, %v7084_v47 }
 0x241   : > { %v1122_v33 = vadd.f32 %v5048_v20, %v1096_v42  ;;  %v5548_v14 = vsel %vm1686_vm12, %v1285_v2, %v7082_v46  ;;  %v7088_v9 = vpack.i.b16 %v7086_v6, %v7087_v34  ;;  %v1685_v15 = vrot.slane %v7089_v49, 4  ;;  %v5632_v34 = vld [vmem:[%s6925_s7] sm:$0xff] }
 0x242   : > { %v1676_v8 = vrot.slane %v7085_v27, 4  ;;  %v5554_v32 = vsel %vm1686_vm12, %v1286_v19, %v1683_v44  ;;  %v1267_v20 = vmul.f32 %v1224_v4, %v1141_v58 }
 0x243   : > { %v1142_v13 = vmax.f32 %v1122_v33, 0.0  ;;  %v1684_v62 = vrot.slane %v7088_v9, 4  ;;  %v5636_v9 = vcombine.high %v5632_v34, %v5632_v34 }
 0x244   : > { %v5557_v21 = vsel %vm1686_vm12, %v1279_v12, %v1676_v8  ;;  %v1287_v1 = vpack.c.bf16 %v1267_v20, %v1267_v20 }
 0x245   : > { %v1268_v60 = vmul.f32 %v1228_v0, %v1142_v13  ;;  %1781 = vrot.lane.b32.xlu1 %v5557_v21, %s4385_s15  ;;  %4092 = vmatprep.mubr.msk.bf16.mxu0 %vm2138_vm15, %v5636_v9 }
 0x246   : > { %v5566_v63 = vsel %vm1686_vm12, %v1287_v1, %v1684_v62  ;;  %4093 = vmatprep.mubr.msk.bf16.mxu1 %vm2138_vm15, %v5636_v9 }
 0x247   : > { %v1288_v28 = vpack.c.bf16 %v1268_v60, %v1268_v60 }
 0x249   : > { %v5569_v25 = vsel %vm1686_vm12, %v1288_v28, %v1685_v15  ;;  %1830 = vrot.lane.b32.xlu1 %v5557_v21, %s4384_s13 }
 0x24d   : > { %1901 = vrot.lane.b32.xlu1 %v5298_v59, %s4381_s14 }
 0x270   : > { %v1817_v35 = vpop.permute.xlu1 %1816  ;;  %v1768_v45 = vpop.permute.xlu0 %1767 }
 0x274   : > { %v1898_v38 = vpop.permute.xlu1 %1897  ;;  %v1815_v26 = vpop.permute.xlu0 %1814 }
 0x275   : > { %v1848_v58 = vsel %vm1846_vm14, %v1815_v26, %v1817_v35 }
 0x278   : > { %v1894_v23 = vpop.permute.xlu0 %1893  ;;  %v1764_v30 = vpop.permute.xlu1 %1763 }
 0x279   : > { %1925 = vrot.lane.b32.xlu0 %v1764_v30, %s4381_s14 }
 0x27c   : > { %v1766_v52 = vpop.permute.xlu1 %1765 }
 0x27d   : > { %v1892_v3 = vpop.permute.xlu0 %1891  ;;  %v1796_v44 = vsel %vm1795_vm13, %v1764_v30, %v1766_v52  ;;  %v1797_v12 = vsel %vm1795_vm13, %v1766_v52, %v1768_v45 }
 0x27e   : > { %1927 = vrot.lane.b32.xlu1 %v1796_v44, %s4381_s14  ;;  %v2018_v18 = vsel %vm1337_vm2, %v1892_v3, %v1894_v23 }
 0x280   : > { %v1813_v40 = vpop.permute.xlu1 %1812 }
 0x281   : > { %v1770_v16 = vpop.permute.xlu0 %1769  ;;  %1959 = vrot.lane.b32.xlu0 %v1813_v40, %s4381_s14  ;;  %v1847_v59 = vsel %vm1846_vm14, %v1813_v40, %v1815_v26 }
 0x282   : > { %1961 = vrot.lane.b32.xlu1 %v1847_v59, %s4381_s14  ;;  %v1798_v41 = vsel %vm1795_vm13, %v1768_v45, %v1770_v16 }
 0x284   : > { %v1896_v36 = vpop.permute.xlu1 %1895 }
 0x285   : > { %v1819_v31 = vpop.permute.xlu0 %1818  ;;  %1995 = vrot.lane.b32.xlu0 %v1766_v52, %s4381_s14  ;;  %v5583_v48 = vsel %vm1337_vm2, %v1894_v23, %v1896_v36  ;;  %v5618_v13 = vsel %vm1337_vm2, %v1896_v36, %v1898_v38 }
 0x286   : > { %1785 = vrot.lane.b32.xlu1 %v5452_v55, %s4385_s15  ;;  %2142 = vmatprep.subr.bf16.mxu0 %v5583_v48  ;;  %v1849_v19 = vsel %vm1846_vm14, %v1817_v35, %v1819_v31 }
 0x287   : > { %2143 = vmatpush1.bf16.msra.mxu0 %v2018_v18 }
 0x289   : > { %2001 = vrot.lane.b32.xlu0 %v1815_v26, %s4381_s14 }
 0x28a   : > { %1931 = vrot.lane.b32.xlu1 %v1798_v41, %s4381_s14 }
 0x28c   : > { %v1774_v2 = vpop.permute.xlu0 %1773 }
 0x28d   : > { %1929 = vrot.lane.b32.xlu0 %v1797_v12, %s4381_s14 }
 0x28e   : > { %v1772_v54 = vpop.permute.xlu1 %1771  ;;  %1965 = vrot.lane.b32.xlu1 %v1849_v19, %s4381_s14 }
 0x28f   : > { %v1799_v27 = vsel %vm1795_vm13, %v1770_v16, %v1772_v54  ;;  %v1800_v28 = vsel %vm1795_vm13, %v1772_v54, %v1774_v2 }
 0x290   : > { %v1776_v42 = vpop.permute.xlu0 %1775 }
 0x291   : > { %1787 = vrot.lane.b32.xlu0 %v5462_v11, %s4385_s15  ;;  %v1801_v1 = vsel %vm1795_vm13, %v1774_v2, %v1776_v42 }
 0x292   : > { %v1821_v4 = vpop.permute.xlu1 %1820  ;;  %2007 = vrot.lane.b32.xlu1 %v1768_v45, %s4381_s14 }
 0x293   : > { %v1850_v60 = vsel %vm1846_vm14, %v1819_v31, %v1821_v4 }
 0x295   : > { %1963 = vrot.lane.b32.xlu0 %v1848_v58, %s4381_s14 }
 0x296   : > { %1834 = vrot.lane.b32.xlu1 %v5452_v55, %s4384_s13 }
 0x297   : > { %v5596_v33 = vpop.permute.xlu1 %1783 }
 0x298   : > { %v1778_v0 = vpop.permute.xlu0 %1777 }
 0x299   : > { %1933 = vrot.lane.b32.xlu0 %v1799_v27, %s4381_s14  ;;  %v1802_v49 = vsel %vm1795_vm13, %v1776_v42, %v1778_v0 }
 0x29a   : > { %2013 = vrot.lane.b32.xlu1 %v1817_v35, %s4381_s14 }
 0x29b   : > { %v5603_v56 = vpop.permute.xlu1 %1832 }
 0x29c   : > { %v1827_v46 = vpop.permute.xlu0 %1826 }
 0x29d   : > { %1836 = vrot.lane.b32.xlu0 %v5462_v11, %s4384_s13 }
 0x29e   : > { %1905 = vrot.lane.b32.xlu1 %v5309_v10, %s4381_s14 }
 0x29f   : > { %v1823_v20 = vpop.permute.xlu1 %1822 }
 0x2a0   : > { %v5607_v47 = vpop.permute.xlu0 %1899 }
 0x2a1   : > { %v5613_v8 = vsel %vm1337_vm2, %v1898_v38, %v5607_v47  ;;  %1967 = vrot.lane.b32.xlu0 %v1850_v60, %s4381_s14 }
 0x2a2   : > { %2183 = vmatprep.subr.bf16.mxu1 %v5613_v8  ;;  %1937 = vrot.lane.b32.xlu1 %v1801_v1, %s4381_s14 }
 0x2a3   : > { %2184 = vmatpush1.bf16.msra.mxu1 %v5618_v13  ;;  %v1825_v6 = vpop.permute.xlu1 %1824 }
 0x2a4   : > { %v1852_v10 = vsel %vm1846_vm14, %v1823_v20, %v1825_v6 }
 0x2a5   : > { %1903 = vrot.lane.b32.xlu0 %v5302_v17, %s4381_s14  ;;  %v1851_v17 = vsel %vm1846_vm14, %v1821_v4, %v1823_v20 }
 0x2a6   : > { %1971 = vrot.lane.b32.xlu1 %v1852_v10, %s4381_s14 }
 0x2a7   : > { %v1780_v62 = vpop.permute.xlu1 %1779 }
 0x2a8   : > { %v1803_v45 = vsel %vm1795_vm13, %v1778_v0, %v1780_v62 }
 0x2a9   : > { %1935 = vrot.lane.b32.xlu0 %v1800_v28, %s4381_s14 }
 0x2aa   : > { %1791 = vrot.lane.b32.xlu1 %v5502_v5, %s4385_s15 }
 0x2ab   : > { %v1829_v15 = vpop.permute.xlu1 %1828 }
 0x2ac   : > { %v1854_v35 = vsel %vm1846_vm14, %v1827_v46, %v1829_v15 }
 0x2ad   : > { %1969 = vrot.lane.b32.xlu0 %v1851_v17, %s4381_s14 }
 0x2ae   : > { %1939 = vrot.lane.b32.xlu1 %v1802_v49, %s4381_s14 }
 0x2b1   : > { %1789 = vrot.lane.b32.xlu0 %v5525_v24, %s4385_s15 }
 0x2b2   : > { %1975 = vrot.lane.b32.xlu1 %v1854_v35, %s4381_s14 }
 0x2b5   : > { %1838 = vrot.lane.b32.xlu0 %v5525_v24, %s4384_s13 }
 0x2b6   : > { %1909 = vrot.lane.b32.xlu1 %v5395_v22, %s4381_s14  ;;  %v1853_v22 = vsel %vm1846_vm14, %v1825_v6, %v1827_v46 }
 0x2b9   : > { %1907 = vrot.lane.b32.xlu0 %v5373_v53, %s4381_s14  ;;  %v1782_v53 = vpop.permute.xlu1 %1781 }
 0x2ba   : > { %1793 = vrot.lane.b32.xlu1 %v5548_v14, %s4385_s15  ;;  %v1804_v38 = vsel %vm1795_vm13, %v1780_v62, %v1782_v53  ;;  %v1805_v23 = vsel %vm1795_vm13, %v1782_v53, %v5596_v33 }
 0x2bd   : > { %1840 = vrot.lane.b32.xlu0 %v5502_v5, %s4384_s13  ;;  %v1831_v26 = vpop.permute.xlu1 %1830 }
 0x2be   : > { %1842 = vrot.lane.b32.xlu1 %v5548_v14, %s4384_s13  ;;  %v1856_v30 = vsel %vm1846_vm14, %v1831_v26, %v5603_v56 }
 0x2c1   : > { %1941 = vrot.lane.b32.xlu0 %v1803_v45, %s4381_s14  ;;  %v5696_v52 = vpop.permute.xlu1 %1901 }
 0x2c2   : > { %1911 = vrot.lane.b32.xlu1 %v5557_v21, %s4381_s14  ;;  %v1855_v21 = vsel %vm1846_vm14, %v1829_v15, %v1831_v26  ;;  %v2022_v15 = vsel %vm1337_vm2, %v5607_v47, %v5696_v52 }
 0x2c5   : > { %1973 = vrot.lane.b32.xlu0 %v1853_v22, %s4381_s14 }
 0x2c6   : > { %1863 = vrot.lane.b32.xlu1 %v5554_v32, %s4385_s15 }
 0x2c9   : > { %1844 = vrot.lane.b32.xlu0 %v5554_v32, %s4384_s13 }
 0x2ca   : > { %1867 = vrot.lane.b32.xlu1 %v5566_v63, %s4384_s13 }
 0x2cd   : > { %1943 = vrot.lane.b32.xlu0 %v1804_v38, %s4381_s14 }
 0x2ce   : > { %1915 = vrot.lane.b32.xlu1 %v5452_v55, %s4381_s14 }
 0x2d1   : > { %1977 = vrot.lane.b32.xlu0 %v1855_v21, %s4381_s14 }
 0x2d5   : > { %1913 = vrot.lane.b32.xlu0 %v5360_v29, %s4381_s14 }
 0x2d9   : > { %1945 = vrot.lane.b32.xlu0 %v1805_v23, %s4381_s14 }
 0x2dd   : > { %1979 = vrot.lane.b32.xlu0 %v1856_v30, %s4381_s14 }
 0x2eb   : > { %v1926_v55 = vpop.permute.xlu0 %1925 }
 0x2f0   : > { %v1928_v3 = vpop.permute.xlu1 %1927 }
 0x2f1   : > { %v2034_v41 = vsel %vm1337_vm2, %v1926_v55, %v1928_v3 }
 0x2f3   : > { %v1960_v44 = vpop.permute.xlu0 %1959 }
 0x2f4   : > { %v1962_v40 = vpop.permute.xlu1 %1961 }
 0x2f5   : > { %v2050_v58 = vsel %vm1337_vm2, %v1960_v44, %v1962_v40 }
 0x2f7   : > { %v1996_v16 = vpop.permute.xlu0 %1995 }
 0x2f8   : > { %v1786_v59 = vpop.permute.xlu1 %1785 }
 0x2f9   : > { %v1806_v29 = vsel %vm1795_vm13, %v5596_v33, %v1786_v59 }
 0x2fa   : > { %1947 = vrot.lane.b32.xlu0 %v1806_v29, %s4381_s14 }
 0x2fb   : > { %v2002_v36 = vpop.permute.xlu0 %2001 }
 0x2fc   : > { %v1932_v31 = vpop.permute.xlu1 %1931 }
 0x2fe   : > { %1870 = vrot.lane.b32.xlu0 %v5566_v63, %s4385_s15 }
 0x2ff   : > { %v1930_v18 = vpop.permute.xlu0 %1929 }
 0x300   : > { %v5703_v54 = vpop.permute.xlu1 %1965  ;;  %v2035_v2 = vsel %vm1337_vm2, %v1928_v3, %v1930_v18  ;;  %v2036_v1 = vsel %vm1337_vm2, %v1930_v18, %v1932_v31  ;;  %v2067_v62 = vsel %vm1337_vm2, %v1996_v16, %v1930_v18 }
 0x301   : > { %2144 = vmatprep.subr.bf16.mxu0 %v2035_v2 }
 0x302   : > { %2145 = vmatpush1.bf16.msra.mxu0 %v2034_v41 }
 0x303   : > { %v5707_v4 = vpop.permute.xlu0 %1787 }
 0x304   : > { %v2008_v42 = vpop.permute.xlu1 %2007  ;;  %v1807_v12 = vsel %vm1795_vm13, %v1786_v59, %v5707_v4 }
 0x305   : > { %1949 = vrot.lane.b32.xlu1 %v1807_v12, %s4381_s14  ;;  %v2073_v38 = vsel %vm1337_vm2, %v2008_v42, %v1932_v31 }
 0x307   : > { %v1964_v19 = vpop.permute.xlu0 %1963 }
 0x308   : > { %v1835_v33 = vpop.permute.xlu1 %1834  ;;  %v2051_v0 = vsel %vm1337_vm2, %v1962_v40, %v1964_v19  ;;  %v2052_v28 = vsel %vm1337_vm2, %v1964_v19, %v5703_v54  ;;  %v2070_v49 = vsel %vm1337_vm2, %v2002_v36, %v1964_v19 }
 0x309   : > { %2146 = vmatprep.subr.bf16.mxu0 %v2051_v0  ;;  %v1857_v46 = vsel %vm1846_vm14, %v5603_v56, %v1835_v33 }
 0x30a   : > { %1981 = vrot.lane.b32.xlu1 %v1857_v46, %s4381_s14  ;;  %2147 = vmatpush1.bf16.msra.mxu0 %v2050_v58 }
 0x30b   : > { %2148 = vmatprep.subr.bf16.mxu0 %v5618_v13  ;;  %v1934_v27 = vpop.permute.xlu0 %1933 }
 0x30c   : > { %v2014_v20 = vpop.permute.xlu1 %2013  ;;  %v2037_v60 = vsel %vm1337_vm2, %v1932_v31, %v1934_v27 }
 0x30d   : > { %2185 = vmatprep.subr.bf16.mxu1 %v2037_v60 }
 0x30e   : > { %1874 = vrot.lane.b32.xlu1 %v5569_v25, %s4384_s13  ;;  %2149 = vmatpush1.bf16.msra.mxu0 %v5583_v48 }
 0x30f   : > { %2186 = vmatpush1.bf16.msra.mxu1 %v2036_v1  ;;  %2150 = vmatprep.subr.bf16.mxu0 %v2036_v1  ;;  %v1837_v56 = vpop.permute.xlu0 %1836 }
 0x310   : > { %v5723_v6 = vpop.permute.xlu1 %1905  ;;  %v1858_v10 = vsel %vm1846_vm14, %v1835_v33, %v1837_v56 }
 0x311   : > { %1983 = vrot.lane.b32.xlu0 %v1858_v10, %s4381_s14 }
 0x312   : > { %2151 = vmatpush1.bf16.msra.mxu0 %v2067_v62 }
 0x313   : > { %2152 = vmatprep.subr.bf16.mxu0 %v2052_v28  ;;  %v1968_v25 = vpop.permute.xlu0 %1967 }
 0x314   : > { %v5730_v48 = vpop.permute.xlu1 %1937  ;;  %v2053_v17 = vsel %vm1337_vm2, %v5703_v54, %v1968_v25 }
 0x315   : > { %1917 = vrot.lane.b32.xlu0 %v5462_v11, %s4381_s14  ;;  %2187 = vmatprep.subr.bf16.mxu1 %v2053_v17 }
 0x316   : > { %2153 = vmatpush1.bf16.msra.mxu0 %v2070_v49  ;;  %2188 = vmatpush1.bf16.msra.mxu1 %v2052_v28 }
 0x317   : > { %2154 = vmatprep.subr.bf16.mxu0 %v5613_v8  ;;  %2189 = vmatprep.subr.bf16.mxu1 %v2022_v15  ;;  %v1904_v35 = vpop.permute.xlu0 %1903 }
 0x318   : > { %v5741_v45 = vpop.permute.xlu1 %1971  ;;  %v2023_v23 = vsel %vm1337_vm2, %v5696_v52, %v1904_v35 }
 0x31a   : > { %2155 = vmatpush1.bf16.msra.mxu0 %v5618_v13  ;;  %2190 = vmatpush1.bf16.msra.mxu1 %v5613_v8  ;;  %v2076_v13 = vsel %vm1337_vm2, %v2014_v20, %v5703_v54  ;;  %v5752_v8 = vcombine.low %v5632_v34, %v5632_v34 }
 0x31b   : > { %2156 = vmatprep.subr.bf16.mxu0 %v2037_v60  ;;  %v1936_v11 = vpop.permute.xlu0 %1935 }
 0x31c   : > { %v1792_v22 = vpop.permute.xlu1 %1791  ;;  %v2038_v53 = vsel %vm1337_vm2, %v1934_v27, %v1936_v11  ;;  %v2039_v34 = vsel %vm1337_vm2, %v1936_v11, %v5730_v48 }
 0x31d   : > { %2191 = vmatprep.subr.bf16.mxu1 %v2038_v53 }
 0x31e   : > { %2157 = vmatpush1.bf16.msra.mxu0 %v2073_v38  ;;  %2192 = vmatpush1.bf16.msra.mxu1 %v2037_v60 }
 0x31f   : > { %2158 = vmatprep.subr.bf16.mxu0 %v2053_v17  ;;  %v1970_v47 = vpop.permute.xlu0 %1969 }
 0x320   : > { %v1940_v26 = vpop.permute.xlu1 %1939  ;;  %v2054_v21 = vsel %vm1337_vm2, %v1968_v25, %v1970_v47  ;;  %v2055_v16 = vsel %vm1337_vm2, %v1970_v47, %v5741_v45  ;;  %v1878_v47 = vld [vmem:[%s6926_s8] sm:$0xff] }
 0x321   : > { %2193 = vmatprep.subr.bf16.mxu1 %v2054_v21  ;;  %v2040_v41 = vsel %vm1337_vm2, %v5730_v48, %v1940_v26 }
 0x322   : > { %2159 = vmatpush1.bf16.msra.mxu0 %v2076_v13  ;;  %2194 = vmatpush1.bf16.msra.mxu1 %v2053_v17 }
 0x323   : > { %2195 = vmatprep.subr.bf16.mxu1 %v2023_v23  ;;  %2224 = vmatprep.subr.bf16.mxu0 %v2023_v23  ;;  %v1790_v30 = vpop.permute.xlu0 %1789 }
 0x324   : > { %v5756_v55 = vpop.permute.xlu1 %1975  ;;  %v1808_v3 = vsel %vm1795_vm13, %v5707_v4, %v1790_v30  ;;  %v1809_v36 = vsel %vm1795_vm13, %v1790_v30, %v1792_v22 }
 0x325   : > { %2175 = vmatmul.mubr.bf16.vlgmr.msra.gmra.mrb[12].mxu0 %v5752_v8  ;;  %1951 = vrot.lane.b32.xlu1 %v1808_v3, %s4381_s14 }
 0x326   : > { %2196 = vmatpush1.bf16.msra.mxu1 %v2022_v15  ;;  %2225 = vmatpush1.bf16.msra.mxu0 %v2022_v15 }
 0x327   : > { %2197 = vmatprep.subr.bf16.mxu1 %v2039_v34  ;;  %2226 = vmatprep.subr.bf16.mxu0 %v2039_v34  ;;  %v1839_v52 = vpop.permute.xlu0 %1838 }
 0x328   : > { %v5764_v44 = vpop.permute.xlu1 %1909  ;;  %v1859_v40 = vsel %vm1846_vm14, %v1837_v56, %v1839_v52  ;;  %4094 = vmatprep.mubr.msk.bf16.mxu0 %vm2138_vm15, %v5636_v9 }
 0x329   : > { %1919 = vrot.lane.b32.xlu1 %v5525_v24, %s4381_s14  ;;  %1985 = vrot.lane.b32.xlu0 %v1859_v40, %s4381_s14  ;;  %v2024_v24 = vsel %vm1337_vm2, %v1904_v35, %v5723_v6  ;;  %v4331_v40 = vld [vmem:[#allocation2 + $0x48] ss:$0 sps:$4 sm:$0xff]  }
 0x32a   : > { %2198 = vmatpush1.bf16.msra.mxu1 %v2038_v53  ;;  %2227 = vmatpush1.bf16.msra.mxu0 %v2038_v53 }
 0x32b   : > { %2199 = vmatprep.subr.bf16.mxu1 %v2055_v16  ;;  %2228 = vmatprep.subr.bf16.mxu0 %v2055_v16  ;;  %v1908_v59 = vpop.permute.xlu0 %1907 }
 0x32c   : > { %v1794_v29 = vpop.permute.xlu1 %1793  ;;  %v2025_v31 = vsel %vm1337_vm2, %v5723_v6, %v1908_v59 }
 0x32d   : > { %1953 = vrot.lane.b32.xlu0 %v1809_v36, %s4381_s14  ;;  %v1810_v42 = vsel %vm1795_vm13, %v1792_v22, %v1794_v29 }
 0x32e   : > { %2200 = vmatpush1.bf16.msra.mxu1 %v2054_v21  ;;  %2229 = vmatpush1.bf16.msra.mxu0 %v2054_v21 }
 0x32f   : > { %2230 = vmatprep.subr.bf16.mxu0 %v2024_v24  ;;  %2265 = vmatprep.subr.bf16.mxu1 %v2025_v31  ;;  %v1841_v18 = vpop.permute.xlu0 %1840 }
 0x330   : > { %v1843_v54 = vpop.permute.xlu1 %1842  ;;  %v1860_v2 = vsel %vm1846_vm14, %v1839_v52, %v1841_v18 }
 0x331   : > { %2216 = vmatmul.mubr.bf16.vlgmr.msra.gmra.mrb[20].mxu1 %v5752_v8  ;;  %1921 = vrot.lane.b32.xlu0 %v5502_v5, %s4381_s14  ;;  %v1861_v33 = vsel %vm1846_vm14, %v1841_v18, %v1843_v54 }
 0x332   : > { %1987 = vrot.lane.b32.xlu1 %v1860_v2, %s4381_s14  ;;  %2231 = vmatpush1.bf16.msra.mxu0 %v2023_v23 }
 0x333   : > { %2266 = vmatpush1.bf16.msra.mxu1 %v2024_v24  ;;  %2232 = vmatprep.subr.bf16.mxu0 %v2040_v41  ;;  %v1942_v4 = vpop.permute.xlu0 %1941 }
 0x334   : > { %v2041_v12 = vsel %vm1337_vm2, %v1940_v26, %v1942_v4  ;;  %4095 = vmatprep.mubr.msk.bf16.mxu1 %vm2138_vm15, %v5636_v9  ;;  %v5792_v5 = vpop.permute.xlu1 %1911 }
 0x335   : > { %1955 = vrot.lane.b32.xlu0 %v1810_v42, %s4381_s14  ;;  %2267 = vmatprep.subr.bf16.mxu1 %v2041_v12  ;;  %v2027_v28 = vsel %vm1337_vm2, %v5764_v44, %v5792_v5 }
 0x336   : > { %1923 = vrot.lane.b32.xlu1 %v5548_v14, %s4381_s14  ;;  %2233 = vmatpush1.bf16.msra.mxu0 %v2039_v34  ;;  %v2026_v14 = vsel %vm1337_vm2, %v1908_v59, %v5764_v44 }
 0x337   : > { %2268 = vmatpush1.bf16.msra.mxu1 %v2040_v41  ;;  %v1974_v19 = vpop.permute.xlu0 %1973 }
 0x338   : > { %v2056_v0 = vsel %vm1337_vm2, %v5741_v45, %v1974_v19  ;;  %v2057_v46 = vsel %vm1337_vm2, %v1974_v19, %v5756_v55  ;;  %v5805_v27 = vpop.permute.xlu1 %1863 }
 0x339   : > { %1989 = vrot.lane.b32.xlu0 %v1861_v33, %s4381_s14  ;;  %2234 = vmatprep.subr.bf16.mxu0 %v2056_v0  ;;  %v1865_v56 = vsel %vm1795_vm13, %v1794_v29, %v5805_v27 }
 0x33a   : > { %1957 = vrot.lane.b32.xlu1 %v1794_v29, %s4381_s14  ;;  %2269 = vmatprep.subr.bf16.mxu1 %v2057_v46 }
 0x33b   : > { %2235 = vmatpush1.bf16.msra.mxu0 %v2055_v16  ;;  %2270 = vmatpush1.bf16.msra.mxu1 %v2056_v0  ;;  %v1845_v58 = vpop.permute.xlu0 %1844  ;;  %v4332_v16 = vld [vmem:[#allocation2 + $0x4c] ss:$0 sps:$4 sm:$0xff]  }
 0x33c   : > { %2236 = vmatprep.subr.bf16.mxu0 %v2025_v31  ;;  %2271 = vmatprep.subr.bf16.mxu1 %v2026_v14  ;;  %v1862_v20 = vsel %vm1846_vm14, %v1843_v54, %v1845_v58  ;;  %v5816_v6 = vpop.permute.xlu1 %1867 }
 0x33d   : > { %1993 = vrot.lane.b32.xlu0 %v5554_v32, %s4381_s14  ;;  %v1869_v62 = vsel %vm1846_vm14, %v1845_v58, %v5816_v6 }
 0x33e   : > { %1991 = vrot.lane.b32.xlu1 %v1862_v20, %s4381_s14 }
 0x33f   : > { %2237 = vmatpush1.bf16.msra.mxu0 %v2024_v24  ;;  %2272 = vmatpush1.bf16.msra.mxu1 %v2025_v31  ;;  %v1944_v60 = vpop.permute.xlu0 %1943 }
 0x340   : > { %2238 = vmatprep.subr.bf16.mxu0 %v2041_v12  ;;  %v2042_v1 = vsel %vm1337_vm2, %v1942_v4, %v1944_v60  ;;  %v1916_v15 = vpop.permute.xlu1 %1915 }
 0x341   : > { %1999 = vrot.lane.b32.xlu0 %v5805_v27, %s4381_s14  ;;  %2273 = vmatprep.subr.bf16.mxu1 %v2042_v1 }
 0x342   : > { %1997 = vrot.lane.b32.xlu1 %v1865_v56, %s4381_s14 }
 0x343   : > { %2239 = vmatpush1.bf16.msra.mxu0 %v2040_v41  ;;  %2274 = vmatpush1.bf16.msra.mxu1 %v2041_v12  ;;  %v1978_v32 = vpop.permute.xlu0 %1977 }
 0x344   : > { %2240 = vmatprep.subr.bf16.mxu0 %v2057_v46  ;;  %v2058_v10 = vsel %vm1337_vm2, %v5756_v55, %v1978_v32 }
 0x345   : > { %2005 = vrot.lane.b32.xlu0 %v5566_v63, %s4381_s14  ;;  %2275 = vmatprep.subr.bf16.mxu1 %v2058_v10 }
 0x346   : > { %2003 = vrot.lane.b32.xlu1 %v1869_v62, %s4381_s14 }
 0x347   : > { %2241 = vmatpush1.bf16.msra.mxu0 %v2056_v0  ;;  %2276 = vmatpush1.bf16.msra.mxu1 %v2057_v46  ;;  %v1914_v25 = vpop.permute.xlu0 %1913 }
 0x348   : > { %2277 = vmatprep.subr.bf16.mxu1 %v2027_v28  ;;  %2306 = vmatprep.subr.bf16.mxu0 %v2027_v28  ;;  %v2028_v35 = vsel %vm1337_vm2, %v5792_v5, %v1914_v25  ;;  %v2029_v45 = vsel %vm1337_vm2, %v1914_v25, %v1916_v15 }
 0x34a   : > { %2257 = vmatmul.mubr.bf16.vlgmr.msra.gmra.mrb[16].mxu0 %v5752_v8 }
 0x34b   : > { %2278 = vmatpush1.bf16.msra.mxu1 %v2026_v14  ;;  %2307 = vmatpush1.bf16.msra.mxu0 %v2026_v14  ;;  %v1946_v63 = vpop.permute.xlu0 %1945 }
 0x34c   : > { %v2043_v48 = vsel %vm1337_vm2, %v1944_v60, %v1946_v63  ;;  %4096 = vmatprep.mubr.msk.bf16.mxu0 %vm2138_vm15, %v5636_v9 }
 0x34d   : > { %2279 = vmatprep.subr.bf16.mxu1 %v2043_v48  ;;  %2308 = vmatprep.subr.bf16.mxu0 %v2043_v48 }
 0x34f   : > { %2280 = vmatpush1.bf16.msra.mxu1 %v2042_v1  ;;  %2309 = vmatpush1.bf16.msra.mxu0 %v2042_v1  ;;  %v1980_v17 = vpop.permute.xlu0 %1979 }
 0x350   : > { %v2059_v49 = vsel %vm1337_vm2, %v1978_v32, %v1980_v17 }
 0x351   : > { %2281 = vmatprep.subr.bf16.mxu1 %v2059_v49  ;;  %2310 = vmatprep.subr.bf16.mxu0 %v2059_v49 }
 0x353   : > { %2282 = vmatpush1.bf16.msra.mxu1 %v2058_v10  ;;  %2311 = vmatpush1.bf16.msra.mxu0 %v2058_v10 }
 0x354   : > { %2312 = vmatprep.subr.bf16.mxu0 %v2028_v35  ;;  %2347 = vmatprep.subr.bf16.mxu1 %v2029_v45 }
 0x356   : > { %2298 = vmatmul.mubr.bf16.vlgmr.msra.gmra.mrb[24].mxu1 %v5752_v8 }
 0x357   : > { %2313 = vmatpush1.bf16.msra.mxu0 %v2027_v28  ;;  %2348 = vmatpush1.bf16.msra.mxu1 %v2028_v35 }
 0x358   : > { %4097 = vmatprep.mubr.msk.bf16.mxu1 %vm2138_vm15, %v5636_v9 }
 0x36c   : > { %v1948_v11 = vpop.permute.xlu0 %1947 }
 0x36d   : > { %v2044_v22 = vsel %vm1337_vm2, %v1946_v63, %v1948_v11 }
 0x36e   : > { %2314 = vmatprep.subr.bf16.mxu0 %v2044_v22 }
 0x36f   : > { %2315 = vmatpush1.bf16.msra.mxu0 %v2043_v48  ;;  %v5880_v48 = vld [vmem:[#allocation2] sm:$0xff] }
 0x370   : > { %v1871_v53 = vpop.permute.xlu0 %1870 }
 0x371   : > { %2011 = vrot.lane.b32.xlu0 %v1871_v53, %s4381_s14  ;;  %v1872_v38 = vsel %vm1795_vm13, %v5805_v27, %v1871_v53 }
 0x372   : > { %2009 = vrot.lane.b32.xlu1 %v1872_v38, %s4381_s14 }
 0x375   : > { %1881 = vperm.xlu0 %4328, %v1878_v47  }
 0x377   : > { %v1950_v26 = vpop.permute.xlu1 %1949 }
 0x378   : > { %v2045_v21 = vsel %vm1337_vm2, %v1948_v11, %v1950_v26 }
 0x379   : > { %2349 = vmatprep.subr.bf16.mxu1 %v2045_v21  ;;  %3064 = vrot.lane.b32.xlu0 %v4332_v16, %s4384_s13 }
 0x37a   : > { %2350 = vmatpush1.bf16.msra.mxu1 %v2044_v22 }
 0x37c   : > { %v1982_v13 = vpop.permute.xlu1 %1981 }
 0x37d   : > { %v2060_v23 = vsel %vm1337_vm2, %v1980_v17, %v1982_v13 }
 0x37e   : > { %2316 = vmatprep.subr.bf16.mxu0 %v2060_v23 }
 0x37f   : > { %2317 = vmatpush1.bf16.msra.mxu0 %v2059_v49 }
 0x380   : > { %v1875_v30 = vpop.permute.xlu1 %1874  ;;  %2318 = vmatprep.subr.bf16.mxu0 %v2029_v45 }
 0x381   : > { %v1876_v55 = vsel %vm1846_vm14, %v5816_v6, %v1875_v30 }
 0x382   : > { %2015 = vrot.lane.b32.xlu1 %v1876_v55, %s4381_s14 }
 0x383   : > { %2319 = vmatpush1.bf16.msra.mxu0 %v2028_v35  ;;  %v1984_v3 = vpop.permute.xlu0 %1983 }
 0x384   : > { %2320 = vmatprep.subr.bf16.mxu0 %v2045_v21  ;;  %v2061_v34 = vsel %vm1337_vm2, %v1982_v13, %v1984_v3 }
 0x385   : > { %2351 = vmatprep.subr.bf16.mxu1 %v2061_v34 }
 0x386   : > { %2352 = vmatpush1.bf16.msra.mxu1 %v2060_v23  ;;  %2960 = vrot.lane.b32.xlu1 %v4331_v40, %s4384_s13 }
 0x387   : > { %2321 = vmatpush1.bf16.msra.mxu0 %v2044_v22  ;;  %v1918_v52 = vpop.permute.xlu0 %1917  ;;  %v5889_v22 = vld [vmem:[%s6921_s3] sm:$0xff] }
 0x388   : > { %2322 = vmatprep.subr.bf16.mxu0 %v2061_v34  ;;  %v2030_v44 = vsel %vm1337_vm2, %v1916_v15, %v1918_v52 }
 0x389   : > { %2353 = vmatprep.subr.bf16.mxu1 %v2030_v44 }
 0x38a   : > { %2354 = vmatpush1.bf16.msra.mxu1 %v2029_v45 }
 0x38b   : > { %2323 = vmatpush1.bf16.msra.mxu0 %v2060_v23  ;;  %v2497_v23 = vrot.slane %v5889_v22, %v4736_v37 }
 0x38e   : > { %2339 = vmatmul.mubr.bf16.vlgmr.msra.gmra.mrb[20].mxu0 %v5752_v8 }
 0x38f   : > { %4098 = vmatprep.mubr.msk.bf16.mxu0 %vm2138_vm15, %v5636_v9 }
 0x397   : > { %v1952_v59 = vpop.permute.xlu1 %1951 }
 0x398   : > { %v2046_v29 = vsel %vm1337_vm2, %v1950_v26, %v1952_v59  ;;  %v2493_v26 = vrot.slane %v5889_v22, %v4739_v43 }
 0x399   : > { %2355 = vmatprep.subr.bf16.mxu1 %v2046_v29 }
 0x39a   : > { %2356 = vmatpush1.bf16.msra.mxu1 %v2045_v21 }
 0x39b   : > { %v1920_v36 = vpop.permute.xlu1 %1919  ;;  %v1986_v24 = vpop.permute.xlu0 %1985 }
 0x39c   : > { %v2062_v31 = vsel %vm1337_vm2, %v1984_v3, %v1986_v24  ;;  %v2031_v18 = vsel %vm1337_vm2, %v1918_v52, %v1920_v36 }
 0x39d   : > { %2357 = vmatprep.subr.bf16.mxu1 %v2062_v31  ;;  %2388 = vmatprep.subr.bf16.mxu0 %v2031_v18 }
 0x39e   : > { %2358 = vmatpush1.bf16.msra.mxu1 %v2061_v34  ;;  %2389 = vmatpush1.bf16.msra.mxu0 %v2030_v44 }
 0x39f   : > { %2359 = vmatprep.subr.bf16.mxu1 %v2031_v18  ;;  %v1954_v54 = vpop.permute.xlu0 %1953 }
 0x3a0   : > { %v2047_v2 = vsel %vm1337_vm2, %v1952_v59, %v1954_v54 }
 0x3a1   : > { %2390 = vmatprep.subr.bf16.mxu0 %v2047_v2 }
 0x3a2   : > { %2360 = vmatpush1.bf16.msra.mxu1 %v2030_v44  ;;  %2391 = vmatpush1.bf16.msra.mxu0 %v2046_v29 }
 0x3a3   : > { %2361 = vmatprep.subr.bf16.mxu1 %v2047_v2  ;;  %v1922_v41 = vpop.permute.xlu0 %1921 }
 0x3a4   : > { %v1988_v4 = vpop.permute.xlu1 %1987  ;;  %v2032_v12 = vsel %vm1337_vm2, %v1920_v36, %v1922_v41 }
 0x3a5   : > { %v2063_v42 = vsel %vm1337_vm2, %v1986_v24, %v1988_v4 }
 0x3a6   : > { %2392 = vmatprep.subr.bf16.mxu0 %v2063_v42  ;;  %2362 = vmatpush1.bf16.msra.mxu1 %v2046_v29  ;;  %v2501_v29 = vrot.slane %v5889_v22, %v4733_v39 }
 0x3a7   : > { %2393 = vmatpush1.bf16.msra.mxu0 %v2062_v31  ;;  %2363 = vmatprep.subr.bf16.mxu1 %v2063_v42  ;;  %v1956_v5 = vpop.permute.xlu0 %1955 }
 0x3a8   : > { %v1924_v19 = vpop.permute.xlu1 %1923  ;;  %2394 = vmatprep.subr.bf16.mxu0 %v2032_v12  ;;  %v2048_v0 = vsel %vm1337_vm2, %v1954_v54, %v1956_v5 }
 0x3a9   : > { %v2033_v33 = vsel %vm1337_vm2, %v1922_v41, %v1924_v19 }
 0x3aa   : > { %2364 = vmatpush1.bf16.msra.mxu1 %v2062_v31 }
 0x3ab   : > { %2395 = vmatpush1.bf16.msra.mxu0 %v2031_v18  ;;  %2429 = vmatprep.subr.bf16.mxu1 %v2033_v33  ;;  %v1990_v46 = vpop.permute.xlu0 %1989 }
 0x3ac   : > { %v1958_v14 = vpop.permute.xlu1 %1957  ;;  %2396 = vmatprep.subr.bf16.mxu0 %v2048_v0  ;;  %v2064_v27 = vsel %vm1337_vm2, %v1988_v4, %v1990_v46 }
 0x3ad   : > { %2380 = vmatmul.mubr.bf16.vlgmr.msra.gmra.mrb[28].mxu1 %v5752_v8  ;;  %v2049_v58 = vsel %vm1337_vm2, %v1956_v5, %v1958_v14 }
 0x3ae   : > { %2430 = vmatpush1.bf16.msra.mxu1 %v2032_v12  ;;  %4099 = vmatprep.mubr.msk.bf16.mxu1 %vm2138_vm15, %v5636_v9 }
 0x3af   : > { %2397 = vmatpush1.bf16.msra.mxu0 %v2047_v2  ;;  %2431 = vmatprep.subr.bf16.mxu1 %v2049_v58  ;;  %v1994_v60 = vpop.permute.xlu0 %1993 }
 0x3b0   : > { %v1992_v20 = vpop.permute.xlu1 %1991  ;;  %2398 = vmatprep.subr.bf16.mxu0 %v2064_v27  ;;  %v2066_v6 = vsel %vm1337_vm2, %v1924_v19, %v1994_v60 }
 0x3b1   : > { %v2065_v1 = vsel %vm1337_vm2, %v1990_v46, %v1992_v20 }
 0x3b2   : > { %2432 = vmatpush1.bf16.msra.mxu1 %v2048_v0 }
 0x3b3   : > { %2399 = vmatpush1.bf16.msra.mxu0 %v2063_v42  ;;  %2433 = vmatprep.subr.bf16.mxu1 %v2065_v1  ;;  %v2000_v32 = vpop.permute.xlu0 %1999 }
 0x3b4   : > { %v1998_v56 = vpop.permute.xlu1 %1997  ;;  %2400 = vmatprep.subr.bf16.mxu0 %v2033_v33 }
 0x3b5   : > { %v2068_v9 = vsel %vm1337_vm2, %v1956_v5, %v1998_v56  ;;  %v2069_v10 = vsel %vm1337_vm2, %v1998_v56, %v2000_v32 }
 0x3b6   : > { %2434 = vmatpush1.bf16.msra.mxu1 %v2064_v27 }
 0x3b7   : > { %2401 = vmatpush1.bf16.msra.mxu0 %v2032_v12  ;;  %2435 = vmatprep.subr.bf16.mxu1 %v2066_v6  ;;  %v2006_v25 = vpop.permute.xlu0 %2005 }
 0x3b8   : > { %2402 = vmatprep.subr.bf16.mxu0 %v2068_v9  ;;  %v2004_v62 = vpop.permute.xlu1 %2003  ;;  %v2072_v63 = vsel %vm1337_vm2, %v1994_v60, %v2006_v25  ;;  %v2509_v60 = vrot.slane %v5889_v22, %v4744_v50 }
 0x3b9   : > { %v2071_v28 = vsel %vm1337_vm2, %v1992_v20, %v2004_v62 }
 0x3ba   : > { %2436 = vmatpush1.bf16.msra.mxu1 %v2033_v33 }
 0x3bb   : > { %2403 = vmatpush1.bf16.msra.mxu0 %v2048_v0  ;;  %2437 = vmatprep.subr.bf16.mxu1 %v2069_v10 }
 0x3bc   : > { %2404 = vmatprep.subr.bf16.mxu0 %v2065_v1 }
 0x3be   : > { %2438 = vmatpush1.bf16.msra.mxu1 %v2068_v9 }
 0x3bf   : > { %2405 = vmatpush1.bf16.msra.mxu0 %v2064_v27  ;;  %2439 = vmatprep.subr.bf16.mxu1 %v2071_v28 }
 0x3c2   : > { %2421 = vmatmul.mubr.bf16.vlgmr.msra.gmra.mrb[24].mxu0 %v5752_v8  ;;  %2440 = vmatpush1.bf16.msra.mxu1 %v2065_v1 }
 0x3c3   : > { %2441 = vmatprep.subr.bf16.mxu1 %v2072_v63  ;;  %3656 = vmatprep.mubr.bf16.mxu0 %v5880_v48 }
 0x3c6   : > { %2442 = vmatpush1.bf16.msra.mxu1 %v2066_v6  ;;  %v2513_v6 = vrot.slane %v5889_v22, %v4747_v51 }
 0x3e3   : > { %v2012_v17 = vpop.permute.xlu0 %2011 }
 0x3e4   : > { %v2010_v49 = vpop.permute.xlu1 %2009 }
 0x3e5   : > { %v2075_v15 = vsel %vm1337_vm2, %v2010_v49, %v2012_v17  ;;  %v2074_v35 = vsel %vm1337_vm2, %v1998_v56, %v2010_v49 }
 0x3e6   : > { %2443 = vmatprep.subr.bf16.mxu1 %v2075_v15 }
 0x3e7   : > { %2444 = vmatpush1.bf16.msra.mxu1 %v2074_v35 }
 0x3f4   : > { %v2016_v45 = vpop.permute.xlu1 %2015  ;;  %v5891_v53 = vpop.permute.xlu0 %1881 }
 0x3f5   : > { %v2077_v11 = vsel %vm1337_vm2, %v2004_v62, %v2016_v45  ;;  %v2517_v45 = vrot.slane %v5889_v22, %v4757_v57 }
 0x3f6   : > { %2445 = vmatprep.subr.bf16.mxu1 %v2077_v11 }
 0x3f7   : > { %2446 = vmatpush1.bf16.msra.mxu1 %v2071_v28 }
 0x3f8   : > { %v2176_v38 = vpop.f32.mrb[12].mxu0 }
 0x3f9   : > { %v2177_v47 = vadd.f32 %v2176_v38, %v5891_v53  ;;  %v2178_v21 = vpop.f32.mrb[13].mxu0 }
 0x3fa   : > { %v2179_v13 = vadd.f32 %v2178_v21, %v5891_v53  ;;  %2462 = vmatmul.mubr.bf16.vlgmr.msra.gmra.mrb[32].mxu1 %v5752_v8  ;;  %v2180_v30 = vpop.f32.mrb[14].mxu0  ;;  %v2505_v8 = vrot.slane %v5889_v22, %v4706_v7 }
 0x3fb   : > { %v2470_v55 = vmax.f32 %v2177_v47, 0.0  ;;  %v2181_v3 = vpop.f32.mrb[15].mxu0  ;;  %3697 = vmatprep.mubr.bf16.mxu1 %v5880_v48  ;;  %v2521_v47 = vrot.slane %v5889_v22, %v4764_v61 }
 0x3fc   : > { %v2471_v34 = vmax.f32 %v2179_v13, 0.0 }
 0x3fd   : > { %v2570_v52 = vmul.f32 %v2493_v26, %v2470_v55 }
 0x3fe   : > { %v2571_v44 = vmul.f32 %v2497_v23, %v2471_v34 }
 0x3ff   : > { %v5921_v0 = vpack.c.bf16 %v2570_v52, %v2570_v52 }
 0x400   : > { %v4185_v40 = vpack.c.bf16 %v2571_v44, %v2570_v52  ;;  %v5919_v33 = vpack.c.bf16 %v2571_v44, %v2571_v44 }
 0x402   : > { %2652 = vst [vmem:[#allocation2 + $0x8] sm:$0xff] %v4185_v40 }
 0x404   : > { %v2217_v16 = vpop.f32.mrb[20].mxu1 }
 0x405   : > { %v2218_v59 = vadd.f32 %v2217_v16, %v5891_v53  ;;  %v2219_v36 = vpop.f32.mrb[21].mxu1 }
 0x406   : > { %v2220_v24 = vadd.f32 %v2219_v36, %v5891_v53  ;;  %v2221_v31 = vpop.f32.mrb[22].mxu1 }
 0x407   : > { %v2472_v18 = vmax.f32 %v2218_v59, 0.0  ;;  %v2222_v54 = vpop.f32.mrb[23].mxu1 }
 0x408   : > { %v2473_v2 = vmax.f32 %v2220_v24, 0.0 }
 0x409   : > { %v2572_v41 = vmul.f32 %v2501_v29, %v2472_v18  ;;  %v2669_v4 = vld [vmem:[#allocation2 + $0x4] sm:$0xff] }
 0x40a   : > { %v2573_v42 = vmul.f32 %v2505_v8, %v2473_v2  ;;  %v5907_v12 = vcombine.high %v2669_v4, %v2669_v4  ;;  %v5909_v5 = vcombine.low %v2669_v4, %v2669_v4  ;;  %v6030_v8 = vld [vmem:[%s6921_s3 + $0x8] sm:$0xff] }
 0x40b   : > { %v5951_v63 = vpack.c.bf16 %v2572_v41, %v2572_v41  ;;  %v2525_v54 = vrot.slane %v6030_v8, %v4739_v43  ;;  %v2529_v4 = vrot.slane %v6030_v8, %v4736_v37 }
 0x40c   : > { %v4186_v19 = vpack.c.bf16 %v2573_v42, %v2572_v41  ;;  %2775 = vrot.lane.b32.xlu0 %v5907_v12, %s4385_s15  ;;  %2773 = vrot.lane.b32.xlu1 %v5909_v5, %s4385_s15  ;;  %v5949_v25 = vpack.c.bf16 %v2573_v42, %v2573_v42 }
 0x40e   : > { %2653 = vst [vmem:[#allocation2 + $0x10] sm:$0xff] %v4186_v19 }
 0x410   : > { %2823 = vrot.lane.b32.xlu0 %v5909_v5, %s4384_s13  ;;  %2825 = vrot.lane.b32.xlu1 %v5907_v12, %s4384_s13 }
 0x414   : > { %2880 = vrot.lane.b32.xlu0 %v5919_v33, %s4385_s15  ;;  %2878 = vrot.lane.b32.xlu1 %v5921_v0, %s4385_s15 }
 0x415   : > { %v2670_v46 = vld [vmem:[#allocation2 + $0xc] sm:$0xff] }
 0x416   : > { %v5931_v14 = vcombine.high %v2670_v46, %v2670_v46  ;;  %v5933_v58 = vcombine.low %v2670_v46, %v2670_v46 }
 0x418   : > { %2928 = vrot.lane.b32.xlu0 %v5921_v0, %s4384_s13  ;;  %2930 = vrot.lane.b32.xlu1 %v5919_v33, %s4384_s13 }
 0x41c   : > { %2779 = vrot.lane.b32.xlu0 %v5931_v14, %s4385_s15  ;;  %2777 = vrot.lane.b32.xlu1 %v5933_v58, %s4385_s15 }
 0x41d   : > { %v2258_v27 = vpop.f32.mrb[16].mxu0 }
 0x41e   : > { %v2259_v20 = vadd.f32 %v2258_v27, %v5891_v53  ;;  %v2260_v1 = vpop.f32.mrb[17].mxu0 }
 0x41f   : > { %v2261_v56 = vadd.f32 %v2260_v1, %v5891_v53  ;;  %v2262_v32 = vpop.f32.mrb[18].mxu0 }
 0x420   : > { %v2474_v9 = vmax.f32 %v2259_v20, 0.0  ;;  %2827 = vrot.lane.b32.xlu0 %v5933_v58, %s4384_s13  ;;  %2829 = vrot.lane.b32.xlu1 %v5931_v14, %s4384_s13  ;;  %v2263_v10 = vpop.f32.mrb[19].mxu0 }
 0x421   : > { %v2475_v62 = vmax.f32 %v2261_v56, 0.0  ;;  %v6058_v10 = vpop.permute.xlu0 %3064 }
 0x422   : > { %v2574_v28 = vmul.f32 %v2509_v60, %v2474_v9  ;;  %7094 = vst [vmem:[#allocation19_spill] sm:$0xff] %v6058_v10  ;;  %v2553_v10 = vrot.slane %v6030_v8, %v4764_v61 }
 0x423   : > { %v2575_v17 = vmul.f32 %v2513_v6, %v2475_v62 }
 0x424   : > { %2884 = vrot.lane.b32.xlu0 %v5949_v25, %s4385_s15  ;;  %2882 = vrot.lane.b32.xlu1 %v5951_v63, %s4385_s15  ;;  %v5977_v22 = vpack.c.bf16 %v2574_v28, %v2574_v28 }
 0x425   : > { %v4187_v49 = vpack.c.bf16 %v2575_v17, %v2574_v28  ;;  %v5993_v16 = vpack.c.bf16 %v2575_v17, %v2575_v17  ;;  %v2533_v28 = vrot.slane %v6030_v8, %v4733_v39 }
 0x427   : > { %2654 = vst [vmem:[#allocation2 + $0x18] sm:$0xff] %v4187_v49 }
 0x428   : > { %2932 = vrot.lane.b32.xlu0 %v5951_v63, %s4384_s13  ;;  %2934 = vrot.lane.b32.xlu1 %v5949_v25, %s4384_s13 }
 0x429   : > { %v2299_v15 = vpop.f32.mrb[24].mxu1 }
 0x42a   : > { %v2300_v35 = vadd.f32 %v2299_v15, %v5891_v53  ;;  %v2301_v11 = vpop.f32.mrb[25].mxu1  ;;  %v2537_v15 = vrot.slane %v6030_v8, %v4706_v7 }
 0x42b   : > { %v2302_v38 = vadd.f32 %v2301_v11, %v5891_v53  ;;  %v2303_v26 = vpop.f32.mrb[26].mxu1 }
 0x42c   : > { %v2476_v21 = vmax.f32 %v2300_v35, 0.0  ;;  %3034 = vrot.lane.b32.xlu0 %v5931_v14, %s4384_s13  ;;  %3032 = vrot.lane.b32.xlu1 %v5933_v58, %s4384_s13  ;;  %v2304_v13 = vpop.f32.mrb[27].mxu1 }
 0x42d   : > { %v2477_v23 = vmax.f32 %v2302_v38, 0.0  ;;  %v6076_v13 = vpop.permute.xlu1 %2960 }
 0x42e   : > { %v2576_v30 = vmul.f32 %v2517_v45, %v2476_v21  ;;  %v2671_v55 = vld [vmem:[#allocation2 + $0x14] sm:$0xff]  ;;  %7095 = vst [vmem:[#allocation13_spill] sm:$0xff] %v6076_v13 }
 0x42f   : > { %v2577_v3 = vmul.f32 %v2521_v47, %v2477_v23  ;;  %v5971_v34 = vcombine.low %v2671_v55, %v2671_v55  ;;  %v5983_v44 = vcombine.high %v2671_v55, %v2671_v55 }
 0x430   : > { %v6005_v29 = vpack.c.bf16 %v2576_v30, %v2576_v30 }
 0x431   : > { %v4188_v52 = vpack.c.bf16 %v2577_v3, %v2576_v30  ;;  %2831 = vrot.lane.b32.xlu0 %v5971_v34, %s4384_s13  ;;  %2781 = vrot.lane.b32.xlu1 %v5971_v34, %s4385_s15  ;;  %v6019_v24 = vpack.c.bf16 %v2577_v3, %v2577_v3 }
 0x433   : > { %2655 = vst [vmem:[#allocation2 + $0x20] sm:$0xff] %v4188_v52  ;;  %7090 = vst [vmem:[#allocation21_spill] sm:$0xff] %v6019_v24 }
 0x435   : > { %2936 = vrot.lane.b32.xlu0 %v5977_v22, %s4384_s13  ;;  %2886 = vrot.lane.b32.xlu1 %v5977_v22, %s4385_s15 }
 0x439   : > { %3038 = vrot.lane.b32.xlu0 %v5983_v44, %s4384_s13  ;;  %2783 = vrot.lane.b32.xlu1 %v5983_v44, %s4385_s15 }
 0x43a   : > { %v2683_v40 = vld [vmem:[#allocation2 + $0x1c] sm:$0xff] }
 0x43b   : > { %v5995_v59 = vcombine.low %v2683_v40, %v2683_v40  ;;  %v6011_v36 = vcombine.high %v2683_v40, %v2683_v40 }
 0x43d   : > { %2833 = vrot.lane.b32.xlu0 %v5983_v44, %s4384_s13  ;;  %3036 = vrot.lane.b32.xlu1 %v5971_v34, %s4384_s13 }
 0x441   : > { %2888 = vrot.lane.b32.xlu0 %v5993_v16, %s4385_s15  ;;  %3040 = vrot.lane.b32.xlu1 %v5995_v59, %s4384_s13 }
 0x445   : > { %2938 = vrot.lane.b32.xlu0 %v5993_v16, %s4384_s13  ;;  %2835 = vrot.lane.b32.xlu1 %v5995_v59, %s4384_s13 }
 0x449   : > { %2785 = vrot.lane.b32.xlu0 %v5995_v59, %s4385_s15  ;;  %2890 = vrot.lane.b32.xlu1 %v6005_v29, %s4385_s15 }
 0x44d   : > { %2787 = vrot.lane.b32.xlu0 %v6011_v36, %s4385_s15  ;;  %2940 = vrot.lane.b32.xlu1 %v6005_v29, %s4384_s13 }
 0x451   : > { %2837 = vrot.lane.b32.xlu0 %v6011_v36, %s4384_s13 }
 0x455   : > { %2892 = vrot.lane.b32.xlu0 %v6019_v24, %s4385_s15 }
 0x459   : > { %2942 = vrot.lane.b32.xlu0 %v6019_v24, %s4384_s13 }
 0x45d   : > { %3042 = vrot.lane.b32.xlu0 %v6011_v36, %s4384_s13 }
 0x461   : > { %v2340_v31 = vpop.f32.mrb[20].mxu0 }
 0x462   : > { %v2341_v18 = vadd.f32 %v2340_v31, %v5891_v53  ;;  %v2342_v2 = vpop.f32.mrb[21].mxu0 }
 0x463   : > { %v2343_v41 = vadd.f32 %v2342_v2, %v5891_v53  ;;  %v2344_v42 = vpop.f32.mrb[22].mxu0 }
 0x464   : > { %v2478_v19 = vmax.f32 %v2341_v18, 0.0  ;;  %v2345_v46 = vpop.f32.mrb[23].mxu0  ;;  %v2541_v18 = vrot.slane %v6030_v8, %v4744_v50 }
 0x465   : > { %v2479_v27 = vmax.f32 %v2343_v41, 0.0  ;;  %v2545_v41 = vrot.slane %v6030_v8, %v4747_v51 }
 0x466   : > { %v2578_v20 = vmul.f32 %v2525_v54, %v2478_v19 }
 0x467   : > { %v2579_v60 = vmul.f32 %v2529_v4, %v2479_v27 }
 0x468   : > { %v6050_v37 = vpack.c.bf16 %v2578_v20, %v2578_v20 }
 0x469   : > { %v4189_v1 = vpack.c.bf16 %v2579_v60, %v2578_v20  ;;  %v6056_v43 = vpack.c.bf16 %v2579_v60, %v2579_v60 }
 0x46a   : > { %7092 = vst [vmem:[#allocation26_spill] sm:$0xff] %v6050_v37 }
 0x46b   : > { %2656 = vst [vmem:[#allocation2 + $0x28] sm:$0xff] %v4189_v1  ;;  %7093 = vst [vmem:[#allocation11_spill] sm:$0xff] %v6056_v43 }
 0x472   : > { %v2673_v56 = vld [vmem:[#allocation2 + $0x24] sm:$0xff] }
 0x473   : > { %v6038_v6 = vcombine.high %v2673_v56, %v2673_v56  ;;  %v6040_v32 = vcombine.low %v2673_v56, %v2673_v56 }
 0x475   : > { %7091 = vst [vmem:[#allocation20_spill] sm:$0xff] %v6038_v6  ;;  %2791 = vrot.lane.b32.xlu0 %v6038_v6, %s4385_s15  ;;  %2789 = vrot.lane.b32.xlu1 %v6040_v32, %s4385_s15 }
 0x479   : > { %3046 = vrot.lane.b32.xlu0 %v6038_v6, %s4384_s13  ;;  %2839 = vrot.lane.b32.xlu1 %v6040_v32, %s4384_s13 }
 0x47d   : > { %2841 = vrot.lane.b32.xlu0 %v6038_v6, %s4384_s13  ;;  %2894 = vrot.lane.b32.xlu1 %v6050_v37, %s4385_s15 }
 0x47e   : > { %v6074_v26 = vpop.permute.xlu0 %2775  ;;  %v6080_v30 = vpop.permute.xlu1 %2773 }
 0x480   : > { %v2381_v9 = vpop.f32.mrb[28].mxu1 }
 0x481   : > { %v2382_v62 = vadd.f32 %v2381_v9, %v5891_v53  ;;  %v2383_v17 = vpop.f32.mrb[29].mxu1  ;;  %2896 = vrot.lane.b32.xlu0 %v6056_v43, %s4385_s15  ;;  %2944 = vrot.lane.b32.xlu1 %v6050_v37, %s4384_s13 }
 0x482   : > { %v2384_v49 = vadd.f32 %v2383_v17, %v5891_v53  ;;  %v2385_v45 = vpop.f32.mrb[30].mxu1  ;;  %v6078_v23 = vpop.permute.xlu0 %2823 }
 0x483   : > { %v2480_v35 = vmax.f32 %v2382_v62, 0.0  ;;  %v2386_v38 = vpop.f32.mrb[31].mxu1  ;;  %v6098_v42 = vpop.permute.xlu1 %2825 }
 0x484   : > { %v2481_v11 = vmax.f32 %v2384_v49, 0.0 }
 0x485   : > { %v2580_v47 = vmul.f32 %v2533_v28, %v2480_v35  ;;  %2946 = vrot.lane.b32.xlu0 %v6056_v43, %s4384_s13  ;;  %3044 = vrot.lane.b32.xlu1 %v6040_v32, %s4384_s13 }
 0x486   : > { %v2581_v39 = vmul.f32 %v2537_v15, %v2481_v11  ;;  %v6086_v52 = vpop.permute.xlu0 %2880 }
 0x487   : > { %v6112_v56 = vpop.permute.xlu1 %2878  ;;  %v6114_v9 = vpack.c.bf16 %v2580_v47, %v2580_v47 }
 0x488   : > { %v4190_v21 = vpack.c.bf16 %v2581_v39, %v2580_v47  ;;  %v6106_v60 = vpack.c.bf16 %v2581_v39, %v2581_v39 }
 0x489   : > { %7099 = vst [vmem:[#allocation14_spill] sm:$0xff] %v6114_v9 }
 0x48a   : > { %2657 = vst [vmem:[#allocation2 + $0x30] sm:$0xff] %v4190_v21  ;;  %v6104_v27 = vpop.permute.xlu0 %2928  ;;  %7098 = vst [vmem:[#allocation23_spill] sm:$0xff] %v6106_v60 }
 0x48b   : > { %v6122_v28 = vpop.permute.xlu1 %2930 }
 0x48e   : > { %v6116_v62 = vpop.permute.xlu0 %2779 }
 0x48f   : > { %v6138_v45 = vpop.permute.xlu1 %2777 }
 0x491   : > { %v2674_v7 = vld [vmem:[#allocation2 + $0x2c] sm:$0xff] }
 0x492   : > { %v6082_v55 = vcombine.high %v2674_v7, %v2674_v7  ;;  %v6084_v3 = vcombine.low %v2674_v7, %v2674_v7  ;;  %v6128_v17 = vpop.permute.xlu0 %2827 }
 0x493   : > { %v6148_v47 = vpop.permute.xlu1 %2829 }
 0x494   : > { %7096 = vst [vmem:[#allocation12_spill] sm:$0xff] %v6082_v55  ;;  %7097 = vst [vmem:[#allocation18_spill] sm:$0xff] %v6084_v3  ;;  %2795 = vrot.lane.b32.xlu0 %v6082_v55, %s4385_s15  ;;  %2793 = vrot.lane.b32.xlu1 %v6084_v3, %s4385_s15 }
 0x495   : > { %v2422_v40 = vpop.f32.mrb[24].mxu0 }
 0x496   : > { %v2423_v31 = vadd.f32 %v2422_v40, %v5891_v53  ;;  %v2424_v54 = vpop.f32.mrb[25].mxu0  ;;  %v6140_v11 = vpop.permute.xlu0 %2884 }
 0x497   : > { %v2425_v2 = vadd.f32 %v2424_v54, %v5891_v53  ;;  %v2426_v4 = vpop.f32.mrb[26].mxu0  ;;  %v6162_v7 = vpop.permute.xlu1 %2882 }
 0x498   : > { %v2482_v19 = vmax.f32 %v2423_v31, 0.0  ;;  %2845 = vrot.lane.b32.xlu0 %v6082_v55, %s4384_s13  ;;  %3048 = vrot.lane.b32.xlu1 %v6084_v3, %s4384_s13  ;;  %v2427_v46 = vpop.f32.mrb[27].mxu0 }
 0x499   : > { %v2483_v50 = vmax.f32 %v2425_v2, 0.0 }
 0x49a   : > { %v2582_v20 = vmul.f32 %v2541_v18, %v2482_v19  ;;  %v6150_v39 = vpop.permute.xlu0 %2932 }
 0x49b   : > { %v2583_v1 = vmul.f32 %v2545_v41, %v2483_v50  ;;  %v6168_v31 = vpop.permute.xlu1 %2934 }
 0x49c   : > { %2900 = vrot.lane.b32.xlu0 %v6106_v60, %s4385_s15  ;;  %2843 = vrot.lane.b32.xlu1 %v6084_v3, %s4384_s13  ;;  %v6146_v38 = vpack.c.bf16 %v2582_v20, %v2582_v20  ;;  %v2962_v3 = vsel %vm1846_vm14, %v6104_v27, %v6122_v28 }
 0x49d   : > { %v4191_v51 = vpack.c.bf16 %v2583_v1, %v2582_v20  ;;  %v6156_v21 = vpack.c.bf16 %v2583_v1, %v2583_v1  ;;  %v2549_v20 = vrot.slane %v6030_v8, %v4757_v57 }
 0x49e   : > { %7102 = vst [vmem:[#allocation22_spill] sm:$0xff] %v6146_v38  ;;  %v6164_v40 = vpop.permute.xlu0 %3034 }
 0x49f   : > { %2658 = vst [vmem:[#allocation2 + $0x38] sm:$0xff] %v4191_v51  ;;  %7103 = vst [vmem:[#allocation4_spill] sm:$0xff] %v6156_v21  ;;  %v6174_v54 = vpop.permute.xlu1 %3032 }
 0x4a0   : > { %2950 = vrot.lane.b32.xlu0 %v6106_v60, %s4384_s13  ;;  %2898 = vrot.lane.b32.xlu1 %v6114_v9, %s4385_s15 }
 0x4a3   : > { %v6170_v18 = vpop.permute.xlu0 %2831  ;;  %v6178_v41 = vpop.permute.xlu1 %2781 }
 0x4a4   : > { %3050 = vrot.lane.b32.xlu0 %v6082_v55, %s4384_s13  ;;  %2948 = vrot.lane.b32.xlu1 %v6114_v9, %s4384_s13 }
 0x4a6   : > { %v2675_v49 = vld [vmem:[#allocation2 + $0x34] sm:$0xff] }
 0x4a7   : > { %v6130_v15 = vcombine.high %v2675_v49, %v2675_v49  ;;  %v6132_v35 = vcombine.low %v2675_v49, %v2675_v49  ;;  %v6176_v2 = vpop.permute.xlu0 %2936  ;;  %v6182_v46 = vpop.permute.xlu1 %2886 }
 0x4a9   : > { %7100 = vst [vmem:[#allocation24_spill] sm:$0xff] %v6130_v15  ;;  %7101 = vst [vmem:[#allocation3_spill] sm:$0xff] %v6132_v35  ;;  %2799 = vrot.lane.b32.xlu0 %v6130_v15, %s4385_s15  ;;  %2797 = vrot.lane.b32.xlu1 %v6132_v35, %s4385_s15 }
 0x4ab   : > { %v6180_v4 = vpop.permute.xlu0 %3038  ;;  %v6192_v43 = vpop.permute.xlu1 %2783 }
 0x4ad   : > { %3054 = vrot.lane.b32.xlu0 %v6130_v15, %s4384_s13  ;;  %2847 = vrot.lane.b32.xlu1 %v6132_v35, %s4384_s13 }
 0x4af   : > { %v6187_v51 = vpop.permute.xlu0 %2833  ;;  %v6196_v57 = vpop.permute.xlu1 %3036 }
 0x4b1   : > { %2849 = vrot.lane.b32.xlu0 %v6130_v15, %s4384_s13  ;;  %2902 = vrot.lane.b32.xlu1 %v6146_v38, %s4385_s15 }
 0x4b3   : > { %v6204_v8 = vpop.permute.xlu1 %3040 }
 0x4b5   : > { %2954 = vrot.lane.b32.xlu0 %v6156_v21, %s4384_s13  ;;  %2952 = vrot.lane.b32.xlu1 %v6146_v38, %s4384_s13 }
 0x4b9   : > { %3052 = vrot.lane.b32.xlu1 %v6132_v35, %s4384_s13 }
 0x4bd   : > { %2904 = vrot.lane.b32.xlu1 %v6156_v21, %s4385_s15 }
 0x4cd   : > { %v2463_v19 = vpop.f32.mrb[32].mxu1 }
 0x4ce   : > { %v2464_v50 = vadd.f32 %v2463_v19, %v5891_v53  ;;  %v2465_v1 = vpop.f32.mrb[33].mxu1  ;;  %v6194_v19 = vpop.permute.xlu0 %2888 }
 0x4cf   : > { %v2466_v49 = vadd.f32 %v2465_v1, %v5891_v53  ;;  %v2467_v13 = vpop.f32.mrb[34].mxu1 }
 0x4d0   : > { %v2484_v21 = vmax.f32 %v2464_v50, 0.0  ;;  %v2468_v38 = vpop.f32.mrb[35].mxu1 }
 0x4d1   : > { %v2485_v15 = vmax.f32 %v2466_v49, 0.0 }
 0x4d2   : > { %v2584_v60 = vmul.f32 %v2549_v20, %v2484_v21  ;;  %v6198_v9 = vpop.permute.xlu0 %2938 }
 0x4d3   : > { %v2585_v55 = vmul.f32 %v2553_v10, %v2485_v15  ;;  %v6216_v10 = vpop.permute.xlu1 %2835 }
 0x4d5   : > { %v4192_v35 = vpack.c.bf16 %v2585_v55, %v2584_v60  ;;  %v6226_v38 = vpack.c.bf16 %v2585_v55, %v2585_v55 }
 0x4d6   : > { %v6206_v13 = vpop.permute.xlu0 %2785 }
 0x4d7   : > { %2659 = vst [vmem:[#allocation2 + $0x40] sm:$0xff] %v4192_v35  ;;  %v6220_v35 = vpack.c.bf16 %v2584_v60, %v2584_v60  ;;  %7107 = vst [vmem:[#allocation16_spill] sm:$0xff] %v6226_v38  ;;  %v6230_v20 = vpop.permute.xlu1 %2890 }
 0x4d9   : > { %7106 = vst [vmem:[#allocation5_spill] sm:$0xff] %v6220_v35 }
 0x4da   : > { %v6218_v15 = vpop.permute.xlu0 %2787 }
 0x4db   : > { %v6241_v55 = vpop.permute.xlu1 %2940 }
 0x4de   : > { %v2676_v53 = vld [vmem:[#allocation2 + $0x3c] sm:$0xff]  ;;  %v6228_v21 = vld [vmem:[#allocation2 + $0x44] ss:$0 sps:$4 sm:$0xff]   ;;  %v6232_v49 = vpop.permute.xlu0 %2837 }
 0x4df   : > { %v6200_v1 = vcombine.high %v2676_v53, %v2676_v53  ;;  %v6202_v61 = vcombine.low %v2676_v53, %v2676_v53  ;;  %7108 = vst [vmem:[#allocation15_spill] sm:$0xff] %v6228_v21  ;;  %v2680_v50 = vld [vmem:[#allocation2 + $0x44] sm:$0xff] }
 0x4e0   : > { %v4146_v60 = vcombine.high %v2680_v50, %v2680_v50 }
 0x4e1   : > { %7104 = vst [vmem:[#allocation25_spill] sm:$0xff] %v6200_v1  ;;  %7105 = vst [vmem:[#allocation17_spill] sm:$0xff] %v6202_v61  ;;  %2803 = vrot.lane.b32.xlu0 %v6200_v1, %s4385_s15  ;;  %2801 = vrot.lane.b32.xlu1 %v6202_v61, %s4385_s15 }
 0x4e2   : > { %v6243_v53 = vpop.permute.xlu0 %2892 }
 0x4e5   : > { %2853 = vrot.lane.b32.xlu0 %v6200_v1, %s4384_s13  ;;  %3056 = vrot.lane.b32.xlu1 %v6202_v61, %s4384_s13 }
 0x4e6   : > { %v6253_v24 = vpop.permute.xlu0 %2942 }
 0x4e7   : > { %v6248_v6 = vpop.permute.xlu1 %2789 }
 0x4e9   : > { %2906 = vrot.lane.b32.xlu0 %v6220_v35, %s4385_s15  ;;  %2851 = vrot.lane.b32.xlu1 %v6202_v61, %s4384_s13  ;;  %v4161_v61 = vcombine.low %v2680_v50, %v2680_v50  ;;  %v3186_v50 = vsel %vm1686_vm12, %v6112_v56, %v6104_v27  ;;  %v4109_v27 = vcombine.high %v5880_v48, %v5880_v48 }
 0x4ed   : > { %2958 = vrot.lane.b32.xlu0 %v6226_v38, %s4384_s13  ;;  %2855 = vrot.lane.b32.xlu1 %v6228_v21, %s4384_s13  ;;  %v3135_v21 = vsel %vm1686_vm12, %v6078_v23, %v5909_v5  ;;  %v6268_v5 = vpop.permute.xlu0 %3042 }
 0x4f1   : > { %2985 = vrot.lane.b32.xlu0 %v4146_v60, %s4385_s15  ;;  %2908 = vrot.lane.b32.xlu1 %v6226_v38, %s4385_s15  ;;  %v6263_v38 = vpop.permute.xlu1 %2839 }
 0x4f5   : > { %3060 = vrot.lane.b32.xlu0 %v4161_v61, %s4384_s13  ;;  %2956 = vrot.lane.b32.xlu1 %v6220_v35, %s4384_s13  ;;  %v2857_v35 = vsel %vm1846_vm14, %v6078_v23, %v6098_v42  ;;  %v2910_v23 = vsel %vm1795_vm13, %v6112_v56, %v6086_v52 }
 0x4f9   : > { %2983 = vrot.lane.b32.xlu1 %v4161_v61, %s4385_s15  ;;  %3342 = vrot.lane.b32.xlu0 %v3135_v21, %s4381_s14  ;;  %v3138_v61 = vsel %vm1686_vm12, %v2857_v35, %v5907_v12  ;;  %v4108_v21 = vcombine.low %v5880_v48, %v5880_v48  ;;  %v3189_v35 = vsel %vm1686_vm12, %v2910_v23, %v2962_v3 }
 0x4fa   : > { %v2806_v48 = vsel %vm1795_vm13, %v6074_v26, %v6138_v45 }
 0x4fb   : > { %v3084_v12 = vsel %vm1686_vm12, %v4108_v21, %v6080_v30  ;;  %v3090_v3 = vsel %vm1686_vm12, %v5921_v0, %v2806_v48  ;;  %v2859_v21 = vsel %vm1846_vm14, %v6128_v17, %v6148_v47 }
 0x4fd   : > { %3058 = vrot.lane.b32.xlu1 %v6200_v1, %s4384_s13  ;;  %3376 = vrot.lane.b32.xlu0 %v3186_v50, %s4381_s14  ;;  %v6282_v50 = vpop.permute.xlu0 %2791  ;;  %v6284_v1 = vpop.permute.xlu1 %2894 }
 0x501   : > { %3062 = vrot.lane.b32.xlu1 %v4146_v60, %s4384_s13  ;;  %3344 = vrot.lane.b32.xlu0 %v3138_v61, %s4381_s14  ;;  %v2805_v60 = vsel %vm1795_vm13, %v6080_v30, %v6074_v26  ;;  %v6297_v61 = vpop.permute.xlu0 %3046  ;;  %v6299_v37 = vpop.permute.xlu1 %2944  ;;  %v3236_v30 = vsel %vm1686_vm12, %v5921_v0, %v6138_v45  ;;  %v3144_v26 = vsel %vm1686_vm12, %v2859_v21, %v5931_v14  ;;  %s6882_s13 = scalar_lea.vmem %s6929_s11, %s4183_s29 }
 0x502   : > { %v3087_v56 = vsel %vm1686_vm12, %v4109_v27, %v2805_v60  ;;  %v2807_v0 = vsel %vm1795_vm13, %v6138_v45, %v6116_v62  ;;  %v2964_v27 = vsel %vm1846_vm14, %v6150_v39, %v6168_v31  ;;  %v2912_v14 = vsel %vm1795_vm13, %v6162_v7, %v6140_v11 }
 0x503   : > { %v2858_v45 = vsel %vm1846_vm14, %v6098_v42, %v6128_v17  ;;  %v2808_v42 = vsel %vm1795_vm13, %v6116_v62, %v6178_v41 }
 0x505   : > { %3308 = vrot.lane.b32.xlu1 %v3084_v12, %s4381_s14  ;;  %3378 = vrot.lane.b32.xlu0 %v3189_v35, %s4381_s14  ;;  %v6317_v23 = vpop.permute.xlu0 %2841  ;;  %v6319_v12 = vpop.permute.xlu1 %3044  ;;  %v3066_v35 = vsel %vm1846_vm14, %v6174_v54, %v6164_v40 }
 0x509   : > { %3310 = vrot.lane.b32.xlu1 %v3087_v56, %s4381_s14  ;;  %3418 = vrot.lane.b32.xlu0 %v6174_v54, %s4381_s14  ;;  %v6337_v60 = vpop.permute.xlu1 %2793  ;;  %v3195_v54 = vsel %vm1686_vm12, %v2912_v14, %v2964_v27  ;;  %v3093_v56 = vsel %vm1686_vm12, %v5919_v33, %v2807_v0  ;;  %v6345_v48 = vpop.permute.xlu0 %2896  ;;  %v2963_v33 = vsel %vm1846_vm14, %v6122_v28, %v6150_v39 }
 0x50d   : > { %3410 = vrot.lane.b32.xlu1 %v3236_v30, %s4381_s14  ;;  %3312 = vrot.lane.b32.xlu0 %v3090_v3, %s4381_s14  ;;  %v3067_v30 = vsel %vm1846_vm14, %v6164_v40, %v6196_v57  ;;  %v3141_v3 = vsel %vm1686_vm12, %v2858_v45, %v5933_v58  ;;  %v6360_v17 = vpop.permute.xlu1 %3048  ;;  %v2911_v40 = vsel %vm1795_vm13, %v6086_v52, %v6162_v7  ;;  %v6367_v21 = vpop.permute.xlu0 %2946 }
 0x50e   : > { %v3096_v58 = vsel %vm1686_vm12, %v5951_v63, %v2808_v42  ;;  %v3192_v28 = vsel %vm1686_vm12, %v2911_v40, %v2963_v33  ;;  %v3068_v52 = vsel %vm1846_vm14, %v6196_v57, %v6180_v4  ;;  %v2860_v63 = vsel %vm1846_vm14, %v6148_v47, %v6170_v18 }
 0x50f   : > { %v2810_v7 = vsel %vm1795_vm13, %v6192_v43, %v6206_v13  ;;  %v2965_v47 = vsel %vm1846_vm14, %v6168_v31, %v6176_v2  ;;  %v2862_v57 = vsel %vm1846_vm14, %v6187_v51, %v6216_v10  ;;  %v2967_v31 = vsel %vm1846_vm14, %v6198_v9, %v6241_v55 }
 0x510   : > { %v3102_v0 = vsel %vm1686_vm12, %v5977_v22, %v2810_v7  ;;  %v3153_v22 = vsel %vm1686_vm12, %v2862_v57, %v5995_v59  ;;  %v2812_v33 = vsel %vm1795_vm13, %v6218_v15, %v6248_v6 }
 0x511   : > { %3348 = vrot.lane.b32.xlu0 %v3144_v26, %s4381_s14  ;;  %3420 = vrot.lane.b32.xlu1 %v3066_v35, %s4381_s14  ;;  %v6374_v62 = vpop.permute.xlu0 %2795  ;;  %v6376_v39 = vpop.permute.xlu1 %2843  ;;  %v3069_v26 = vsel %vm1846_vm14, %v6180_v4, %v6204_v8  ;;  %v3147_v35 = vsel %vm1686_vm12, %v2860_v63, %v5971_v34  ;;  %v2913_v4 = vsel %vm1795_vm13, %v6140_v11, %v6182_v46 }
 0x512   : > { %v3198_v34 = vsel %vm1686_vm12, %v2913_v4, %v2965_v47  ;;  %v2809_v11 = vsel %vm1795_vm13, %v6178_v41, %v6192_v43  ;;  %v2861_v41 = vsel %vm1846_vm14, %v6170_v18, %v6187_v51  ;;  %v3073_v63 = vsel %vm1846_vm14, %v6297_v61, %v6360_v17 }
 0x513   : > { %v3099_v59 = vsel %vm1686_vm12, %v5949_v25, %v2809_v11  ;;  %v2966_v25 = vsel %vm1846_vm14, %v6176_v2, %v6198_v9  ;;  %v3108_v9 = vsel %vm1686_vm12, %v6005_v29, %v2812_v33  ;;  %v2864_v2 = vsel %vm1846_vm14, %v6232_v49, %v6263_v38 }
 0x514   : > { %v2811_v29 = vsel %vm1795_vm13, %v6206_v13, %v6218_v15  ;;  %v2863_v13 = vsel %vm1846_vm14, %v6216_v10, %v6232_v49  ;;  %v2814_v10 = vsel %vm1795_vm13, %v6282_v50, %v6337_v60  ;;  %v2813_v47 = vsel %vm1795_vm13, %v6248_v6, %v6282_v50 }
 0x515   : > { %3382 = vrot.lane.b32.xlu0 %v3195_v54, %s4381_s14  ;;  %3314 = vrot.lane.b32.xlu1 %v3093_v56, %s4381_s14  ;;  %v6405_v27 = vpop.permute.xlu0 %2845  ;;  %v6407_v14 = vpop.permute.xlu1 %2898  ;;  %v2915_v54 = vsel %vm1795_vm13, %v6194_v19, %v6230_v20  ;;  %v2865_v50 = vsel %vm1846_vm14, %v6263_v38, %v6317_v23 }
 0x516   : > { %v3204_v43 = vsel %vm1686_vm12, %v2915_v54, %v2967_v31 }
 0x519   : > { %3422 = vrot.lane.b32.xlu0 %v3067_v30, %s4381_s14  ;;  %3346 = vrot.lane.b32.xlu1 %v3141_v3, %s4381_s14  ;;  %v6425_v56 = vpop.permute.xlu0 %2900  ;;  %v6427_v45 = vpop.permute.xlu1 %2948  ;;  %v3150_v30 = vsel %vm1686_vm12, %v2861_v41, %v5983_v44  ;;  %v3071_v3 = vsel %vm1846_vm14, %v6268_v5, %v6319_v12  ;;  %v2914_v44 = vsel %vm1795_vm13, %v6182_v46, %v6194_v19 }
 0x51a   : > { %v3201_v42 = vsel %vm1686_vm12, %v2914_v44, %v2966_v25  ;;  %v3159_v46 = vsel %vm1686_vm12, %v2864_v2, %v6040_v32  ;;  %v3070_v19 = vsel %vm1846_vm14, %v6204_v8, %v6268_v5  ;;  %v2917_v32 = vsel %vm1795_vm13, %v6243_v53, %v6284_v1  ;;  %v7113_v44 = vld [vmem:[#allocation14_spill] sm:$0xff] }
 0x51b   : > { %v3105_v8 = vsel %vm1686_vm12, %v5993_v16, %v2811_v29  ;;  %v2968_v16 = vsel %vm1846_vm14, %v6241_v55, %v6253_v24  ;;  %v2866_v55 = vsel %vm1846_vm14, %v6317_v23, %v6376_v39  ;;  %v2971_v57 = vsel %vm1846_vm14, %v6367_v21, %v6427_v45 }
 0x51c   : > { %v2918_v23 = vsel %vm1795_vm13, %v6284_v1, %v6345_v48 }
 0x51d   : > { %3316 = vrot.lane.b32.xlu0 %v3096_v58, %s4381_s14  ;;  %3380 = vrot.lane.b32.xlu1 %v3192_v28, %s4381_s14  ;;  %v6448_v18 = vpop.permute.xlu0 %2950  ;;  %v6450_v51 = vpop.permute.xlu1 %2797  ;;  %v2969_v28 = vsel %vm1846_vm14, %v6253_v24, %v6299_v37 }
 0x51e   : > { %v2816_v38 = vsel %vm1795_vm13, %v6374_v62, %v6450_v51 }
 0x521   : > { %3426 = vrot.lane.b32.xlu0 %v3069_v26, %s4381_s14  ;;  %3424 = vrot.lane.b32.xlu1 %v3068_v52, %s4381_s14  ;;  %v6465_v40 = vpop.permute.xlu0 %3050  ;;  %v6467_v58 = vpop.permute.xlu1 %2847  ;;  %v3210_v26 = vsel %vm1686_vm12, %v2917_v32, %v2969_v28  ;;  %v3156_v52 = vsel %vm1686_vm12, %v2863_v13, %v6011_v36  ;;  %v2916_v36 = vsel %vm1795_vm13, %v6230_v20, %v6243_v53  ;;  %v7110_v53 = vld [vmem:[#allocation18_spill] sm:$0xff]  ;;  %v7115_v32 = vld [vmem:[#allocation11_spill] sm:$0xff] }
 0x522   : > { %v3072_v20 = vsel %vm1846_vm14, %v6319_v12, %v6297_v61  ;;  %v3165_v4 = vsel %vm1686_vm12, %v2866_v55, %v7110_v53  ;;  %v2919_v61 = vsel %vm1795_vm13, %v6345_v48, %v6407_v14  ;;  %v7111_v12 = vld [vmem:[#allocation21_spill] sm:$0xff]  ;;  %v3074_v1 = vsel %vm1846_vm14, %v6360_v17, %v6465_v40  ;;  %v7114_v48 = vld [vmem:[#allocation3_spill] sm:$0xff] }
 0x523   : > { %v3111_v11 = vsel %vm1686_vm12, %v7111_v12, %v2813_v47  ;;  %v3216_v6 = vsel %vm1686_vm12, %v2919_v61, %v2971_v57  ;;  %v7118_v57 = vld [vmem:[#allocation24_spill] sm:$0xff] }
 0x525   : > { %3350 = vrot.lane.b32.xlu1 %v3147_v35, %s4381_s14  ;;  %3320 = vrot.lane.b32.xlu0 %v3102_v0, %s4381_s14  ;;  %v6491_v15 = vpop.permute.xlu0 %2799  ;;  %v6493_v5 = vpop.permute.xlu1 %2902  ;;  %v3207_v35 = vsel %vm1686_vm12, %v2916_v36, %v2968_v16  ;;  %v7109_v0 = vld [vmem:[#allocation26_spill] sm:$0xff]  ;;  %v2972_v16 = vsel %vm1846_vm14, %v6427_v45, %v6448_v18 }
 0x526   : > { %v3114_v24 = vsel %vm1686_vm12, %v7109_v0, %v2814_v10  ;;  %v2921_v29 = vsel %vm1795_vm13, %v6425_v56, %v6493_v5 }
 0x529   : > { %3384 = vrot.lane.b32.xlu1 %v3198_v34, %s4381_s14  ;;  %3354 = vrot.lane.b32.xlu0 %v3153_v22, %s4381_s14  ;;  %v6513_v49 = vpop.permute.xlu0 %3054  ;;  %v6515_v7 = vpop.permute.xlu1 %2952 }
 0x52d   : > { %3318 = vrot.lane.b32.xlu1 %v3099_v59, %s4381_s14  ;;  %3388 = vrot.lane.b32.xlu0 %v3204_v43, %s4381_s14  ;;  %v6536_v34 = vpop.permute.xlu0 %2849  ;;  %v3053_v22 = vpop.permute.xlu1 %3052  ;;  %v7112_v43 = vld [vmem:[#allocation20_spill] sm:$0xff] }
 0x52e   : > { %v3075_v59 = vsel %vm1846_vm14, %v6465_v40, %v3053_v22  ;;  %v3162_v41 = vsel %vm1686_vm12, %v2865_v50, %v7112_v43 }
 0x531   : > { %3352 = vrot.lane.b32.xlu1 %v3150_v30, %s4381_s14  ;;  %3430 = vrot.lane.b32.xlu0 %v3071_v3, %s4381_s14  ;;  %v6551_v31 = vpop.permute.xlu0 %2954  ;;  %v6553_v54 = vpop.permute.xlu1 %2904  ;;  %v2970_v30 = vsel %vm1846_vm14, %v6299_v37, %v6367_v21  ;;  %v3120_v37 = vsel %vm1686_vm12, %v7113_v44, %v2816_v38  ;;  %v2868_v21 = vsel %vm1846_vm14, %v6405_v27, %v6467_v58  ;;  %v7120_v38 = vld [vmem:[#allocation17_spill] sm:$0xff] }
 0x532   : > { %v3213_v33 = vsel %vm1686_vm12, %v2918_v23, %v2970_v30  ;;  %v3171_v2 = vsel %vm1686_vm12, %v2868_v21, %v7114_v48  ;;  %v2922_v61 = vsel %vm1795_vm13, %v6493_v5, %v6553_v54  ;;  %v7121_v21 = vld [vmem:[#allocation15_spill] sm:$0xff] }
 0x535   : > { %3386 = vrot.lane.b32.xlu1 %v3201_v42, %s4381_s14  ;;  %3324 = vrot.lane.b32.xlu0 %v3108_v9, %s4381_s14 }
 0x539   : > { %3358 = vrot.lane.b32.xlu0 %v3159_v46, %s4381_s14  ;;  %3428 = vrot.lane.b32.xlu1 %v3070_v19, %s4381_s14  ;;  %v2815_v46 = vsel %vm1795_vm13, %v6337_v60, %v6374_v62  ;;  %v2973_v19 = vsel %vm1846_vm14, %v6448_v18, %v6515_v7  ;;  %v2867_v62 = vsel %vm1846_vm14, %v6376_v39, %v6405_v27  ;;  %v4352_v39 = vld [vmem:[#allocation2 + $0x40] ss:$0 sps:$4 sm:$0xff]  }
 0x53a   : > { %v3222_v28 = vsel %vm1686_vm12, %v2921_v29, %v2973_v19  ;;  %v3117_v60 = vsel %vm1686_vm12, %v7115_v32, %v2815_v46  ;;  %v2920_v27 = vsel %vm1795_vm13, %v6407_v14, %v6425_v56  ;;  %v2817_v14 = vsel %vm1795_vm13, %v6450_v51, %v6491_v15 }
 0x53d   : > { %3392 = vrot.lane.b32.xlu0 %v3210_v26, %s4381_s14  ;;  %3322 = vrot.lane.b32.xlu1 %v3105_v8, %s4381_s14 }
 0x541   : > { %3356 = vrot.lane.b32.xlu1 %v3156_v52, %s4381_s14  ;;  %3434 = vrot.lane.b32.xlu0 %v3073_v63, %s4381_s14  ;;  %v7116_v52 = vld [vmem:[#allocation12_spill] sm:$0xff] }
 0x542   : > { %v3168_v63 = vsel %vm1686_vm12, %v2867_v62, %v7116_v52 }
 0x545   : > { %3390 = vrot.lane.b32.xlu1 %v3207_v35, %s4381_s14  ;;  %3328 = vrot.lane.b32.xlu0 %v3114_v24, %s4381_s14  ;;  %v3219_v35 = vsel %vm1686_vm12, %v2920_v27, %v2972_v16  ;;  %v3076_v24 = vsel %vm1846_vm14, %v3053_v22, %v6513_v49 }
 0x549   : > { %3432 = vrot.lane.b32.xlu1 %v3072_v20, %s4381_s14  ;;  %3362 = vrot.lane.b32.xlu0 %v3165_v4, %s4381_s14  ;;  %v7117_v20 = vld [vmem:[#allocation23_spill] sm:$0xff]  ;;  %v2869_v4 = vsel %vm1846_vm14, %v6467_v58, %v6536_v34  ;;  %v2974_v58 = vsel %vm1846_vm14, %v6515_v7, %v6551_v31  ;;  %v4354_v7 = vld [vmem:[#allocation2 + $0x48] ss:$0 sps:$4 sm:$0xff]  }
 0x54a   : > { %v3123_v53 = vsel %vm1686_vm12, %v7117_v20, %v2817_v14  ;;  %v3174_v22 = vsel %vm1686_vm12, %v2869_v4, %v7118_v57  ;;  %v3225_v50 = vsel %vm1686_vm12, %v2922_v61, %v2974_v58 }
 0x54d   : > { %3326 = vrot.lane.b32.xlu1 %v3111_v11, %s4381_s14  ;;  %3396 = vrot.lane.b32.xlu0 %v3216_v6, %s4381_s14 }
 0x551   : > { %3360 = vrot.lane.b32.xlu1 %v3162_v41, %s4381_s14  ;;  %3438 = vrot.lane.b32.xlu0 %v3075_v59, %s4381_s14  ;;  %v7119_v59 = vld [vmem:[#allocation22_spill] sm:$0xff] }
 0x553   : > { %v6570_v3 = vpop.permute.xlu1 %2801  ;;  %v6572_v25 = vpop.permute.xlu0 %2803 }
 0x554   : > { %v3132_v0 = vsel %vm1686_vm12, %v4352_v39, %v6572_v25  ;;  %v2818_v12 = vsel %vm1795_vm13, %v6491_v15, %v6570_v3 }
 0x555   : > { %3394 = vrot.lane.b32.xlu1 %v3213_v33, %s4381_s14  ;;  %3332 = vrot.lane.b32.xlu0 %v3120_v37, %s4381_s14  ;;  %v3126_v5 = vsel %vm1686_vm12, %v7119_v59, %v2818_v12 }
 0x557   : > { %v3057_v42 = vpop.permute.xlu1 %3056  ;;  %v6582_v9 = vpop.permute.xlu0 %2853 }
 0x558   : > { %v3077_v13 = vsel %vm1846_vm14, %v6513_v49, %v3057_v42 }
 0x559   : > { %3366 = vrot.lane.b32.xlu0 %v3171_v2, %s4381_s14  ;;  %3436 = vrot.lane.b32.xlu1 %v3074_v1, %s4381_s14  ;;  %v2819_v1 = vsel %vm1795_vm13, %v6570_v3, %v6572_v25 }
 0x55b   : > { %v6600_v17 = vpop.permute.xlu1 %2851  ;;  %v6602_v40 = vpop.permute.xlu0 %2906 }
 0x55c   : > { %v2870_v15 = vsel %vm1846_vm14, %v6536_v34, %v6600_v17  ;;  %v2923_v2 = vsel %vm1795_vm13, %v6553_v54, %v6602_v40  ;;  %v7123_v54 = vld [vmem:[#allocation13_spill] sm:$0xff] }
 0x55d   : > { %3400 = vrot.lane.b32.xlu0 %v3222_v28, %s4381_s14  ;;  %3330 = vrot.lane.b32.xlu1 %v3117_v60, %s4381_s14  ;;  %v3177_v23 = vsel %vm1686_vm12, %v2870_v15, %v7120_v38  ;;  %v7122_v28 = vld [vmem:[#allocation4_spill] sm:$0xff] }
 0x55e   : > { %v3129_v32 = vsel %vm1686_vm12, %v7122_v28, %v2819_v1 }
 0x55f   : > { %v2856_v26 = vpop.permute.xlu1 %2855  ;;  %v6612_v8 = vpop.permute.xlu0 %2958 }
 0x560   : > { %v2872_v33 = vsel %vm1846_vm14, %v6582_v9, %v2856_v26  ;;  %v2977_v62 = vsel %vm1846_vm14, %v6612_v8, %v7123_v54 }
 0x561   : > { %3364 = vrot.lane.b32.xlu1 %v3168_v63, %s4381_s14  ;;  %3442 = vrot.lane.b32.xlu0 %v3077_v13, %s4381_s14  ;;  %v7124_v63 = vld [vmem:[#allocation25_spill] sm:$0xff] }
 0x563   : > { %v6626_v10 = vpop.permute.xlu1 %2908  ;;  %v6628_v36 = vpop.permute.xlu0 %2985 }
 0x564   : > { %v3245_v30 = vsel %vm1686_vm12, %v4354_v7, %v6628_v36  ;;  %v3234_v52 = vsel %vm1686_vm12, %v6626_v10, %v2977_v62  ;;  %v2924_v39 = vsel %vm1795_vm13, %v6602_v40, %v6626_v10  ;;  %v7126_v10 = vld [vmem:[#allocation5_spill] sm:$0xff] }
 0x565   : > { %3398 = vrot.lane.b32.xlu1 %v3219_v35, %s4381_s14  ;;  %3340 = vrot.lane.b32.xlu0 %v3132_v0, %s4381_s14  ;;  %v7125_v0 = vld [vmem:[#allocation16_spill] sm:$0xff] }
 0x567   : > { %v2957_v45 = vpop.permute.xlu1 %2956  ;;  %v6635_v18 = vpop.permute.xlu0 %3060 }
 0x568   : > { %v2975_v48 = vsel %vm1846_vm14, %v6551_v31, %v2957_v45  ;;  %v2871_v31 = vsel %vm1846_vm14, %v6600_v17, %v6582_v9  ;;  %v2976_v17 = vsel %vm1846_vm14, %v2957_v45, %v6612_v8 }
 0x569   : > { %3440 = vrot.lane.b32.xlu1 %v3076_v24, %s4381_s14  ;;  %v3228_v29 = vsel %vm1686_vm12, %v2923_v2, %v2975_v48  ;;  %v3180_v9 = vsel %vm1686_vm12, %v2871_v31, %v7124_v63  ;;  %v3231_v14 = vsel %vm1686_vm12, %v2924_v39, %v2976_v17 }
 0x56b   : > { %v6643_v56 = vpop.permute.xlu1 %2983  ;;  %v6645_v55 = vpop.permute.xlu0 %3342 }
 0x56c   : > { %v2988_v16 = vsel %vm1795_vm13, %v6643_v56, %v6628_v36  ;;  %v2987_v8 = vsel %vm1795_vm13, %v6572_v25, %v6643_v56  ;;  %v3247_v56 = vld [vmem:[%s6928_s10] sm:$0xff] }
 0x56d   : > { %3334 = vrot.lane.b32.xlu1 %v3123_v53, %s4381_s14  ;;  %v3242_v24 = vsel %vm1686_vm12, %v7125_v0, %v2988_v16  ;;  %v3239_v20 = vsel %vm1686_vm12, %v7126_v10, %v2987_v8 }
 0x56f   : > { %v3059_v49 = vpop.permute.xlu1 %3058  ;;  %v6653_v47 = vpop.permute.xlu0 %3376 }
 0x570   : > { %v3078_v51 = vsel %vm1846_vm14, %v3057_v42, %v3059_v49  ;;  %v3079_v37 = vsel %vm1846_vm14, %v3059_v49, %v6635_v18  ;;  %v3183_v42 = vsel %vm1686_vm12, %v2872_v33, %v7121_v21  ;;  %v7127_v49 = vld [vmem:[#allocation19_spill] sm:$0xff] }
 0x571   : > { %3368 = vrot.lane.b32.xlu1 %v3174_v22, %s4381_s14  ;;  %3444 = vrot.lane.b32.xlu0 %v3078_v51, %s4381_s14 }
 0x573   : > { %v6669_v11 = vpop.permute.xlu1 %3062  ;;  %v3345_v6 = vpop.permute.xlu0 %3344 }
 0x574   : > { %v3080_v40 = vsel %vm1846_vm14, %v6635_v18, %v6669_v11  ;;  %v3468_v25 = vsel %vm1337_vm2, %v6645_v55, %v3345_v6  ;;  %v3081_v51 = vsel %vm1846_vm14, %v6669_v11, %v7127_v49 }
 0x575   : > { %3402 = vrot.lane.b32.xlu1 %v3225_v50, %s4381_s14  ;;  %3336 = vrot.lane.b32.xlu0 %v3126_v5, %s4381_s14 }
 0x577   : > { %v3309_v43 = vpop.permute.xlu1 %3308  ;;  %v6679_v41 = vpop.permute.xlu0 %3378 }
 0x578   : > { %v3484_v55 = vsel %vm1337_vm2, %v6653_v47, %v6679_v41 }
 0x579   : > { %3370 = vrot.lane.b32.xlu0 %v3177_v23, %s4381_s14  ;;  %3416 = vrot.lane.b32.xlu1 %v3245_v30, %s4381_s14  ;;  %v6775_v30 = vld [vmem:[%s6927_s9] sm:$0xf] }
 0x57b   : > { %v3311_v34 = vpop.permute.xlu1 %3310  ;;  %v6689_v44 = vpop.permute.xlu0 %3418 }
 0x57c   : > { %v3452_v60 = vsel %vm1337_vm2, %v3309_v43, %v3311_v34 }
 0x57d   : > { %3374 = vrot.lane.b32.xlu0 %v3183_v42, %s4381_s14  ;;  %3446 = vrot.lane.b32.xlu1 %v3079_v37, %s4381_s14 }
 0x57f   : > { %v3411_v46 = vpop.permute.xlu1 %3410  ;;  %v3313_v19 = vpop.permute.xlu0 %3312 }
 0x580   : > { %v3453_v3 = vsel %vm1337_vm2, %v3311_v34, %v3313_v19 }
 0x581   : > { %3404 = vrot.lane.b32.xlu0 %v3228_v29, %s4381_s14  ;;  %3338 = vrot.lane.b32.xlu1 %v3129_v32, %s4381_s14 }
 0x582   : > { %3624 = vmatprep.subr.bf16.mxu0 %v3453_v3 }
 0x583   : > { %3625 = vmatpush1.bf16.msra.mxu0 %v3452_v60  ;;  %v3421_v26 = vpop.permute.xlu1 %3420  ;;  %v3349_v13 = vpop.permute.xlu0 %3348 }
 0x585   : > { %3408 = vrot.lane.b32.xlu0 %v3234_v52, %s4381_s14  ;;  %3372 = vrot.lane.b32.xlu1 %v3180_v9, %s4381_s14 }
 0x587   : > { %v3315_v27 = vpop.permute.xlu1 %3314  ;;  %v3383_v35 = vpop.permute.xlu0 %3382 }
 0x588   : > { %v3454_v61 = vsel %vm1337_vm2, %v3313_v19, %v3315_v27  ;;  %v3500_v11 = vsel %vm1337_vm2, %v3411_v46, %v3315_v27 }
 0x589   : > { %3414 = vrot.lane.b32.xlu0 %v3242_v24, %s4381_s14  ;;  %3406 = vrot.lane.b32.xlu1 %v3231_v14, %s4381_s14 }
 0x58b   : > { %v3347_v36 = vpop.permute.xlu1 %3346  ;;  %v3423_v45 = vpop.permute.xlu0 %3422 }
 0x58c   : > { %v3469_v53 = vsel %vm1337_vm2, %v3345_v6, %v3347_v36  ;;  %v3504_v6 = vsel %vm1337_vm2, %v6689_v44, %v3421_v26  ;;  %v3505_v50 = vsel %vm1337_vm2, %v3421_v26, %v3423_v45  ;;  %v3470_v15 = vsel %vm1337_vm2, %v3347_v36, %v3349_v13  ;;  %v6781_v44 = vld [vmem:[#allocation2] sm:$0xff] }
 0x58d   : > { %3448 = vrot.lane.b32.xlu0 %v3080_v40, %s4381_s14  ;;  %3412 = vrot.lane.b32.xlu1 %v3239_v20, %s4381_s14  ;;  %v3577_v43 = vsel %vm1686_vm12, %v3504_v6, 0 }
 0x58e   : > { %3626 = vmatprep.subr.bf16.mxu0 %v3469_v53 }
 0x58f   : > { %3627 = vmatpush1.bf16.msra.mxu0 %v3468_v25  ;;  %v3381_v4 = vpop.permute.xlu1 %3380  ;;  %v3317_v18 = vpop.permute.xlu0 %3316 }
 0x590   : > { %v3485_v57 = vsel %vm1337_vm2, %v6679_v41, %v3381_v4  ;;  %v3455_v22 = vsel %vm1337_vm2, %v3315_v27, %v3317_v18  ;;  %v3486_v23 = vsel %vm1337_vm2, %v3381_v4, %v3383_v35 }
 0x591   : > { %3250 = vperm.xlu0 %4328, %v3247_v56   ;;  %3450 = vrot.lane.b32.xlu1 %v3081_v51, %s4381_s14 }
 0x592   : > { %3628 = vmatprep.subr.bf16.mxu0 %v3485_v57  ;;  %3665 = vmatprep.subr.bf16.mxu1 %v3455_v22 }
 0x593   : > { %3629 = vmatpush1.bf16.msra.mxu0 %v3484_v55  ;;  %3666 = vmatpush1.bf16.msra.mxu1 %v3454_v61  ;;  %v3425_v12 = vpop.permute.xlu1 %3424  ;;  %v3427_v58 = vpop.permute.xlu0 %3426 }
 0x594   : > { %3630 = vmatprep.subr.bf16.mxu0 %v3455_v22  ;;  %v3506_v42 = vsel %vm1337_vm2, %v3423_v45, %v3425_v12  ;;  %v3507_v1 = vsel %vm1337_vm2, %v3425_v12, %v3427_v58 }
 0x595   : > { %v3583_v29 = vsel %vm1686_vm12, %v3506_v42, 0 }
 0x597   : > { %3631 = vmatpush1.bf16.msra.mxu0 %v3500_v11  ;;  %v3351_v59 = vpop.permute.xlu1 %3350  ;;  %v3321_v5 = vpop.permute.xlu0 %3320 }
 0x598   : > { %4164 = vmatprep.subr.msk.bf16.mxu0 %vm1686_vm12, %v3505_v50  ;;  %v3471_v47 = vsel %vm1337_vm2, %v3349_v13, %v3351_v59 }
 0x599   : > { %3667 = vmatprep.subr.bf16.mxu1 %v3471_v47 }
 0x59a   : > { %3668 = vmatpush1.bf16.msra.mxu1 %v3470_v15 }
 0x59b   : > { %3633 = vmatpush1.bf16.msra.mxu0 %v3577_v43  ;;  %v3385_v41 = vpop.permute.xlu1 %3384  ;;  %v3355_v7 = vpop.permute.xlu0 %3354 }
 0x59c   : > { %v3487_v38 = vsel %vm1337_vm2, %v3383_v35, %v3385_v41 }
 0x59d   : > { %3669 = vmatprep.subr.bf16.mxu1 %v3487_v38 }
 0x59e   : > { %4165 = vmatmul.mubr.msk.bf16.vlgmr.msra.gmra.mrb[28].mxu0 %vm3572_vm0, %v6775_v30  ;;  %3670 = vmatpush1.bf16.msra.mxu1 %v3486_v23 }
 0x59f   : > { %v3319_v33 = vpop.permute.xlu1 %3318  ;;  %v3389_v34 = vpop.permute.xlu0 %3388  ;;  %3738 = vmatprep.mubr.bf16.mxu0 %v6781_v44 }
 0x5a0   : > { %v3456_v37 = vsel %vm1337_vm2, %v3317_v18, %v3319_v33  ;;  %v3457_v21 = vsel %vm1337_vm2, %v3319_v33, %v3321_v5 }
 0x5a1   : > { %3671 = vmatprep.subr.bf16.mxu1 %v3457_v21  ;;  %3706 = vmatprep.subr.bf16.mxu0 %v3457_v21 }
 0x5a2   : > { %3672 = vmatpush1.bf16.msra.mxu1 %v3456_v37  ;;  %3707 = vmatpush1.bf16.msra.mxu0 %v3456_v37 }
 0x5a3   : > { %v3353_v48 = vpop.permute.xlu1 %3352  ;;  %4166 = vmatprep.subr.msk.bf16.mxu1 %vm1686_vm12, %v3507_v1  ;;  %v3431_v2 = vpop.permute.xlu0 %3430 }
 0x5a4   : > { %v3472_v46 = vsel %vm1337_vm2, %v3351_v59, %v3353_v48  ;;  %v3473_v19 = vsel %vm1337_vm2, %v3353_v48, %v3355_v7 }
 0x5a5   : > { %3708 = vmatprep.subr.bf16.mxu0 %v3473_v19 }
 0x5a6   : > { %3674 = vmatpush1.bf16.msra.mxu1 %v3583_v29  ;;  %3709 = vmatpush1.bf16.msra.mxu0 %v3472_v46 }
 0x5a7   : > { %v3387_v28 = vpop.permute.xlu1 %3386  ;;  %v3325_v32 = vpop.permute.xlu0 %3324 }
 0x5a8   : > { %v3488_v3 = vsel %vm1337_vm2, %v3385_v41, %v3387_v28  ;;  %v3489_v31 = vsel %vm1337_vm2, %v3387_v28, %v3389_v34 }
 0x5a9   : > { %4167 = vmatmul.mubr.msk.bf16.vlgmr.msra.gmra.mrb[36].mxu1 %vm3572_vm0, %v6775_v30  ;;  %3710 = vmatprep.subr.bf16.mxu0 %v3489_v31 }
 0x5aa   : > { %3711 = vmatpush1.bf16.msra.mxu0 %v3488_v3  ;;  %3779 = vmatprep.mubr.bf16.mxu1 %v6781_v44 }
 0x5ab   : > { %v3429_v60 = vpop.permute.xlu1 %3428  ;;  %v3359_v54 = vpop.permute.xlu0 %3358 }
 0x5ac   : > { %v3508_v63 = vsel %vm1337_vm2, %v3427_v58, %v3429_v60  ;;  %v3509_v9 = vsel %vm1337_vm2, %v3429_v60, %v3431_v2 }
 0x5ad   : > { %v3589_v35 = vsel %vm1686_vm12, %v3508_v63, 0 }
 0x5af   : > { %v3323_v62 = vpop.permute.xlu1 %3322  ;;  %v3393_v26 = vpop.permute.xlu0 %3392 }
 0x5b0   : > { %v3458_v13 = vsel %vm1337_vm2, %v3321_v5, %v3323_v62  ;;  %v3459_v52 = vsel %vm1337_vm2, %v3323_v62, %v3325_v32 }
 0x5b1   : > { %3712 = vmatprep.subr.bf16.mxu0 %v3459_v52  ;;  %3747 = vmatprep.subr.bf16.mxu1 %v3459_v52 }
 0x5b2   : > { %3713 = vmatpush1.bf16.msra.mxu0 %v3458_v13  ;;  %3748 = vmatpush1.bf16.msra.mxu1 %v3458_v13 }
 0x5b3   : > { %v3357_v17 = vpop.permute.xlu1 %3356  ;;  %4168 = vmatprep.subr.msk.bf16.mxu0 %vm1686_vm12, %v3509_v9  ;;  %v3435_v16 = vpop.permute.xlu0 %3434 }
 0x5b4   : > { %v3474_v39 = vsel %vm1337_vm2, %v3355_v7, %v3357_v17  ;;  %v3475_v27 = vsel %vm1337_vm2, %v3357_v17, %v3359_v54 }
 0x5b5   : > { %3749 = vmatprep.subr.bf16.mxu1 %v3475_v27 }
 0x5b6   : > { %3715 = vmatpush1.bf16.msra.mxu0 %v3589_v35  ;;  %3750 = vmatpush1.bf16.msra.mxu1 %v3474_v39 }
 0x5b7   : > { %v3391_v0 = vpop.permute.xlu1 %3390  ;;  %v3329_v24 = vpop.permute.xlu0 %3328 }
 0x5b8   : > { %v3490_v14 = vsel %vm1337_vm2, %v3389_v34, %v3391_v0  ;;  %v3491_v8 = vsel %vm1337_vm2, %v3391_v0, %v3393_v26 }
 0x5b9   : > { %4169 = vmatmul.mubr.msk.bf16.vlgmr.msra.gmra.mrb[32].mxu0 %vm3572_vm0, %v6775_v30  ;;  %3751 = vmatprep.subr.bf16.mxu1 %v3491_v8 }
 0x5ba   : > { %3752 = vmatpush1.bf16.msra.mxu1 %v3490_v14  ;;  %3820 = vmatprep.mubr.bf16.mxu0 %v6781_v44 }
 0x5bb   : > { %v3433_v36 = vpop.permute.xlu1 %3432  ;;  %v3363_v45 = vpop.permute.xlu0 %3362 }
 0x5bc   : > { %v3510_v25 = vsel %vm1337_vm2, %v3431_v2, %v3433_v36  ;;  %v3511_v56 = vsel %vm1337_vm2, %v3433_v36, %v3435_v16 }
 0x5bd   : > { %v3595_v57 = vsel %vm1686_vm12, %v3510_v25, 0 }
 0x5bf   : > { %v3327_v40 = vpop.permute.xlu1 %3326  ;;  %v3397_v10 = vpop.permute.xlu0 %3396 }
 0x5c0   : > { %v3460_v20 = vsel %vm1337_vm2, %v3325_v32, %v3327_v40  ;;  %v3461_v53 = vsel %vm1337_vm2, %v3327_v40, %v3329_v24 }
 0x5c1   : > { %3753 = vmatprep.subr.bf16.mxu1 %v3461_v53  ;;  %3788 = vmatprep.subr.bf16.mxu0 %v3461_v53 }
 0x5c2   : > { %3754 = vmatpush1.bf16.msra.mxu1 %v3460_v20  ;;  %3789 = vmatpush1.bf16.msra.mxu0 %v3460_v20 }
 0x5c3   : > { %v3361_v4 = vpop.permute.xlu1 %3360  ;;  %4170 = vmatprep.subr.msk.bf16.mxu1 %vm1686_vm12, %v3511_v56  ;;  %v3439_v18 = vpop.permute.xlu0 %3438 }
 0x5c4   : > { %v3476_v49 = vsel %vm1337_vm2, %v3359_v54, %v3361_v4  ;;  %v3477_v51 = vsel %vm1337_vm2, %v3361_v4, %v3363_v45 }
 0x5c5   : > { %3790 = vmatprep.subr.bf16.mxu0 %v3477_v51 }
 0x5c6   : > { %3756 = vmatpush1.bf16.msra.mxu1 %v3595_v57  ;;  %3791 = vmatpush1.bf16.msra.mxu0 %v3476_v49 }
 0x5c7   : > { %v3395_v22 = vpop.permute.xlu1 %3394  ;;  %v3333_v55 = vpop.permute.xlu0 %3332 }
 0x5c8   : > { %v3492_v61 = vsel %vm1337_vm2, %v3393_v26, %v3395_v22  ;;  %v3493_v12 = vsel %vm1337_vm2, %v3395_v22, %v3397_v10 }
 0x5c9   : > { %4171 = vmatmul.mubr.msk.bf16.vlgmr.msra.gmra.mrb[40].mxu1 %vm3572_vm0, %v6775_v30  ;;  %3792 = vmatprep.subr.bf16.mxu0 %v3493_v12 }
 0x5ca   : > { %3793 = vmatpush1.bf16.msra.mxu0 %v3492_v61  ;;  %3861 = vmatprep.mubr.bf16.mxu1 %v6781_v44 }
 0x5cb   : > { %v3437_v58 = vpop.permute.xlu1 %3436  ;;  %v3367_v11 = vpop.permute.xlu0 %3366 }
 0x5cc   : > { %v3512_v5 = vsel %vm1337_vm2, %v3435_v16, %v3437_v58  ;;  %v3513_v47 = vsel %vm1337_vm2, %v3437_v58, %v3439_v18 }
 0x5cd   : > { %v3601_v38 = vsel %vm1686_vm12, %v3512_v5, 0 }
 0x5cf   : > { %v3331_v6 = vpop.permute.xlu1 %3330  ;;  %v3401_v15 = vpop.permute.xlu0 %3400 }
 0x5d0   : > { %v3462_v50 = vsel %vm1337_vm2, %v3329_v24, %v3331_v6  ;;  %v3463_v59 = vsel %vm1337_vm2, %v3331_v6, %v3333_v55 }
 0x5d1   : > { %3794 = vmatprep.subr.bf16.mxu0 %v3463_v59  ;;  %3829 = vmatprep.subr.bf16.mxu1 %v3463_v59 }
 0x5d2   : > { %3795 = vmatpush1.bf16.msra.mxu0 %v3462_v50  ;;  %3830 = vmatpush1.bf16.msra.mxu1 %v3462_v50 }
 0x5d3   : > { %v3365_v43 = vpop.permute.xlu1 %3364  ;;  %4172 = vmatprep.subr.msk.bf16.mxu0 %vm1686_vm12, %v3513_v47  ;;  %v6833_v37 = vpop.permute.xlu0 %3442 }
 0x5d4   : > { %v3478_v41 = vsel %vm1337_vm2, %v3363_v45, %v3365_v43  ;;  %v3479_v7 = vsel %vm1337_vm2, %v3365_v43, %v3367_v11 }
 0x5d5   : > { %3831 = vmatprep.subr.bf16.mxu1 %v3479_v7 }
 0x5d6   : > { %3797 = vmatpush1.bf16.msra.mxu0 %v3601_v38  ;;  %3832 = vmatpush1.bf16.msra.mxu1 %v3478_v41 }
 0x5d7   : > { %v3399_v23 = vpop.permute.xlu1 %3398  ;;  %v3341_v42 = vpop.permute.xlu0 %3340 }
 0x5d8   : > { %v3494_v33 = vsel %vm1337_vm2, %v3397_v10, %v3399_v23  ;;  %v3495_v34 = vsel %vm1337_vm2, %v3399_v23, %v3401_v15 }
 0x5d9   : > { %4173 = vmatmul.mubr.msk.bf16.vlgmr.msra.gmra.mrb[36].mxu0 %vm3572_vm0, %v6775_v30  ;;  %3833 = vmatprep.subr.bf16.mxu1 %v3495_v34 }
 0x5da   : > { %3834 = vmatpush1.bf16.msra.mxu1 %v3494_v33  ;;  %3902 = vmatprep.mubr.bf16.mxu0 %v6781_v44 }
 0x5db   : > { %v3441_v21 = vpop.permute.xlu1 %3440 }
 0x5dc   : > { %v3514_v32 = vsel %vm1337_vm2, %v3439_v18, %v3441_v21  ;;  %v3515_v3 = vsel %vm1337_vm2, %v3441_v21, %v6833_v37 }
 0x5dd   : > { %v3607_v62 = vsel %vm1686_vm12, %v3514_v32, 0 }
 0x5df   : > { %v3335_v1 = vpop.permute.xlu1 %3334 }
 0x5e0   : > { %v3464_v28 = vsel %vm1337_vm2, %v3333_v55, %v3335_v1 }
 0x5e3   : > { %v3369_v48 = vpop.permute.xlu1 %3368  ;;  %v3445_v2 = vpop.permute.xlu0 %3444 }
 0x5e4   : > { %v3480_v26 = vsel %vm1337_vm2, %v3367_v11, %v3369_v48  ;;  %v3516_v56 = vsel %vm1337_vm2, %v6833_v37, %v3445_v2 }
 0x5e5   : > { %v3613_v57 = vsel %vm1686_vm12, %v3516_v56, 0 }
 0x5e7   : > { %v3403_v46 = vpop.permute.xlu1 %3402  ;;  %v3337_v19 = vpop.permute.xlu0 %3336 }
 0x5e8   : > { %v3465_v29 = vsel %vm1337_vm2, %v3335_v1, %v3337_v19  ;;  %v3496_v27 = vsel %vm1337_vm2, %v3401_v15, %v3403_v46 }
 0x5e9   : > { %3835 = vmatprep.subr.bf16.mxu1 %v3465_v29  ;;  %3870 = vmatprep.subr.bf16.mxu0 %v3465_v29 }
 0x5ea   : > { %3836 = vmatpush1.bf16.msra.mxu1 %v3464_v28  ;;  %3871 = vmatpush1.bf16.msra.mxu0 %v3464_v28 }
 0x5eb   : > { %v3417_v31 = vpop.permute.xlu1 %3416  ;;  %4174 = vmatprep.subr.msk.bf16.mxu1 %vm1686_vm12, %v3515_v3  ;;  %v3371_v60 = vpop.permute.xlu0 %3370 }
 0x5ec   : > { %v3481_v54 = vsel %vm1337_vm2, %v3369_v48, %v3371_v60 }
 0x5ed   : > { %3872 = vmatprep.subr.bf16.mxu0 %v3481_v54 }
 0x5ee   : > { %3838 = vmatpush1.bf16.msra.mxu1 %v3607_v62  ;;  %3873 = vmatpush1.bf16.msra.mxu0 %v3480_v26 }
 0x5ef   : > { %v3447_v13 = vpop.permute.xlu1 %3446  ;;  %v3375_v52 = vpop.permute.xlu0 %3374 }
 0x5f0   : > { %v3517_v4 = vsel %vm1337_vm2, %v3445_v2, %v3447_v13 }
 0x5f1   : > { %4175 = vmatmul.mubr.msk.bf16.vlgmr.msra.gmra.mrb[44].mxu1 %vm3572_vm0, %v6775_v30 }
 0x5f2   : > { %3943 = vmatprep.mubr.bf16.mxu1 %v6781_v44 }
 0x5f3   : > { %v3339_v63 = vpop.permute.xlu1 %3338  ;;  %v3405_v9 = vpop.permute.xlu0 %3404 }
 0x5f4   : > { %v3497_v17 = vsel %vm1337_vm2, %v3403_v46, %v3405_v9  ;;  %v3467_v16 = vsel %vm1337_vm2, %v3339_v63, %v3341_v42  ;;  %v3466_v39 = vsel %vm1337_vm2, %v3337_v19, %v3339_v63 }
 0x5f5   : > { %3874 = vmatprep.subr.bf16.mxu0 %v3497_v17  ;;  %3911 = vmatprep.subr.bf16.mxu1 %v3467_v16 }
 0x5f6   : > { %3875 = vmatpush1.bf16.msra.mxu0 %v3496_v27  ;;  %3912 = vmatpush1.bf16.msra.mxu1 %v3466_v39 }
 0x5f7   : > { %v3373_v35 = vpop.permute.xlu1 %3372  ;;  %v3409_v0 = vpop.permute.xlu0 %3408 }
 0x5f8   : > { %v3482_v24 = vsel %vm1337_vm2, %v3371_v60, %v3373_v35  ;;  %v3483_v44 = vsel %vm1337_vm2, %v3373_v35, %v3375_v52 }
 0x5f9   : > { %3913 = vmatprep.subr.bf16.mxu1 %v3483_v44 }
 0x5fa   : > { %3914 = vmatpush1.bf16.msra.mxu1 %v3482_v24 }
 0x5fb   : > { %v3407_v14 = vpop.permute.xlu1 %3406  ;;  %v3415_v8 = vpop.permute.xlu0 %3414 }
 0x5fc   : > { %v3498_v36 = vsel %vm1337_vm2, %v3405_v9, %v3407_v14  ;;  %v3499_v45 = vsel %vm1337_vm2, %v3407_v14, %v3409_v0  ;;  %v3503_v40 = vsel %vm1337_vm2, %v3415_v8, %v3417_v31 }
 0x5fd   : > { %3915 = vmatprep.subr.bf16.mxu1 %v3499_v45 }
 0x5fe   : > { %3916 = vmatpush1.bf16.msra.mxu1 %v3498_v36 }
 0x5ff   : > { %v3413_v10 = vpop.permute.xlu1 %3412  ;;  %3917 = vmatprep.subr.bf16.mxu1 %v3503_v40  ;;  %v3449_v20 = vpop.permute.xlu0 %3448 }
 0x600   : > { %v3502_v53 = vsel %vm1337_vm2, %v3413_v10, %v3415_v8  ;;  %v3501_v25 = vsel %vm1337_vm2, %v3339_v63, %v3413_v10  ;;  %v3518_v18 = vsel %vm1337_vm2, %v3447_v13, %v3449_v20 }
 0x601   : > { %3876 = vmatprep.subr.bf16.mxu0 %v3501_v25  ;;  %v3619_v22 = vsel %vm1686_vm12, %v3518_v18, 0 }
 0x602   : > { %3877 = vmatpush1.bf16.msra.mxu0 %v3466_v39  ;;  %3918 = vmatpush1.bf16.msra.mxu1 %v3502_v53 }
 0x603   : > { %v3451_v49 = vpop.permute.xlu1 %3450  ;;  %4176 = vmatprep.subr.msk.bf16.mxu0 %vm1686_vm12, %v3517_v4 }
 0x604   : > { %v3519_v51 = vsel %vm1337_vm2, %v3449_v20, %v3451_v49 }
 0x605   : > { %4178 = vmatprep.subr.msk.bf16.mxu1 %vm1686_vm12, %v3519_v51 }
 0x606   : > { %3879 = vmatpush1.bf16.msra.mxu0 %v3613_v57  ;;  %3920 = vmatpush1.bf16.msra.mxu1 %v3619_v22 }
 0x609   : > { %4177 = vmatmul.mubr.msk.bf16.vlgmr.msra.gmra.mrb[40].mxu0 %vm3572_vm0, %v6775_v30  ;;  %4179 = vmatmul.mubr.msk.bf16.vlgmr.msra.gmra.mrb[48].mxu1 %vm3572_vm0, %v6775_v30 }
 0x610   : > { %v6874_v55 = vpop.permute.xlu0 %3250 }
 0x671   : > { %v3658_v61 = vpop.f32.mrb[28].mxu0 }
 0x672   : > { %v3659_v12 = vadd.f32 %v3658_v61, %v6874_v55  ;;  %v3660_v58 = vpop.f32.mrb[29].mxu0 }
 0x673   : > { %v3661_v11 = vadd.f32 %v3660_v58, %v6874_v55  ;;  %v3662_v6 = vpop.f32.mrb[30].mxu0 }
 0x674   : > { %v3952_v30 = vmax.f32 %v3659_v12, 0.0  ;;  %v3663_v50 = vpop.f32.mrb[31].mxu0 }
 0x675   : > { %v3953_v59 = vmax.f32 %v3661_v11, 0.0 }
 0x676   : > { %3968 = vst [vmem:[%s6882_s13] sm:$0xff] %v3952_v30 }
 0x677   : > { %3969 = vst [vmem:[%s6882_s13 + $0x8] sm:$0xff] %v3953_v59 }
 0x67c   : > { %v3699_v5 = vpop.f32.mrb[36].mxu1 }
 0x67d   : > { %v3700_v47 = vadd.f32 %v3699_v5, %v6874_v55  ;;  %v3701_v15 = vpop.f32.mrb[37].mxu1 }
 0x67e   : > { %v3702_v43 = vadd.f32 %v3701_v15, %v6874_v55  ;;  %v3703_v41 = vpop.f32.mrb[38].mxu1 }
 0x67f   : > { %v3954_v7 = vmax.f32 %v3700_v47, 0.0  ;;  %v3704_v38 = vpop.f32.mrb[39].mxu1 }
 0x680   : > { %v3955_v23 = vmax.f32 %v3702_v43, 0.0 }
 0x681   : > { %3970 = vst [vmem:[%s6882_s13 + $0x10] sm:$0xff] %v3954_v7 }
 0x682   : > { %3971 = vst [vmem:[%s6882_s13 + $0x18] sm:$0xff] %v3955_v23 }
 0x68c   : > { %v3740_v33 = vpop.f32.mrb[32].mxu0 }
 0x68d   : > { %v3741_v34 = vadd.f32 %v3740_v33, %v6874_v55  ;;  %v3742_v37 = vpop.f32.mrb[33].mxu0 }
 0x68e   : > { %v3743_v21 = vadd.f32 %v3742_v37, %v6874_v55  ;;  %v3744_v42 = vpop.f32.mrb[34].mxu0 }
 0x68f   : > { %v3956_v1 = vmax.f32 %v3741_v34, 0.0  ;;  %v3745_v48 = vpop.f32.mrb[35].mxu0 }
 0x690   : > { %v3957_v2 = vmax.f32 %v3743_v21, 0.0 }
 0x691   : > { %3972 = vst [vmem:[%s6882_s13 + $0x20] sm:$0xff] %v3956_v1 }
 0x692   : > { %3973 = vst [vmem:[%s6882_s13 + $0x28] sm:$0xff] %v3957_v2 }
 0x69c   : > { %v3781_v46 = vpop.f32.mrb[40].mxu1 }
 0x69d   : > { %v3782_v19 = vadd.f32 %v3781_v46, %v6874_v55  ;;  %v3783_v29 = vpop.f32.mrb[41].mxu1 }
 0x69e   : > { %v3784_v28 = vadd.f32 %v3783_v29, %v6874_v55  ;;  %v3785_v32 = vpop.f32.mrb[42].mxu1 }
 0x69f   : > { %v3958_v3 = vmax.f32 %v3782_v19, 0.0  ;;  %v3786_v31 = vpop.f32.mrb[43].mxu1 }
 0x6a0   : > { %v3959_v60 = vmax.f32 %v3784_v28, 0.0 }
 0x6a1   : > { %3974 = vst [vmem:[%s6882_s13 + $0x30] sm:$0xff] %v3958_v3 }
 0x6a2   : > { %3975 = vst [vmem:[%s6882_s13 + $0x38] sm:$0xff] %v3959_v60 }
 0x6ac   : > { %v3822_v54 = vpop.f32.mrb[36].mxu0 }
 0x6ad   : > { %v3823_v62 = vadd.f32 %v3822_v54, %v6874_v55  ;;  %v3824_v26 = vpop.f32.mrb[37].mxu0 }
 0x6ae   : > { %v3825_v13 = vadd.f32 %v3824_v26, %v6874_v55  ;;  %v3826_v52 = vpop.f32.mrb[38].mxu0 }
 0x6af   : > { %v3960_v63 = vmax.f32 %v3823_v62, 0.0  ;;  %v3827_v9 = vpop.f32.mrb[39].mxu0 }
 0x6b0   : > { %v3961_v17 = vmax.f32 %v3825_v13, 0.0 }
 0x6b1   : > { %3976 = vst [vmem:[%s6882_s13 + $0x40] sm:$0xff] %v3960_v63 }
 0x6b2   : > { %3977 = vst [vmem:[%s6882_s13 + $0x48] sm:$0xff] %v3961_v17 }
 0x6c4   : > { %v3863_v16 = vpop.f32.mrb[44].mxu1 }
 0x6c5   : > { %v3864_v39 = vadd.f32 %v3863_v16, %v6874_v55  ;;  %v3865_v27 = vpop.f32.mrb[45].mxu1 }
 0x6c6   : > { %v3866_v35 = vadd.f32 %v3865_v27, %v6874_v55  ;;  %v3867_v0 = vpop.f32.mrb[46].mxu1 }
 0x6c7   : > { %v3962_v24 = vmax.f32 %v3864_v39, 0.0  ;;  %v3868_v44 = vpop.f32.mrb[47].mxu1 }
 0x6c8   : > { %v3963_v14 = vmax.f32 %v3866_v35, 0.0 }
 0x6c9   : > { %3978 = vst [vmem:[%s6882_s13 + $0x50] sm:$0xff] %v3962_v24 }
 0x6ca   : > { %3979 = vst [vmem:[%s6882_s13 + $0x58] sm:$0xff] %v3963_v14 }
 0x6dc   : > { %v3904_v8 = vpop.f32.mrb[40].mxu0  ;;  %v3945_v36 = vpop.f32.mrb[48].mxu1 }
 0x6dd   : > { %v3905_v45 = vadd.f32 %v3904_v8, %v6874_v55  ;;  %v3946_v40 = vadd.f32 %v3945_v36, %v6874_v55  ;;  %v3906_v10 = vpop.f32.mrb[41].mxu0  ;;  %v3947_v20 = vpop.f32.mrb[49].mxu1 }
 0x6de   : > { %v3907_v53 = vadd.f32 %v3906_v10, %v6874_v55  ;;  %v3948_v25 = vadd.f32 %v3947_v20, %v6874_v55  ;;  %v3908_v56 = vpop.f32.mrb[42].mxu0  ;;  %v3949_v4 = vpop.f32.mrb[50].mxu1 }
 0x6df   : > { %v3964_v18 = vmax.f32 %v3905_v45, 0.0  ;;  %v3966_v49 = vmax.f32 %v3946_v40, 0.0  ;;  %v3909_v51 = vpop.f32.mrb[43].mxu0  ;;  %v3950_v57 = vpop.f32.mrb[51].mxu1 }
 0x6e0   : > { %v3965_v22 = vmax.f32 %v3907_v53, 0.0  ;;  %v3967_v61 = vmax.f32 %v3948_v25, 0.0 }
 0x6e1   : > { %3980 = vst [vmem:[%s6882_s13 + $0x60] sm:$0xff] %v3964_v18  ;;  %3982 = vst [vmem:[%s6882_s13 + $0x70] sm:$0xff] %v3966_v49 }
 0x6e2   : > { %3981 = vst [vmem:[%s6882_s13 + $0x68] sm:$0xff] %v3965_v22  ;;  %3983 = vst [vmem:[%s6882_s13 + $0x78] sm:$0xff] %v3967_v61 }
 0x6e3 PF: > { %s21_s17 = sadd.s32 1, %s4378_s17  }
 0x6e4   : > { %p18_p4 = scmp.ge.s32.totalorder %s21_s17, 4  }
 0x6e6   :  { %20 = sbr.rel (!%p18_p4) target bundleno = 1 (0x1), region = 97 }

</bundles_post_ra>
